<compile_context>
chip_gen: v6e
topology: v6e:2x2x1
jax: 0.10.0
libtpu: 0.0.40
codegen_flags: <defaults>
</compile_context>

<pallas_src>
import functools

import jax
import jax.numpy as jnp
from jax.experimental import pallas as pl
from jax.experimental.pallas import tpu as pltpu

INI = 0.01
_KSIZES = (3, 4, 5)
# Actual per-call VMEM footprint here is a few hundred KB; 8 MiB leaves ample
# headroom while staying well inside v7x's 64 MiB physical VMEM.
_VMEM_LIMIT = 8 * 1024 * 1024

# Flip to jnp.bfloat16 on v6e/v7x to feed the bf16-native MXU (accumulation
# stays f32 via preferred_element_type; the raw-score glimpse matmul is kept
# f32 regardless).  f32 default keeps exact parity with the PyTorch reference
# and is the right choice on v5e.
MXU_DTYPE = jnp.float32


def _mx(x):
    return x.astype(MXU_DTYPE)


def _pad128(n):
    return ((n + 127) // 128) * 128


# -----------------------------------------------------------------------------
# Pallas kernels
# -----------------------------------------------------------------------------
def conv_encode_pallas(x_emb, conv_ws, conv_bs, conv_hidden):
    """Fused ConvSentEncoder: all kernel sizes, all sentences, one call.

    x_emb:   (N, L, E) embedded words for every sentence in the batch.
    conv_ws: list of (k*E, C) im2col-packed conv weights (row order: tap j
             outer, emb dim inner) for k in (3, 4, 5).
    conv_bs: list of (1, C) biases.
    returns  (N, 3*C): relu(conv).max-over-time per kernel size, concatenated.
    """
    N, L, E = x_emb.shape
    C = conv_hidden
    n_out = len(_KSIZES) * C
    out_pad = _pad128(n_out)

    # im2col in the wrapper: the tap shift-add folds into one matmul per k.
    xs = []
    for k in _KSIZES:
        lo = L - k + 1
        xk = jnp.concatenate([x_emb[:, j:j + lo, :] for j in range(k)], axis=-1)
        xs.append(xk.reshape(N * lo, k * E))

    def kernel(x3_ref, x4_ref, x5_ref, w3_ref, w4_ref, w5_ref,
               b3_ref, b4_ref, b5_ref, o_ref):
        x_refs = (x3_ref, x4_ref, x5_ref)
        w_refs = (w3_ref, w4_ref, w5_ref)
        b_refs = (b3_ref, b4_ref, b5_ref)
        feats = []
        for idx, k in enumerate(_KSIZES):
            lo = L - k + 1
            p = jnp.dot(_mx(x_refs[idx][...]), _mx(w_refs[idx][...]),
                        preferred_element_type=jnp.float32)        # (N*lo, C)
            p = jnp.maximum(p + b_refs[idx][...], 0.0)             # ReLU
            feats.append(jnp.max(p.reshape(N, lo, C), axis=1))     # max over time
        out = jnp.concatenate(feats, axis=-1)                      # (N, 3C)
        pad = out_pad - n_out
        if pad:
            out = jnp.concatenate(
                [out, jnp.zeros((N, pad), out.dtype)], axis=-1)
        o_ref[...] = out                                           # lane-dense store

    out = pl.pallas_call(
        kernel,
        out_shape=jax.ShapeDtypeStruct((N, out_pad), jnp.float32),
        compiler_params=pltpu.CompilerParams(vmem_limit_bytes=_VMEM_LIMIT),
    )(xs[0], xs[1], xs[2], conv_ws[0], conv_ws[1], conv_ws[2],
      conv_bs[0], conv_bs[1], conv_bs[2])
    return out[:, :n_out]


def lstm_layer_pallas(x, w_ih, w_hh, b, h0, c0):
    """One LSTM layer, both directions fused in a single (gridless) call.

    x:    (T, B, D)        layer input (NOT reversed; reversal handled inside).
    w_ih: (nd, D, 4H)      input->gates weights (gate order i, f, g, o).
    w_hh: (nd, H, 4H)      hidden->gates weights.
    b:    (nd, 1, 4H)      combined bias (b_ih + b_hh).
    h0,c0:(nd, B, H)
    returns (T, B, nd*H)   fwd ++ time-aligned bwd hidden states.
    """
    T, B, D = x.shape
    nd, _, G = w_ih.shape
    H = G // 4

    def kernel(x_ref, wih_ref, whh_ref, b_ref, h0_ref, c0_ref, o_ref):
        x2 = x_ref[...].reshape(T * B, D)
        dir_outs = []
        for d in range(nd):
            # Hoisted input projection: one (T*B, D) @ (D, 4H) matmul.
            gx = jnp.dot(_mx(x2), _mx(wih_ref[d]),
                         preferred_element_type=jnp.float32) + b_ref[d]
            gx = gx.reshape(T, B, G)
            whh = _mx(whh_ref[d])          # (H, 4H), read once, resident
            h = h0_ref[d]
            c = c0_ref[d]
            hs = [None] * T
            # T is small and static -> fully unrolled recurrence.
            # TODO(synk): switch to lax.fori_loop / partial unroll if T > ~16.
            for s in range(T):
                t = s if d == 0 else (T - 1 - s)
                gates = gx[t] + jnp.dot(_mx(h), whh,
                                        preferred_element_type=jnp.float32)
                sg = jax.nn.sigmoid(gates)   # full (B, 4H) vreg on the EUP
                tg = jnp.tanh(gates)
                i_g = sg[:, 0:H]
                f_g = sg[:, H:2 * H]
                g_g = tg[:, 2 * H:3 * H]
                o_g = sg[:, 3 * H:4 * H]
                c = f_g * c + i_g * g_g
                h = o_g * jnp.tanh(c)
                hs[t] = h
            dir_outs.append(jnp.stack(hs, axis=0))                 # (T, B, H)
        out = dir_outs[0] if nd == 1 else jnp.concatenate(dir_outs, axis=-1)
        o_ref[...] = out                                           # single store

    return pl.pallas_call(
        kernel,
        out_shape=jax.ShapeDtypeStruct((T, B, nd * H), jnp.float32),
        compiler_params=pltpu.CompilerParams(vmem_limit_bytes=_VMEM_LIMIT),
    )(x, w_ih, w_hh, b, h0, c0)


def pointer_attention_pallas(enc_out, query, wm2, attn_wq, attn_v,
                             hop_wq, hop_v, n_hop):
    """Fused pointer-net attention: projections + n_hop glimpses + final score.

    enc_out: (B, Ns, D); query: (B, Nq, H)
    wm2: (D, 2H) = [attn_wm | hop_wm]; *_wq: (H, H); *_v: (1, 1, H)
    returns unnormalized scores (B, Nq, Ns).
    NOTE: matches the reference exactly - `norm_score = score` overwrites the
    softmax, so no softmax / mem_sizes masking is applied in the glimpse.
    """
    B, Ns, D = enc_out.shape
    Nq = query.shape[1]
    H = attn_wq.shape[0]
    ns_pad = _pad128(Ns)

    def kernel(enc_ref, q_ref, wm_ref, awq_ref, av_ref, hwq_ref, hv_ref, o_ref):
        # Shared projection for the whole batch in one matmul.
        feat = jnp.dot(_mx(enc_ref[...].reshape(B * Ns, D)), _mx(wm_ref[...]),
                       preferred_element_type=jnp.float32).reshape(B, Ns, 2 * H)
        attn_feat = feat[..., 0:H]
        hop_feat = feat[..., H:2 * H]
        q = q_ref[...]                                             # (B, Nq, H)

        def score_fn(qcur, wq_ref, v_ref, mem_feat):
            qw = jnp.dot(_mx(qcur.reshape(B * Nq, H)), _mx(wq_ref[...]),
                         preferred_element_type=jnp.float32).reshape(B, Nq, H)
            t = jnp.tanh(mem_feat[:, None, :, :] + qw[:, :, None, :])
            return jnp.sum(t * v_ref[...][None], axis=-1)          # (B, Nq, Ns)

        for _ in range(n_hop):
            sc = score_fn(q, hwq_ref, hv_ref, hop_feat)
            # Raw (unnormalized) score, per the reference quirk; kept f32.
            q = jnp.einsum('bqs,bsh->bqh', sc, hop_feat,
                           preferred_element_type=jnp.float32)     # (B, Nq, H)
        score = score_fn(q, awq_ref, av_ref, attn_feat)            # (B, Nq, Ns)
        pad = ns_pad - Ns
        if pad:
            score = jnp.concatenate(
                [score, jnp.zeros((B, Nq, pad), score.dtype)], axis=-1)
        o_ref[...] = score                                         # lane-dense store

    out = pl.pallas_call(
        kernel,
        out_shape=jax.ShapeDtypeStruct((B, Nq, ns_pad), jnp.float32),
        compiler_params=pltpu.CompilerParams(vmem_limit_bytes=_VMEM_LIMIT),
    )(enc_out, query, wm2, attn_wq, attn_v, hop_wq, hop_v)
    return out[:, :, :Ns]


# -----------------------------------------------------------------------------
# Model glue (plain JAX: parameter setup, gathers, padding, stacking)
# -----------------------------------------------------------------------------
def init_params(key, vocab_size, emb_dim, conv_hidden, lstm_hidden, lstm_layer,
                bidirectional):
    keys = iter(jax.random.split(key, 256))

    def u(shape, lo=-0.1, hi=0.1):
        return jax.random.uniform(next(keys), shape, jnp.float32, lo, hi)

    p = {}
    emb = u((vocab_size, emb_dim))
    p["emb"] = emb.at[0].set(0.0)  # padding_idx = 0

    # ConvSentEncoder weights in im2col layout: (k*E, C) per kernel size.
    p["conv_w"] = [u((k * emb_dim, conv_hidden)) for k in _KSIZES]
    p["conv_b"] = [u((1, conv_hidden)) for _ in _KSIZES]

    num_dir = 2 if bidirectional else 1
    H = lstm_hidden

    def lstm_layer_params(din, nd):
        # separate W_ih^T / W_hh^T (gate order i, f, g, o) and combined bias
        return (u((nd, din, 4 * H)), u((nd, H, 4 * H)), u((nd, 1, 4 * H)))

    d_in_art = 3 * conv_hidden
    p["art_lstm"] = [
        lstm_layer_params(d_in_art if l == 0 else H * num_dir, num_dir)
        for l in range(lstm_layer)
    ]
    p["art_init_h"] = u((lstm_layer * num_dir, H), -INI, INI)
    p["art_init_c"] = u((lstm_layer * num_dir, H), -INI, INI)

    enc_dim = H * num_dir
    p["ptr_lstm"] = [
        lstm_layer_params(enc_dim if l == 0 else H, 1) for l in range(lstm_layer)
    ]
    p["ptr_init_h"] = u((lstm_layer, H), -INI, INI)
    p["ptr_init_c"] = u((lstm_layer, H), -INI, INI)
    p["ptr_init_i"] = u((enc_dim,), -0.1, 0.1)

    attn_wm = u((enc_dim, H))
    hop_wm = u((enc_dim, H))
    p["wm2"] = jnp.concatenate([attn_wm, hop_wm], axis=1)         # (enc_dim, 2H)
    p["attn_wq"] = u((H, H))
    p["attn_v"] = u((1, 1, H), -INI, INI)
    p["hop_wq"] = u((H, H))
    p["hop_v"] = u((1, 1, H), -INI, INI)
    return p


def run_lstm(x_tbd, layers, init_h, init_c):
    """x_tbd: (T, B, D) -> (T, B, H * num_dir).  num_dir inferred from weights."""
    _, B, _ = x_tbd.shape
    H = init_h.shape[-1]
    inp = x_tbd
    for l, (w_ih, w_hh, b) in enumerate(layers):
        nd = w_ih.shape[0]
        h0 = jnp.broadcast_to(init_h[l * nd:(l + 1) * nd, None, :], (nd, B, H))
        c0 = jnp.broadcast_to(init_c[l * nd:(l + 1) * nd, None, :], (nd, B, H))
        inp = lstm_layer_pallas(inp, w_ih, w_hh, b, h0, c0)       # (T, B, nd*H)
    return inp


@functools.partial(jax.jit, static_argnames=("sent_nums", "n_hop"))
def ptr_extract_summ_forward(p, article_sents, target, sent_nums, n_hop):
    # --- _encode: conv sentence encoder (all articles batched into ONE kernel) ---
    # TODO(synk): assumes all articles share the same word length L; ragged L
    #             would need per-length grouping before the fused conv call.
    all_ids = jnp.concatenate(article_sents, axis=0)              # (sum_n, L)
    x_emb = p["emb"][all_ids]                                     # (sum_n, L, E)
    conv_hidden = p["conv_b"][0].shape[1]
    enc_all = conv_encode_pallas(x_emb, p["conv_w"], p["conv_b"], conv_hidden)

    max_n = max(sent_nums)
    feat_dim = enc_all.shape[1]
    padded, start = [], 0
    for n in sent_nums:
        s = enc_all[start:start + n]
        start += n
        if n != max_n:
            s = jnp.concatenate(
                [s, jnp.zeros((max_n - n, feat_dim), s.dtype)], axis=0)
        padded.append(s)
    enc_sent = jnp.stack(padded, axis=0)                          # (bs, max_n, 3C)

    # --- article (bi-)LSTM over sentences ---
    lstm_out = run_lstm(jnp.transpose(enc_sent, (1, 0, 2)), p["art_lstm"],
                        p["art_init_h"], p["art_init_c"])
    enc_out = jnp.transpose(lstm_out, (1, 0, 2))                  # (bs, max_n, enc_dim)

    # --- ptr_in = gather(enc_out, target) ---
    bs, nt = target.shape
    d = enc_out.shape[2]
    idx = jnp.broadcast_to(target[:, :, None], (bs, nt, d))
    ptr_in = jnp.take_along_axis(enc_out, idx, axis=1)            # (bs, nt, enc_dim)

    # --- pointer network: LSTM over [init_i; ptr_in], then fused attention ---
    init_i = jnp.broadcast_to(p["ptr_init_i"][None, None, :], (bs, 1, d))
    lstm_in = jnp.concatenate([init_i, ptr_in], axis=1)           # (bs, nt+1, enc_dim)
    q = run_lstm(jnp.transpose(lstm_in, (1, 0, 2)), p["ptr_lstm"],
                 p["ptr_init_h"], p["ptr_init_c"])
    query = jnp.transpose(q, (1, 0, 2))                           # (bs, nt+1, H)

    return pointer_attention_pallas(enc_out, query, p["wm2"], p["attn_wq"],
                                    p["attn_v"], p["hop_wq"], p["hop_v"], n_hop)


# -----------------------------------------------------------------------------
if __name__ == "__main__":
    vocab_size, emb_dim, conv_hidden = 50, 32, 32
    lstm_hidden, lstm_layer, bidirectional, n_hop = 32, 1, True, 1

    key = jax.random.PRNGKey(0)
    k_param, k_s0, k_s1, k_tgt = jax.random.split(key, 4)

    params = init_params(k_param, vocab_size, emb_dim, conv_hidden,
                         lstm_hidden, lstm_layer, bidirectional)

    bs, L, nt = 2, 8, 3
    sent_nums = (6, 6)  # equal counts -> no packed-sequence ambiguity
    article_sents = (
        jax.random.randint(k_s0, (sent_nums[0], L), 1, vocab_size, dtype=jnp.int32),
        jax.random.randint(k_s1, (sent_nums[1], L), 1, vocab_size, dtype=jnp.int32),
    )
    target = jax.random.randint(k_tgt, (bs, nt), 0, max(sent_nums), dtype=jnp.int32)

    out = ptr_extract_summ_forward(params, article_sents, target,
                                   sent_nums=sent_nums, n_hop=n_hop)
    out = jax.block_until_ready(out)
    assert out.shape == (bs, nt + 1, max(sent_nums)), out.shape
    assert out.dtype == jnp.float32
    print("KERNEL_OK")
</pallas_src>

<mosaic_0001>
module attributes {stable_mosaic.version = 11 : i64} {
  func.func @kernel(%arg0: memref<72x96xf32, #tpu.memory_space<vmem>>, %arg1: memref<60x128xf32, #tpu.memory_space<vmem>>, %arg2: memref<48x160xf32, #tpu.memory_space<vmem>>, %arg3: memref<96x32xf32, #tpu.memory_space<vmem>>, %arg4: memref<128x32xf32, #tpu.memory_space<vmem>>, %arg5: memref<160x32xf32, #tpu.memory_space<vmem>>, %arg6: memref<1x32xf32, #tpu.memory_space<vmem>>, %arg7: memref<1x32xf32, #tpu.memory_space<vmem>>, %arg8: memref<1x32xf32, #tpu.memory_space<vmem>>, %arg9: memref<12x128xf32, #tpu.memory_space<vmem>>) attributes {dimension_semantics = [], scalar_prefetch = 0 : i64, scratch_operands = 0 : i64, tpu.core_type = #tpu.core_type<tc>} {
    %c0 = arith.constant 0 : index
    %c0_0 = arith.constant 0 : index
    %0 = vector.load %arg0[%c0, %c0_0] : memref<72x96xf32, #tpu.memory_space<vmem>>, vector<72x96xf32>
    %c0_1 = arith.constant 0 : index
    %c0_2 = arith.constant 0 : index
    %1 = vector.load %arg3[%c0_1, %c0_2] : memref<96x32xf32, #tpu.memory_space<vmem>>, vector<96x32xf32>
    %cst = arith.constant dense<0.000000e+00> : vector<72x32xf32>
    %2 = tpu.matmul %0, %1, %cst {dimension_numbers = #tpu.dot_dimension_numbers<[1], [0], [0], [1], [0, 0, 1, 1], [], []>} : vector<72x96xf32>, vector<96x32xf32>, vector<72x32xf32> -> vector<72x32xf32>
    %c0_3 = arith.constant 0 : index
    %c0_4 = arith.constant 0 : index
    %3 = vector.load %arg6[%c0_3, %c0_4] : memref<1x32xf32, #tpu.memory_space<vmem>>, vector<1x32xf32>
    %4 = vector.broadcast %3 : vector<1x32xf32> to vector<72x32xf32>
    %5 = arith.addf %2, %4 : vector<72x32xf32>
    %cst_5 = arith.constant 0.000000e+00 : f32
    %6 = vector.broadcast %cst_5 : f32 to vector<72x32xf32>
    %7 = arith.maximumf %5, %6 : vector<72x32xf32>
    %8 = vector.shape_cast %7 : vector<72x32xf32> to vector<12x6x32xf32>
    %cst_6 = arith.constant dense<0xFF800000> : vector<12x32xf32>
    %9 = vector.multi_reduction <maximumf>, %8, %cst_6 [1] : vector<12x6x32xf32> to vector<12x32xf32>
    %c0_7 = arith.constant 0 : index
    %c0_8 = arith.constant 0 : index
    %10 = vector.load %arg1[%c0_7, %c0_8] : memref<60x128xf32, #tpu.memory_space<vmem>>, vector<60x128xf32>
    %c0_9 = arith.constant 0 : index
    %c0_10 = arith.constant 0 : index
    %11 = vector.load %arg4[%c0_9, %c0_10] : memref<128x32xf32, #tpu.memory_space<vmem>>, vector<128x32xf32>
    %cst_11 = arith.constant dense<0.000000e+00> : vector<60x32xf32>
    %12 = tpu.matmul %10, %11, %cst_11 {dimension_numbers = #tpu.dot_dimension_numbers<[1], [0], [0], [1], [0, 0, 1, 1], [], []>} : vector<60x128xf32>, vector<128x32xf32>, vector<60x32xf32> -> vector<60x32xf32>
    %c0_12 = arith.constant 0 : index
    %c0_13 = arith.constant 0 : index
    %13 = vector.load %arg7[%c0_12, %c0_13] : memref<1x32xf32, #tpu.memory_space<vmem>>, vector<1x32xf32>
    %14 = vector.broadcast %13 : vector<1x32xf32> to vector<60x32xf32>
    %15 = arith.addf %12, %14 : vector<60x32xf32>
    %cst_14 = arith.constant 0.000000e+00 : f32
    %16 = vector.broadcast %cst_14 : f32 to vector<60x32xf32>
    %17 = arith.maximumf %15, %16 : vector<60x32xf32>
    %18 = vector.shape_cast %17 : vector<60x32xf32> to vector<12x5x32xf32>
    %cst_15 = arith.constant dense<0xFF800000> : vector<12x32xf32>
    %19 = vector.multi_reduction <maximumf>, %18, %cst_15 [1] : vector<12x5x32xf32> to vector<12x32xf32>
    %c0_16 = arith.constant 0 : index
    %c0_17 = arith.constant 0 : index
    %20 = vector.load %arg2[%c0_16, %c0_17] : memref<48x160xf32, #tpu.memory_space<vmem>>, vector<48x160xf32>
    %c0_18 = arith.constant 0 : index
    %c0_19 = arith.constant 0 : index
    %21 = vector.load %arg5[%c0_18, %c0_19] : memref<160x32xf32, #tpu.memory_space<vmem>>, vector<160x32xf32>
    %cst_20 = arith.constant dense<0.000000e+00> : vector<48x32xf32>
    %22 = tpu.matmul %20, %21, %cst_20 {dimension_numbers = #tpu.dot_dimension_numbers<[1], [0], [0], [1], [0, 0, 1, 1], [], []>} : vector<48x160xf32>, vector<160x32xf32>, vector<48x32xf32> -> vector<48x32xf32>
    %c0_21 = arith.constant 0 : index
    %c0_22 = arith.constant 0 : index
    %23 = vector.load %arg8[%c0_21, %c0_22] : memref<1x32xf32, #tpu.memory_space<vmem>>, vector<1x32xf32>
    %24 = vector.broadcast %23 : vector<1x32xf32> to vector<48x32xf32>
    %25 = arith.addf %22, %24 : vector<48x32xf32>
    %cst_23 = arith.constant 0.000000e+00 : f32
    %26 = vector.broadcast %cst_23 : f32 to vector<48x32xf32>
    %27 = arith.maximumf %25, %26 : vector<48x32xf32>
    %28 = vector.shape_cast %27 : vector<48x32xf32> to vector<12x4x32xf32>
    %cst_24 = arith.constant dense<0xFF800000> : vector<12x32xf32>
    %29 = vector.multi_reduction <maximumf>, %28, %cst_24 [1] : vector<12x4x32xf32> to vector<12x32xf32>
    %30 = tpu.concatenate %9, %19, %29 in 1 : vector<12x32xf32>, vector<12x32xf32>, vector<12x32xf32> -> vector<12x96xf32>
    %cst_25 = arith.constant 0.000000e+00 : f32
    %31 = vector.broadcast %cst_25 : f32 to vector<12x32xf32>
    %32 = tpu.concatenate %30, %31 in 1 : vector<12x96xf32>, vector<12x32xf32> -> vector<12x128xf32>
    %c0_26 = arith.constant 0 : index
    %c0_27 = arith.constant 0 : index
    %33 = vector.load %arg9[%c0_26, %c0_27] : memref<12x128xf32, #tpu.memory_space<vmem>>, vector<12x128xf32>
    tpu.vector_store %arg9[%c0_26, %c0_27], %32 {strides = array<i32>} : memref<12x128xf32, #tpu.memory_space<vmem>>, vector<12x128xf32>,
    return
  }
}

module attributes {stable_mosaic.version = 11 : i64} {
  func.func @kernel(%arg0: memref<6x2x96xf32, #tpu.memory_space<vmem>>, %arg1: memref<2x96x128xf32, #tpu.memory_space<vmem>>, %arg2: memref<2x32x128xf32, #tpu.memory_space<vmem>>, %arg3: memref<2x1x128xf32, #tpu.memory_space<vmem>>, %arg4: memref<2x2x32xf32, #tpu.memory_space<vmem>>, %arg5: memref<2x2x32xf32, #tpu.memory_space<vmem>>, %arg6: memref<6x2x64xf32, #tpu.memory_space<vmem>>) attributes {dimension_semantics = [], scalar_prefetch = 0 : i64, scratch_operands = 0 : i64, tpu.core_type = #tpu.core_type<tc>} {
    %c0 = arith.constant 0 : index
    %c0_0 = arith.constant 0 : index
    %c0_1 = arith.constant 0 : index
    %0 = vector.load %arg0[%c0, %c0_0, %c0_1] : memref<6x2x96xf32, #tpu.memory_space<vmem>>, vector<6x2x96xf32>
    %1 = vector.shape_cast %0 : vector<6x2x96xf32> to vector<12x96xf32>
    %c0_2 = arith.constant 0 : index
    %c0_3 = arith.constant 0 : index
    %c0_4 = arith.constant 0 : index
    %2 = vector.load %arg1[%c0_2, %c0_3, %c0_4] : memref<2x96x128xf32, #tpu.memory_space<vmem>>, vector<1x96x128xf32>
    %3 = vector.shape_cast %2 : vector<1x96x128xf32> to vector<96x128xf32>
    %cst = arith.constant dense<0.000000e+00> : vector<12x128xf32>
    %4 = tpu.matmul %1, %3, %cst {dimension_numbers = #tpu.dot_dimension_numbers<[1], [0], [0], [1], [0, 0, 1, 1], [], []>} : vector<12x96xf32>, vector<96x128xf32>, vector<12x128xf32> -> vector<12x128xf32>
    %c0_5 = arith.constant 0 : index
    %c0_6 = arith.constant 0 : index
    %c0_7 = arith.constant 0 : index
    %5 = vector.load %arg3[%c0_5, %c0_6, %c0_7] : memref<2x1x128xf32, #tpu.memory_space<vmem>>, vector<1x1x128xf32>
    %6 = vector.shape_cast %5 : vector<1x1x128xf32> to vector<1x128xf32>
    %7 = vector.broadcast %6 : vector<1x128xf32> to vector<12x128xf32>
    %8 = arith.addf %4, %7 : vector<12x128xf32>
    %9 = vector.shape_cast %8 : vector<12x128xf32> to vector<6x2x128xf32>
    %c0_8 = arith.constant 0 : index
    %c0_9 = arith.constant 0 : index
    %c0_10 = arith.constant 0 : index
    %10 = vector.load %arg2[%c0_8, %c0_9, %c0_10] : memref<2x32x128xf32, #tpu.memory_space<vmem>>, vector<1x32x128xf32>
    %11 = vector.shape_cast %10 : vector<1x32x128xf32> to vector<32x128xf32>
    %c0_11 = arith.constant 0 : index
    %c0_12 = arith.constant 0 : index
    %c0_13 = arith.constant 0 : index
    %12 = vector.load %arg4[%c0_11, %c0_12, %c0_13] : memref<2x2x32xf32, #tpu.memory_space<vmem>>, vector<1x2x32xf32>
    %13 = vector.shape_cast %12 : vector<1x2x32xf32> to vector<2x32xf32>
    %c0_14 = arith.constant 0 : index
    %c0_15 = arith.constant 0 : index
    %c0_16 = arith.constant 0 : index
    %14 = vector.load %arg5[%c0_14, %c0_15, %c0_16] : memref<2x2x32xf32, #tpu.memory_space<vmem>>, vector<1x2x32xf32>
    %15 = vector.shape_cast %14 : vector<1x2x32xf32> to vector<2x32xf32>
    %16 = vector.extract_strided_slice %9 {offsets = [0, 0, 0], sizes = [1, 2, 128], strides = [1, 1, 1]} : vector<6x2x128xf32> to vector<1x2x128xf32>
    %17 = vector.shape_cast %16 : vector<1x2x128xf32> to vector<2x128xf32>
    %cst_17 = arith.constant dense<0.000000e+00> : vector<2x128xf32>
    %18 = tpu.matmul %13, %11, %cst_17 {dimension_numbers = #tpu.dot_dimension_numbers<[1], [0], [0], [1], [0, 0, 1, 1], [], []>} : vector<2x32xf32>, vector<32x128xf32>, vector<2x128xf32> -> vector<2x128xf32>
    %19 = arith.addf %17, %18 : vector<2x128xf32>
    %20 = arith.negf %19 : vector<2x128xf32>
    %21 = math.exp %20 : vector<2x128xf32>
    %cst_18 = arith.constant 1.000000e+00 : f32
    %22 = vector.broadcast %cst_18 : f32 to vector<2x128xf32>
    %23 = arith.addf %22, %21 : vector<2x128xf32>
    %24 = arith.divf %22, %23 : vector<2x128xf32>
    %25 = math.tanh %19 : vector<2x128xf32>
    %26 = vector.extract_strided_slice %24 {offsets = [0, 0], sizes = [2, 32], strides = [1, 1]} : vector<2x128xf32> to vector<2x32xf32>
    %27 = vector.extract_strided_slice %24 {offsets = [0, 32], sizes = [2, 32], strides = [1, 1]} : vector<2x128xf32> to vector<2x32xf32>
    %28 = vector.extract_strided_slice %25 {offsets = [0, 64], sizes = [2, 32], strides = [1, 1]} : vector<2x128xf32> to vector<2x32xf32>
    %29 = vector.extract_strided_slice %24 {offsets = [0, 96], sizes = [2, 32], strides = [1, 1]} : vector<2x128xf32> to vector<2x32xf32>
    %30 = arith.mulf %27, %15 : vector<2x32xf32>
    %31 = arith.mulf %26, %28 : vector<2x32xf32>
    %32 = arith.addf %30, %31 : vector<2x32xf32>
    %33 = math.tanh %32 : vector<2x32xf32>
    %34 = arith.mulf %29, %33 : vector<2x32xf32>
    %35 = vector.extract_strided_slice %9 {offsets = [1, 0, 0], sizes = [1, 2, 128], strides = [1, 1, 1]} : vector<6x2x128xf32> to vector<1x2x128xf32>
    %36 = vector.shape_cast %35 : vector<1x2x128xf32> to vector<2x128xf32>
    %cst_19 = arith.constant dense<0.000000e+00> : vector<2x128xf32>
    %37 = tpu.matmul %34, %11, %cst_19 {dimension_numbers = #tpu.dot_dimension_numbers<[1], [0], [0], [1], [0, 0, 1, 1], [], []>} : vector<2x32xf32>, vector<32x128xf32>, vector<2x128xf32> -> vector<2x128xf32>
    %38 = arith.addf %36, %37 : vector<2x128xf32>
    %39 = arith.negf %38 : vector<2x128xf32>
    %40 = math.exp %39 : vector<2x128xf32>
    %cst_20 = arith.constant 1.000000e+00 : f32
    %41 = vector.broadcast %cst_20 : f32 to vector<2x128xf32>
    %42 = arith.addf %41, %40 : vector<2x128xf32>
    %43 = arith.divf %41, %42 : vector<2x128xf32>
    %44 = math.tanh %38 : vector<2x128xf32>
    %45 = vector.extract_strided_slice %43 {offsets = [0, 0], sizes = [2, 32], strides = [1, 1]} : vector<2x128xf32> to vector<2x32xf32>
    %46 = vector.extract_strided_slice %43 {offsets = [0, 32], sizes = [2, 32], strides = [1, 1]} : vector<2x128xf32> to vector<2x32xf32>
    %47 = vector.extract_strided_slice %44 {offsets = [0, 64], sizes = [2, 32], strides = [1, 1]} : vector<2x128xf32> to vector<2x32xf32>
    %48 = vector.extract_strided_slice %43 {offsets = [0, 96], sizes = [2, 32], strides = [1, 1]} : vector<2x128xf32> to vector<2x32xf32>
    %49 = arith.mulf %46, %32 : vector<2x32xf32>
    %50 = arith.mulf %45, %47 : vector<2x32xf32>
    %51 = arith.addf %49, %50 : vector<2x32xf32>
    %52 = math.tanh %51 : vector<2x32xf32>
    %53 = arith.mulf %48, %52 : vector<2x32xf32>
    %54 = vector.extract_strided_slice %9 {offsets = [2, 0, 0], sizes = [1, 2, 128], strides = [1, 1, 1]} : vector<6x2x128xf32> to vector<1x2x128xf32>
    %55 = vector.shape_cast %54 : vector<1x2x128xf32> to vector<2x128xf32>
    %cst_21 = arith.constant dense<0.000000e+00> : vector<2x128xf32>
    %56 = tpu.matmul %53, %11, %cst_21 {dimension_numbers = #tpu.dot_dimension_numbers<[1], [0], [0], [1], [0, 0, 1, 1], [], []>} : vector<2x32xf32>, vector<32x128xf32>, vector<2x128xf32> -> vector<2x128xf32>
    %57 = arith.addf %55, %56 : vector<2x128xf32>
    %58 = arith.negf %57 : vector<2x128xf32>
    %59 = math.exp %58 : vector<2x128xf32>
    %cst_22 = arith.constant 1.000000e+00 : f32
    %60 = vector.broadcast %cst_22 : f32 to vector<2x128xf32>
    %61 = arith.addf %60, %59 : vector<2x128xf32>
    %62 = arith.divf %60, %61 : vector<2x128xf32>
    %63 = math.tanh %57 : vector<2x128xf32>
    %64 = vector.extract_strided_slice %62 {offsets = [0, 0], sizes = [2, 32], strides = [1, 1]} : vector<2x128xf32> to vector<2x32xf32>
    %65 = vector.extract_strided_slice %62 {offsets = [0, 32], sizes = [2, 32], strides = [1, 1]} : vector<2x128xf32> to vector<2x32xf32>
    %66 = vector.extract_strided_slice %63 {offsets = [0, 64], sizes = [2, 32], strides = [1, 1]} : vector<2x128xf32> to vector<2x32xf32>
    %67 = vector.extract_strided_slice %62 {offsets = [0, 96], sizes = [2, 32], strides = [1, 1]} : vector<2x128xf32> to vector<2x32xf32>
    %68 = arith.mulf %65, %51 : vector<2x32xf32>
    %69 = arith.mulf %64, %66 : vector<2x32xf32>
    %70 = arith.addf %68, %69 : vector<2x32xf32>
    %71 = math.tanh %70 : vector<2x32xf32>
    %72 = arith.mulf %67, %71 : vector<2x32xf32>
    %73 = vector.extract_strided_slice %9 {offsets = [3, 0, 0], sizes = [1, 2, 128], strides = [1, 1, 1]} : vector<6x2x128xf32> to vector<1x2x128xf32>
    %74 = vector.shape_cast %73 : vector<1x2x128xf32> to vector<2x128xf32>
    %cst_23 = arith.constant dense<0.000000e+00> : vector<2x128xf32>
    %75 = tpu.matmul %72, %11, %cst_23 {dimension_numbers = #tpu.dot_dimension_numbers<[1], [0], [0], [1], [0, 0, 1, 1], [], []>} : vector<2x32xf32>, vector<32x128xf32>, vector<2x128xf32> -> vector<2x128xf32>
    %76 = arith.addf %74, %75 : vector<2x128xf32>
    %77 = arith.negf %76 : vector<2x128xf32>
    %78 = math.exp %77 : vector<2x128xf32>
    %cst_24 = arith.constant 1.000000e+00 : f32
    %79 = vector.broadcast %cst_24 : f32 to vector<2x128xf32>
    %80 = arith.addf %79, %78 : vector<2x128xf32>
    %81 = arith.divf %79, %80 : vector<2x128xf32>
    %82 = math.tanh %76 : vector<2x128xf32>
    %83 = vector.extract_strided_slice %81 {offsets = [0, 0], sizes = [2, 32], strides = [1, 1]} : vector<2x128xf32> to vector<2x32xf32>
    %84 = vector.extract_strided_slice %81 {offsets = [0, 32], sizes = [2, 32], strides = [1, 1]} : vector<2x128xf32> to vector<2x32xf32>
    %85 = vector.extract_strided_slice %82 {offsets = [0, 64], sizes = [2, 32], strides = [1, 1]} : vector<2x128xf32> to vector<2x32xf32>
    %86 = vector.extract_strided_slice %81 {offsets = [0, 96], sizes = [2, 32], strides = [1, 1]} : vector<2x128xf32> to vector<2x32xf32>
    %87 = arith.mulf %84, %70 : vector<2x32xf32>
    %88 = arith.mulf %83, %85 : vector<2x32xf32>
    %89 = arith.addf %87, %88 : vector<2x32xf32>
    %90 = math.tanh %89 : vector<2x32xf32>
    %91 = arith.mulf %86, %90 : vector<2x32xf32>
    %92 = vector.extract_strided_slice %9 {offsets = [4, 0, 0], sizes = [1, 2, 128], strides = [1, 1, 1]} : vector<6x2x128xf32> to vector<1x2x128xf32>
    %93 = vector.shape_cast %92 : vector<1x2x128xf32> to vector<2x128xf32>
    %cst_25 = arith.constant dense<0.000000e+00> : vector<2x128xf32>
    %94 = tpu.matmul %91, %11, %cst_25 {dimension_numbers = #tpu.dot_dimension_numbers<[1], [0], [0], [1], [0, 0, 1, 1], [], []>} : vector<2x32xf32>, vector<32x128xf32>, vector<2x128xf32> -> vector<2x128xf32>
    %95 = arith.addf %93, %94 : vector<2x128xf32>
    %96 = arith.negf %95 : vector<2x128xf32>
    %97 = math.exp %96 : vector<2x128xf32>
    %cst_26 = arith.constant 1.000000e+00 : f32
    %98 = vector.broadcast %cst_26 : f32 to vector<2x128xf32>
    %99 = arith.addf %98, %97 : vector<2x128xf32>
    %100 = arith.divf %98, %99 : vector<2x128xf32>
    %101 = math.tanh %95 : vector<2x128xf32>
    %102 = vector.extract_strided_slice %100 {offsets = [0, 0], sizes = [2, 32], strides = [1, 1]} : vector<2x128xf32> to vector<2x32xf32>
    %103 = vector.extract_strided_slice %100 {offsets = [0, 32], sizes = [2, 32], strides = [1, 1]} : vector<2x128xf32> to vector<2x32xf32>
    %104 = vector.extract_strided_slice %101 {offsets = [0, 64], sizes = [2, 32], strides = [1, 1]} : vector<2x128xf32> to vector<2x32xf32>
    %105 = vector.extract_strided_slice %100 {offsets = [0, 96], sizes = [2, 32], strides = [1, 1]} : vector<2x128xf32> to vector<2x32xf32>
    %106 = arith.mulf %103, %89 : vector<2x32xf32>
    %107 = arith.mulf %102, %104 : vector<2x32xf32>
    %108 = arith.addf %106, %107 : vector<2x32xf32>
    %109 = math.tanh %108 : vector<2x32xf32>
    %110 = arith.mulf %105, %109 : vector<2x32xf32>
    %111 = vector.extract_strided_slice %9 {offsets = [5, 0, 0], sizes = [1, 2, 128], strides = [1, 1, 1]} : vector<6x2x128xf32> to vector<1x2x128xf32>
    %112 = vector.shape_cast %111 : vector<1x2x128xf32> to vector<2x128xf32>
    %cst_27 = arith.constant dense<0.000000e+00> : vector<2x128xf32>
    %113 = tpu.matmul %110, %11, %cst_27 {dimension_numbers = #tpu.dot_dimension_numbers<[1], [0], [0], [1], [0, 0, 1, 1], [], []>} : vector<2x32xf32>, vector<32x128xf32>, vector<2x128xf32> -> vector<2x128xf32>
    %114 = arith.addf %112, %113 : vector<2x128xf32>
    %115 = arith.negf %114 : vector<2x128xf32>
    %116 = math.exp %115 : vector<2x128xf32>
    %cst_28 = arith.constant 1.000000e+00 : f32
    %117 = vector.broadcast %cst_28 : f32 to vector<2x128xf32>
    %118 = arith.addf %117, %116 : vector<2x128xf32>
    %119 = arith.divf %117, %118 : vector<2x128xf32>
    %120 = math.tanh %114 : vector<2x128xf32>
    %121 = vector.extract_strided_slice %119 {offsets = [0, 0], sizes = [2, 32], strides = [1, 1]} : vector<2x128xf32> to vector<2x32xf32>
    %122 = vector.extract_strided_slice %119 {offsets = [0, 32], sizes = [2, 32], strides = [1, 1]} : vector<2x128xf32> to vector<2x32xf32>
    %123 = vector.extract_strided_slice %120 {offsets = [0, 64], sizes = [2, 32], strides = [1, 1]} : vector<2x128xf32> to vector<2x32xf32>
    %124 = vector.extract_strided_slice %119 {offsets = [0, 96], sizes = [2, 32], strides = [1, 1]} : vector<2x128xf32> to vector<2x32xf32>
    %125 = arith.mulf %122, %108 : vector<2x32xf32>
    %126 = arith.mulf %121, %123 : vector<2x32xf32>
    %127 = arith.addf %125, %126 : vector<2x32xf32>
    %128 = math.tanh %127 : vector<2x32xf32>
    %129 = arith.mulf %124, %128 : vector<2x32xf32>
    %130 = vector.shape_cast %34 : vector<2x32xf32> to vector<1x2x32xf32>
    %131 = vector.shape_cast %53 : vector<2x32xf32> to vector<1x2x32xf32>
    %132 = vector.shape_cast %72 : vector<2x32xf32> to vector<1x2x32xf32>
    %133 = vector.shape_cast %91 : vector<2x32xf32> to vector<1x2x32xf32>
    %134 = vector.shape_cast %110 : vector<2x32xf32> to vector<1x2x32xf32>
    %135 = vector.shape_cast %129 : vector<2x32xf32> to vector<1x2x32xf32>
    %136 = tpu.concatenate %130, %131, %132, %133, %134, %135 in 0 : vector<1x2x32xf32>, vector<1x2x32xf32>, vector<1x2x32xf32>, vector<1x2x32xf32>, vector<1x2x32xf32>, vector<1x2x32xf32> -> vector<6x2x32xf32>
    %c1 = arith.constant 1 : index
    %c0_29 = arith.constant 0 : index
    %c0_30 = arith.constant 0 : index
    %137 = vector.load %arg1[%c1, %c0_29, %c0_30] : memref<2x96x128xf32, #tpu.memory_space<vmem>>, vector<1x96x128xf32>
    %138 = vector.shape_cast %137 : vector<1x96x128xf32> to vector<96x128xf32>
    %cst_31 = arith.constant dense<0.000000e+00> : vector<12x128xf32>
    %139 = tpu.matmul %1, %138, %cst_31 {dimension_numbers = #tpu.dot_dimension_numbers<[1], [0], [0], [1], [0, 0, 1, 1], [], []>} : vector<12x96xf32>, vector<96x128xf32>, vector<12x128xf32> -> vector<12x128xf32>
    %c1_32 = arith.constant 1 : index
    %c0_33 = arith.constant 0 : index
    %c0_34 = arith.constant 0 : index
    %140 = vector.load %arg3[%c1_32, %c0_33, %c0_34] : memref<2x1x128xf32, #tpu.memory_space<vmem>>, vector<1x1x128xf32>
    %141 = vector.shape_cast %140 : vector<1x1x128xf32> to vector<1x128xf32>
    %142 = vector.broadcast %141 : vector<1x128xf32> to vector<12x128xf32>
    %143 = arith.addf %139, %142 : vector<12x128xf32>
    %144 = vector.shape_cast %143 : vector<12x128xf32> to vector<6x2x128xf32>
    %c1_35 = arith.constant 1 : index
    %c0_36 = arith.constant 0 : index
    %c0_37 = arith.constant 0 : index
    %145 = vector.load %arg2[%c1_35, %c0_36, %c0_37] : memref<2x32x128xf32, #tpu.memory_space<vmem>>, vector<1x32x128xf32>
    %146 = vector.shape_cast %145 : vector<1x32x128xf32> to vector<32x128xf32>
    %c1_38 = arith.constant 1 : index
    %c0_39 = arith.constant 0 : index
    %c0_40 = arith.constant 0 : index
    %147 = vector.load %arg4[%c1_38, %c0_39, %c0_40] : memref<2x2x32xf32, #tpu.memory_space<vmem>>, vector<1x2x32xf32>
    %148 = vector.shape_cast %147 : vector<1x2x32xf32> to vector<2x32xf32>
    %c1_41 = arith.constant 1 : index
    %c0_42 = arith.constant 0 : index
    %c0_43 = arith.constant 0 : index
    %149 = vector.load %arg5[%c1_41, %c0_42, %c0_43] : memref<2x2x32xf32, #tpu.memory_space<vmem>>, vector<1x2x32xf32>
    %150 = vector.shape_cast %149 : vector<1x2x32xf32> to vector<2x32xf32>
    %151 = vector.extract_strided_slice %144 {offsets = [5, 0, 0], sizes = [1, 2, 128], strides = [1, 1, 1]} : vector<6x2x128xf32> to vector<1x2x128xf32>
    %152 = vector.shape_cast %151 : vector<1x2x128xf32> to vector<2x128xf32>
    %cst_44 = arith.constant dense<0.000000e+00> : vector<2x128xf32>
    %153 = tpu.matmul %148, %146, %cst_44 {dimension_numbers = #tpu.dot_dimension_numbers<[1], [0], [0], [1], [0, 0, 1, 1], [], []>} : vector<2x32xf32>, vector<32x128xf32>, vector<2x128xf32> -> vector<2x128xf32>
    %154 = arith.addf %152, %153 : vector<2x128xf32>
    %155 = arith.negf %154 : vector<2x128xf32>
    %156 = math.exp %155 : vector<2x128xf32>
    %cst_45 = arith.constant 1.000000e+00 : f32
    %157 = vector.broadcast %cst_45 : f32 to vector<2x128xf32>
    %158 = arith.addf %157, %156 : vector<2x128xf32>
    %159 = arith.divf %157, %158 : vector<2x128xf32>
    %160 = math.tanh %154 : vector<2x128xf32>
    %161 = vector.extract_strided_slice %159 {offsets = [0, 0], sizes = [2, 32], strides = [1, 1]} : vector<2x128xf32> to vector<2x32xf32>
    %162 = vector.extract_strided_slice %159 {offsets = [0, 32], sizes = [2, 32], strides = [1, 1]} : vector<2x128xf32> to vector<2x32xf32>
    %163 = vector.extract_strided_slice %160 {offsets = [0, 64], sizes = [2, 32], strides = [1, 1]} : vector<2x128xf32> to vector<2x32xf32>
    %164 = vector.extract_strided_slice %159 {offsets = [0, 96], sizes = [2, 32], strides = [1, 1]} : vector<2x128xf32> to vector<2x32xf32>
    %165 = arith.mulf %162, %150 : vector<2x32xf32>
    %166 = arith.mulf %161, %163 : vector<2x32xf32>
    %167 = arith.addf %165, %166 : vector<2x32xf32>
    %168 = math.tanh %167 : vector<2x32xf32>
    %169 = arith.mulf %164, %168 : vector<2x32xf32>
    %170 = vector.extract_strided_slice %144 {offsets = [4, 0, 0], sizes = [1, 2, 128], strides = [1, 1, 1]} : vector<6x2x128xf32> to vector<1x2x128xf32>
    %171 = vector.shape_cast %170 : vector<1x2x128xf32> to vector<2x128xf32>
    %cst_46 = arith.constant dense<0.000000e+00> : vector<2x128xf32>
    %172 = tpu.matmul %169, %146, %cst_46 {dimension_numbers = #tpu.dot_dimension_numbers<[1], [0], [0], [1], [0, 0, 1, 1], [], []>} : vector<2x32xf32>, vector<32x128xf32>, vector<2x128xf32> -> vector<2x128xf32>
    %173 = arith.addf %171, %172 : vector<2x128xf32>
    %174 = arith.negf %173 : vector<2x128xf32>
    %175 = math.exp %174 : vector<2x128xf32>
    %cst_47 = arith.constant 1.000000e+00 : f32
    %176 = vector.broadcast %cst_47 : f32 to vector<2x128xf32>
    %177 = arith.addf %176, %175 : vector<2x128xf32>
    %178 = arith.divf %176, %177 : vector<2x128xf32>
    %179 = math.tanh %173 : vector<2x128xf32>
    %180 = vector.extract_strided_slice %178 {offsets = [0, 0], sizes = [2, 32], strides = [1, 1]} : vector<2x128xf32> to vector<2x32xf32>
    %181 = vector.extract_strided_slice %178 {offsets = [0, 32], sizes = [2, 32], strides = [1, 1]} : vector<2x128xf32> to vector<2x32xf32>
    %182 = vector.extract_strided_slice %179 {offsets = [0, 64], sizes = [2, 32], strides = [1, 1]} : vector<2x128xf32> to vector<2x32xf32>
    %183 = vector.extract_strided_slice %178 {offsets = [0, 96], sizes = [2, 32], strides = [1, 1]} : vector<2x128xf32> to vector<2x32xf32>
    %184 = arith.mulf %181, %167 : vector<2x32xf32>
    %185 = arith.mulf %180, %182 : vector<2x32xf32>
    %186 = arith.addf %184, %185 : vector<2x32xf32>
    %187 = math.tanh %186 : vector<2x32xf32>
    %188 = arith.mulf %183, %187 : vector<2x32xf32>
    %189 = vector.extract_strided_slice %144 {offsets = [3, 0, 0], sizes = [1, 2, 128], strides = [1, 1, 1]} : vector<6x2x128xf32> to vector<1x2x128xf32>
    %190 = vector.shape_cast %189 : vector<1x2x128xf32> to vector<2x128xf32>
    %cst_48 = arith.constant dense<0.000000e+00> : vector<2x128xf32>
    %191 = tpu.matmul %188, %146, %cst_48 {dimension_numbers = #tpu.dot_dimension_numbers<[1], [0], [0], [1], [0, 0, 1, 1], [], []>} : vector<2x32xf32>, vector<32x128xf32>, vector<2x128xf32> -> vector<2x128xf32>
    %192 = arith.addf %190, %191 : vector<2x128xf32>
    %193 = arith.negf %192 : vector<2x128xf32>
    %194 = math.exp %193 : vector<2x128xf32>
    %cst_49 = arith.constant 1.000000e+00 : f32
    %195 = vector.broadcast %cst_49 : f32 to vector<2x128xf32>
    %196 = arith.addf %195, %194 : vector<2x128xf32>
    %197 = arith.divf %195, %196 : vector<2x128xf32>
    %198 = math.tanh %192 : vector<2x128xf32>
    %199 = vector.extract_strided_slice %197 {offsets = [0, 0], sizes = [2, 32], strides = [1, 1]} : vector<2x128xf32> to vector<2x32xf32>
    %200 = vector.extract_strided_slice %197 {offsets = [0, 32], sizes = [2, 32], strides = [1, 1]} : vector<2x128xf32> to vector<2x32xf32>
    %201 = vector.extract_strided_slice %198 {offsets = [0, 64], sizes = [2, 32], strides = [1, 1]} : vector<2x128xf32> to vector<2x32xf32>
    %202 = vector.extract_strided_slice %197 {offsets = [0, 96], sizes = [2, 32], strides = [1, 1]} : vector<2x128xf32> to vector<2x32xf32>
    %203 = arith.mulf %200, %186 : vector<2x32xf32>
    %204 = arith.mulf %199, %201 : vector<2x32xf32>
    %205 = arith.addf %203, %204 : vector<2x32xf32>
    %206 = math.tanh %205 : vector<2x32xf32>
    %207 = arith.mulf %202, %206 : vector<2x32xf32>
    %208 = vector.extract_strided_slice %144 {offsets = [2, 0, 0], sizes = [1, 2, 128], strides = [1, 1, 1]} : vector<6x2x128xf32> to vector<1x2x128xf32>
    %209 = vector.shape_cast %208 : vector<1x2x128xf32> to vector<2x128xf32>
    %cst_50 = arith.constant dense<0.000000e+00> : vector<2x128xf32>
    %210 = tpu.matmul %207, %146, %cst_50 {dimension_numbers = #tpu.dot_dimension_numbers<[1], [0], [0], [1], [0, 0, 1, 1], [], []>} : vector<2x32xf32>, vector<32x128xf32>, vector<2x128xf32> -> vector<2x128xf32>
    %211 = arith.addf %209, %210 : vector<2x128xf32>
    %212 = arith.negf %211 : vector<2x128xf32>
    %213 = math.exp %212 : vector<2x128xf32>
    %cst_51 = arith.constant 1.000000e+00 : f32
    %214 = vector.broadcast %cst_51 : f32 to vector<2x128xf32>
    %215 = arith.addf %214, %213 : vector<2x128xf32>
    %216 = arith.divf %214, %215 : vector<2x128xf32>
    %217 = math.tanh %211 : vector<2x128xf32>
    %218 = vector.extract_strided_slice %216 {offsets = [0, 0], sizes = [2, 32], strides = [1, 1]} : vector<2x128xf32> to vector<2x32xf32>
    %219 = vector.extract_strided_slice %216 {offsets = [0, 32], sizes = [2, 32], strides = [1, 1]} : vector<2x128xf32> to vector<2x32xf32>
    %220 = vector.extract_strided_slice %217 {offsets = [0, 64], sizes = [2, 32], strides = [1, 1]} : vector<2x128xf32> to vector<2x32xf32>
    %221 = vector.extract_strided_slice %216 {offsets = [0, 96], sizes = [2, 32], strides = [1, 1]} : vector<2x128xf32> to vector<2x32xf32>
    %222 = arith.mulf %219, %205 : vector<2x32xf32>
    %223 = arith.mulf %218, %220 : vector<2x32xf32>
    %224 = arith.addf %222, %223 : vector<2x32xf32>
    %225 = math.tanh %224 : vector<2x32xf32>
    %226 = arith.mulf %221, %225 : vector<2x32xf32>
    %227 = vector.extract_strided_slice %144 {offsets = [1, 0, 0], sizes = [1, 2, 128], strides = [1, 1, 1]} : vector<6x2x128xf32> to vector<1x2x128xf32>
    %228 = vector.shape_cast %227 : vector<1x2x128xf32> to vector<2x128xf32>
    %cst_52 = arith.constant dense<0.000000e+00> : vector<2x128xf32>
    %229 = tpu.matmul %226, %146, %cst_52 {dimension_numbers = #tpu.dot_dimension_numbers<[1], [0], [0], [1], [0, 0, 1, 1], [], []>} : vector<2x32xf32>, vector<32x128xf32>, vector<2x128xf32> -> vector<2x128xf32>
    %230 = arith.addf %228, %229 : vector<2x128xf32>
    %231 = arith.negf %230 : vector<2x128xf32>
    %232 = math.exp %231 : vector<2x128xf32>
    %cst_53 = arith.constant 1.000000e+00 : f32
    %233 = vector.broadcast %cst_53 : f32 to vector<2x128xf32>
    %234 = arith.addf %233, %232 : vector<2x128xf32>
    %235 = arith.divf %233, %234 : vector<2x128xf32>
    %236 = math.tanh %230 : vector<2x128xf32>
    %237 = vector.extract_strided_slice %235 {offsets = [0, 0], sizes = [2, 32], strides = [1, 1]} : vector<2x128xf32> to vector<2x32xf32>
    %238 = vector.extract_strided_slice %235 {offsets = [0, 32], sizes = [2, 32], strides = [1, 1]} : vector<2x128xf32> to vector<2x32xf32>
    %239 = vector.extract_strided_slice %236 {offsets = [0, 64], sizes = [2, 32], strides = [1, 1]} : vector<2x128xf32> to vector<2x32xf32>
    %240 = vector.extract_strided_slice %235 {offsets = [0, 96], sizes = [2, 32], strides = [1, 1]} : vector<2x128xf32> to vector<2x32xf32>
    %241 = arith.mulf %238, %224 : vector<2x32xf32>
    %242 = arith.mulf %237, %239 : vector<2x32xf32>
    %243 = arith.addf %241, %242 : vector<2x32xf32>
    %244 = math.tanh %243 : vector<2x32xf32>
    %245 = arith.mulf %240, %244 : vector<2x32xf32>
    %246 = vector.extract_strided_slice %144 {offsets = [0, 0, 0], sizes = [1, 2, 128], strides = [1, 1, 1]} : vector<6x2x128xf32> to vector<1x2x128xf32>
    %247 = vector.shape_cast %246 : vector<1x2x128xf32> to vector<2x128xf32>
    %cst_54 = arith.constant dense<0.000000e+00> : vector<2x128xf32>
    %248 = tpu.matmul %245, %146, %cst_54 {dimension_numbers = #tpu.dot_dimension_numbers<[1], [0], [0], [1], [0, 0, 1, 1], [], []>} : vector<2x32xf32>, vector<32x128xf32>, vector<2x128xf32> -> vector<2x128xf32>
    %249 = arith.addf %247, %248 : vector<2x128xf32>
    %250 = arith.negf %249 : vector<2x128xf32>
    %251 = math.exp %250 : vector<2x128xf32>
    %cst_55 = arith.constant 1.000000e+00 : f32
    %252 = vector.broadcast %cst_55 : f32 to vector<2x128xf32>
    %253 = arith.addf %252, %251 : vector<2x128xf32>
    %254 = arith.divf %252, %253 : vector<2x128xf32>
    %255 = math.tanh %249 : vector<2x128xf32>
    %256 = vector.extract_strided_slice %254 {offsets = [0, 0], sizes = [2, 32], strides = [1, 1]} : vector<2x128xf32> to vector<2x32xf32>
    %257 = vector.extract_strided_slice %254 {offsets = [0, 32], sizes = [2, 32], strides = [1, 1]} : vector<2x128xf32> to vector<2x32xf32>
    %258 = vector.extract_strided_slice %255 {offsets = [0, 64], sizes = [2, 32], strides = [1, 1]} : vector<2x128xf32> to vector<2x32xf32>
    %259 = vector.extract_strided_slice %254 {offsets = [0, 96], sizes = [2, 32], strides = [1, 1]} : vector<2x128xf32> to vector<2x32xf32>
    %260 = arith.mulf %257, %243 : vector<2x32xf32>
    %261 = arith.mulf %256, %258 : vector<2x32xf32>
    %262 = arith.addf %260, %261 : vector<2x32xf32>
    %263 = math.tanh %262 : vector<2x32xf32>
    %264 = arith.mulf %259, %263 : vector<2x32xf32>
    %265 = vector.shape_cast %264 : vector<2x32xf32> to vector<1x2x32xf32>
    %266 = vector.shape_cast %245 : vector<2x32xf32> to vector<1x2x32xf32>
    %267 = vector.shape_cast %226 : vector<2x32xf32> to vector<1x2x32xf32>
    %268 = vector.shape_cast %207 : vector<2x32xf32> to vector<1x2x32xf32>
    %269 = vector.shape_cast %188 : vector<2x32xf32> to vector<1x2x32xf32>
    %270 = vector.shape_cast %169 : vector<2x32xf32> to vector<1x2x32xf32>
    %271 = tpu.concatenate %265, %266, %267, %268, %269, %270 in 0 : vector<1x2x32xf32>, vector<1x2x32xf32>, vector<1x2x32xf32>, vector<1x2x32xf32>, vector<1x2x32xf32>, vector<1x2x32xf32> -> vector<6x2x32xf32>
    %272 = tpu.concatenate %136, %271 in 2 : vector<6x2x32xf32>, vector<6x2x32xf32> -> vector<6x2x64xf32>
    %c0_56 = arith.constant 0 : index
    %c0_57 = arith.constant 0 : index
    %c0_58 = arith.constant 0 : index
    %273 = vector.load %arg6[%c0_56, %c0_57, %c0_58] : memref<6x2x64xf32, #tpu.memory_space<vmem>>, vector<6x2x64xf32>
    tpu.vector_store %arg6[%c0_56, %c0_57, %c0_58], %272 {strides = array<i32>} : memref<6x2x64xf32, #tpu.memory_space<vmem>>, vector<6x2x64xf32>,
    return
  }
}

module attributes {stable_mosaic.version = 11 : i64} {
  func.func @kernel(%arg0: memref<4x2x64xf32, #tpu.memory_space<vmem>>, %arg1: memref<1x64x128xf32, #tpu.memory_space<vmem>>, %arg2: memref<1x32x128xf32, #tpu.memory_space<vmem>>, %arg3: memref<1x1x128xf32, #tpu.memory_space<vmem>>, %arg4: memref<1x2x32xf32, #tpu.memory_space<vmem>>, %arg5: memref<1x2x32xf32, #tpu.memory_space<vmem>>, %arg6: memref<4x2x32xf32, #tpu.memory_space<vmem>>) attributes {dimension_semantics = [], scalar_prefetch = 0 : i64, scratch_operands = 0 : i64, tpu.core_type = #tpu.core_type<tc>} {
    %c0 = arith.constant 0 : index
    %c0_0 = arith.constant 0 : index
    %c0_1 = arith.constant 0 : index
    %0 = vector.load %arg0[%c0, %c0_0, %c0_1] : memref<4x2x64xf32, #tpu.memory_space<vmem>>, vector<4x2x64xf32>
    %1 = vector.shape_cast %0 : vector<4x2x64xf32> to vector<8x64xf32>
    %c0_2 = arith.constant 0 : index
    %c0_3 = arith.constant 0 : index
    %c0_4 = arith.constant 0 : index
    %2 = vector.load %arg1[%c0_2, %c0_3, %c0_4] : memref<1x64x128xf32, #tpu.memory_space<vmem>>, vector<1x64x128xf32>
    %3 = vector.shape_cast %2 : vector<1x64x128xf32> to vector<64x128xf32>
    %cst = arith.constant dense<0.000000e+00> : vector<8x128xf32>
    %4 = tpu.matmul %1, %3, %cst {dimension_numbers = #tpu.dot_dimension_numbers<[1], [0], [0], [1], [0, 0, 1, 1], [], []>} : vector<8x64xf32>, vector<64x128xf32>, vector<8x128xf32> -> vector<8x128xf32>
    %c0_5 = arith.constant 0 : index
    %c0_6 = arith.constant 0 : index
    %c0_7 = arith.constant 0 : index
    %5 = vector.load %arg3[%c0_5, %c0_6, %c0_7] : memref<1x1x128xf32, #tpu.memory_space<vmem>>, vector<1x1x128xf32>
    %6 = vector.shape_cast %5 : vector<1x1x128xf32> to vector<1x128xf32>
    %7 = vector.broadcast %6 : vector<1x128xf32> to vector<8x128xf32>
    %8 = arith.addf %4, %7 : vector<8x128xf32>
    %9 = vector.shape_cast %8 : vector<8x128xf32> to vector<4x2x128xf32>
    %c0_8 = arith.constant 0 : index
    %c0_9 = arith.constant 0 : index
    %c0_10 = arith.constant 0 : index
    %10 = vector.load %arg2[%c0_8, %c0_9, %c0_10] : memref<1x32x128xf32, #tpu.memory_space<vmem>>, vector<1x32x128xf32>
    %11 = vector.shape_cast %10 : vector<1x32x128xf32> to vector<32x128xf32>
    %c0_11 = arith.constant 0 : index
    %c0_12 = arith.constant 0 : index
    %c0_13 = arith.constant 0 : index
    %12 = vector.load %arg4[%c0_11, %c0_12, %c0_13] : memref<1x2x32xf32, #tpu.memory_space<vmem>>, vector<1x2x32xf32>
    %13 = vector.shape_cast %12 : vector<1x2x32xf32> to vector<2x32xf32>
    %c0_14 = arith.constant 0 : index
    %c0_15 = arith.constant 0 : index
    %c0_16 = arith.constant 0 : index
    %14 = vector.load %arg5[%c0_14, %c0_15, %c0_16] : memref<1x2x32xf32, #tpu.memory_space<vmem>>, vector<1x2x32xf32>
    %15 = vector.shape_cast %14 : vector<1x2x32xf32> to vector<2x32xf32>
    %16 = vector.extract_strided_slice %9 {offsets = [0, 0, 0], sizes = [1, 2, 128], strides = [1, 1, 1]} : vector<4x2x128xf32> to vector<1x2x128xf32>
    %17 = vector.shape_cast %16 : vector<1x2x128xf32> to vector<2x128xf32>
    %cst_17 = arith.constant dense<0.000000e+00> : vector<2x128xf32>
    %18 = tpu.matmul %13, %11, %cst_17 {dimension_numbers = #tpu.dot_dimension_numbers<[1], [0], [0], [1], [0, 0, 1, 1], [], []>} : vector<2x32xf32>, vector<32x128xf32>, vector<2x128xf32> -> vector<2x128xf32>
    %19 = arith.addf %17, %18 : vector<2x128xf32>
    %20 = arith.negf %19 : vector<2x128xf32>
    %21 = math.exp %20 : vector<2x128xf32>
    %cst_18 = arith.constant 1.000000e+00 : f32
    %22 = vector.broadcast %cst_18 : f32 to vector<2x128xf32>
    %23 = arith.addf %22, %21 : vector<2x128xf32>
    %24 = arith.divf %22, %23 : vector<2x128xf32>
    %25 = math.tanh %19 : vector<2x128xf32>
    %26 = vector.extract_strided_slice %24 {offsets = [0, 0], sizes = [2, 32], strides = [1, 1]} : vector<2x128xf32> to vector<2x32xf32>
    %27 = vector.extract_strided_slice %24 {offsets = [0, 32], sizes = [2, 32], strides = [1, 1]} : vector<2x128xf32> to vector<2x32xf32>
    %28 = vector.extract_strided_slice %25 {offsets = [0, 64], sizes = [2, 32], strides = [1, 1]} : vector<2x128xf32> to vector<2x32xf32>
    %29 = vector.extract_strided_slice %24 {offsets = [0, 96], sizes = [2, 32], strides = [1, 1]} : vector<2x128xf32> to vector<2x32xf32>
    %30 = arith.mulf %27, %15 : vector<2x32xf32>
    %31 = arith.mulf %26, %28 : vector<2x32xf32>
    %32 = arith.addf %30, %31 : vector<2x32xf32>
    %33 = math.tanh %32 : vector<2x32xf32>
    %34 = arith.mulf %29, %33 : vector<2x32xf32>
    %35 = vector.extract_strided_slice %9 {offsets = [1, 0, 0], sizes = [1, 2, 128], strides = [1, 1, 1]} : vector<4x2x128xf32> to vector<1x2x128xf32>
    %36 = vector.shape_cast %35 : vector<1x2x128xf32> to vector<2x128xf32>
    %cst_19 = arith.constant dense<0.000000e+00> : vector<2x128xf32>
    %37 = tpu.matmul %34, %11, %cst_19 {dimension_numbers = #tpu.dot_dimension_numbers<[1], [0], [0], [1], [0, 0, 1, 1], [], []>} : vector<2x32xf32>, vector<32x128xf32>, vector<2x128xf32> -> vector<2x128xf32>
    %38 = arith.addf %36, %37 : vector<2x128xf32>
    %39 = arith.negf %38 : vector<2x128xf32>
    %40 = math.exp %39 : vector<2x128xf32>
    %cst_20 = arith.constant 1.000000e+00 : f32
    %41 = vector.broadcast %cst_20 : f32 to vector<2x128xf32>
    %42 = arith.addf %41, %40 : vector<2x128xf32>
    %43 = arith.divf %41, %42 : vector<2x128xf32>
    %44 = math.tanh %38 : vector<2x128xf32>
    %45 = vector.extract_strided_slice %43 {offsets = [0, 0], sizes = [2, 32], strides = [1, 1]} : vector<2x128xf32> to vector<2x32xf32>
    %46 = vector.extract_strided_slice %43 {offsets = [0, 32], sizes = [2, 32], strides = [1, 1]} : vector<2x128xf32> to vector<2x32xf32>
    %47 = vector.extract_strided_slice %44 {offsets = [0, 64], sizes = [2, 32], strides = [1, 1]} : vector<2x128xf32> to vector<2x32xf32>
    %48 = vector.extract_strided_slice %43 {offsets = [0, 96], sizes = [2, 32], strides = [1, 1]} : vector<2x128xf32> to vector<2x32xf32>
    %49 = arith.mulf %46, %32 : vector<2x32xf32>
    %50 = arith.mulf %45, %47 : vector<2x32xf32>
    %51 = arith.addf %49, %50 : vector<2x32xf32>
    %52 = math.tanh %51 : vector<2x32xf32>
    %53 = arith.mulf %48, %52 : vector<2x32xf32>
    %54 = vector.extract_strided_slice %9 {offsets = [2, 0, 0], sizes = [1, 2, 128], strides = [1, 1, 1]} : vector<4x2x128xf32> to vector<1x2x128xf32>
    %55 = vector.shape_cast %54 : vector<1x2x128xf32> to vector<2x128xf32>
    %cst_21 = arith.constant dense<0.000000e+00> : vector<2x128xf32>
    %56 = tpu.matmul %53, %11, %cst_21 {dimension_numbers = #tpu.dot_dimension_numbers<[1], [0], [0], [1], [0, 0, 1, 1], [], []>} : vector<2x32xf32>, vector<32x128xf32>, vector<2x128xf32> -> vector<2x128xf32>
    %57 = arith.addf %55, %56 : vector<2x128xf32>
    %58 = arith.negf %57 : vector<2x128xf32>
    %59 = math.exp %58 : vector<2x128xf32>
    %cst_22 = arith.constant 1.000000e+00 : f32
    %60 = vector.broadcast %cst_22 : f32 to vector<2x128xf32>
    %61 = arith.addf %60, %59 : vector<2x128xf32>
    %62 = arith.divf %60, %61 : vector<2x128xf32>
    %63 = math.tanh %57 : vector<2x128xf32>
    %64 = vector.extract_strided_slice %62 {offsets = [0, 0], sizes = [2, 32], strides = [1, 1]} : vector<2x128xf32> to vector<2x32xf32>
    %65 = vector.extract_strided_slice %62 {offsets = [0, 32], sizes = [2, 32], strides = [1, 1]} : vector<2x128xf32> to vector<2x32xf32>
    %66 = vector.extract_strided_slice %63 {offsets = [0, 64], sizes = [2, 32], strides = [1, 1]} : vector<2x128xf32> to vector<2x32xf32>
    %67 = vector.extract_strided_slice %62 {offsets = [0, 96], sizes = [2, 32], strides = [1, 1]} : vector<2x128xf32> to vector<2x32xf32>
    %68 = arith.mulf %65, %51 : vector<2x32xf32>
    %69 = arith.mulf %64, %66 : vector<2x32xf32>
    %70 = arith.addf %68, %69 : vector<2x32xf32>
    %71 = math.tanh %70 : vector<2x32xf32>
    %72 = arith.mulf %67, %71 : vector<2x32xf32>
    %73 = vector.extract_strided_slice %9 {offsets = [3, 0, 0], sizes = [1, 2, 128], strides = [1, 1, 1]} : vector<4x2x128xf32> to vector<1x2x128xf32>
    %74 = vector.shape_cast %73 : vector<1x2x128xf32> to vector<2x128xf32>
    %cst_23 = arith.constant dense<0.000000e+00> : vector<2x128xf32>
    %75 = tpu.matmul %72, %11, %cst_23 {dimension_numbers = #tpu.dot_dimension_numbers<[1], [0], [0], [1], [0, 0, 1, 1], [], []>} : vector<2x32xf32>, vector<32x128xf32>, vector<2x128xf32> -> vector<2x128xf32>
    %76 = arith.addf %74, %75 : vector<2x128xf32>
    %77 = arith.negf %76 : vector<2x128xf32>
    %78 = math.exp %77 : vector<2x128xf32>
    %cst_24 = arith.constant 1.000000e+00 : f32
    %79 = vector.broadcast %cst_24 : f32 to vector<2x128xf32>
    %80 = arith.addf %79, %78 : vector<2x128xf32>
    %81 = arith.divf %79, %80 : vector<2x128xf32>
    %82 = math.tanh %76 : vector<2x128xf32>
    %83 = vector.extract_strided_slice %81 {offsets = [0, 0], sizes = [2, 32], strides = [1, 1]} : vector<2x128xf32> to vector<2x32xf32>
    %84 = vector.extract_strided_slice %81 {offsets = [0, 32], sizes = [2, 32], strides = [1, 1]} : vector<2x128xf32> to vector<2x32xf32>
    %85 = vector.extract_strided_slice %82 {offsets = [0, 64], sizes = [2, 32], strides = [1, 1]} : vector<2x128xf32> to vector<2x32xf32>
    %86 = vector.extract_strided_slice %81 {offsets = [0, 96], sizes = [2, 32], strides = [1, 1]} : vector<2x128xf32> to vector<2x32xf32>
    %87 = arith.mulf %84, %70 : vector<2x32xf32>
    %88 = arith.mulf %83, %85 : vector<2x32xf32>
    %89 = arith.addf %87, %88 : vector<2x32xf32>
    %90 = math.tanh %89 : vector<2x32xf32>
    %91 = arith.mulf %86, %90 : vector<2x32xf32>
    %92 = vector.shape_cast %34 : vector<2x32xf32> to vector<1x2x32xf32>
    %93 = vector.shape_cast %53 : vector<2x32xf32> to vector<1x2x32xf32>
    %94 = vector.shape_cast %72 : vector<2x32xf32> to vector<1x2x32xf32>
    %95 = vector.shape_cast %91 : vector<2x32xf32> to vector<1x2x32xf32>
    %96 = tpu.concatenate %92, %93, %94, %95 in 0 : vector<1x2x32xf32>, vector<1x2x32xf32>, vector<1x2x32xf32>, vector<1x2x32xf32> -> vector<4x2x32xf32>
    %c0_25 = arith.constant 0 : index
    %c0_26 = arith.constant 0 : index
    %c0_27 = arith.constant 0 : index
    %97 = vector.load %arg6[%c0_25, %c0_26, %c0_27] : memref<4x2x32xf32, #tpu.memory_space<vmem>>, vector<4x2x32xf32>
    tpu.vector_store %arg6[%c0_25, %c0_26, %c0_27], %96 {strides = array<i32>} : memref<4x2x32xf32, #tpu.memory_space<vmem>>, vector<4x2x32xf32>,
    return
  }
}

module attributes {stable_mosaic.version = 11 : i64} {
  func.func @kernel(%arg0: memref<2x6x64xf32, #tpu.memory_space<vmem>>, %arg1: memref<2x4x32xf32, #tpu.memory_space<vmem>>, %arg2: memref<64x64xf32, #tpu.memory_space<vmem>>, %arg3: memref<32x32xf32, #tpu.memory_space<vmem>>, %arg4: memref<1x1x32xf32, #tpu.memory_space<vmem>>, %arg5: memref<32x32xf32, #tpu.memory_space<vmem>>, %arg6: memref<1x1x32xf32, #tpu.memory_space<vmem>>, %arg7: memref<2x4x128xf32, #tpu.memory_space<vmem>>) attributes {dimension_semantics = [], scalar_prefetch = 0 : i64, scratch_operands = 0 : i64, tpu.core_type = #tpu.core_type<tc>} {
    %c0 = arith.constant 0 : index
    %c0_0 = arith.constant 0 : index
    %c0_1 = arith.constant 0 : index
    %0 = vector.load %arg0[%c0, %c0_0, %c0_1] : memref<2x6x64xf32, #tpu.memory_space<vmem>>, vector<2x6x64xf32>
    %1 = vector.shape_cast %0 : vector<2x6x64xf32> to vector<12x64xf32>
    %c0_2 = arith.constant 0 : index
    %c0_3 = arith.constant 0 : index
    %2 = vector.load %arg2[%c0_2, %c0_3] : memref<64x64xf32, #tpu.memory_space<vmem>>, vector<64x64xf32>
    %cst = arith.constant dense<0.000000e+00> : vector<12x64xf32>
    %3 = tpu.matmul %1, %2, %cst {dimension_numbers = #tpu.dot_dimension_numbers<[1], [0], [0], [1], [0, 0, 1, 1], [], []>} : vector<12x64xf32>, vector<64x64xf32>, vector<12x64xf32> -> vector<12x64xf32>
    %4 = vector.shape_cast %3 : vector<12x64xf32> to vector<2x6x64xf32>
    %5 = vector.extract_strided_slice %4 {offsets = [0, 0, 0], sizes = [2, 6, 32], strides = [1, 1, 1]} : vector<2x6x64xf32> to vector<2x6x32xf32>
    %6 = vector.extract_strided_slice %4 {offsets = [0, 0, 32], sizes = [2, 6, 32], strides = [1, 1, 1]} : vector<2x6x64xf32> to vector<2x6x32xf32>
    %c0_4 = arith.constant 0 : index
    %c0_5 = arith.constant 0 : index
    %c0_6 = arith.constant 0 : index
    %7 = vector.load %arg1[%c0_4, %c0_5, %c0_6] : memref<2x4x32xf32, #tpu.memory_space<vmem>>, vector<2x4x32xf32>
    %8 = vector.shape_cast %7 : vector<2x4x32xf32> to vector<8x32xf32>
    %c0_7 = arith.constant 0 : index
    %c0_8 = arith.constant 0 : index
    %9 = vector.load %arg5[%c0_7, %c0_8] : memref<32x32xf32, #tpu.memory_space<vmem>>, vector<32x32xf32>
    %cst_9 = arith.constant dense<0.000000e+00> : vector<8x32xf32>
    %10 = tpu.matmul %8, %9, %cst_9 {dimension_numbers = #tpu.dot_dimension_numbers<[1], [0], [0], [1], [0, 0, 1, 1], [], []>} : vector<8x32xf32>, vector<32x32xf32>, vector<8x32xf32> -> vector<8x32xf32>
    %11 = vector.shape_cast %10 : vector<8x32xf32> to vector<2x4x32xf32>
    %12 = vector.shape_cast %6 : vector<2x6x32xf32> to vector<2x1x6x32xf32>
    %13 = vector.shape_cast %11 : vector<2x4x32xf32> to vector<2x4x1x32xf32>
    %14 = vector.broadcast %12 : vector<2x1x6x32xf32> to vector<2x4x6x32xf32>
    %15 = vector.broadcast %13 : vector<2x4x1x32xf32> to vector<2x4x6x32xf32>
    %16 = arith.addf %14, %15 : vector<2x4x6x32xf32>
    %17 = math.tanh %16 : vector<2x4x6x32xf32>
    %c0_10 = arith.constant 0 : index
    %c0_11 = arith.constant 0 : index
    %c0_12 = arith.constant 0 : index
    %18 = vector.load %arg6[%c0_10, %c0_11, %c0_12] : memref<1x1x32xf32, #tpu.memory_space<vmem>>, vector<1x1x32xf32>
    %19 = vector.shape_cast %18 : vector<1x1x32xf32> to vector<1x1x1x32xf32>
    %20 = vector.broadcast %19 : vector<1x1x1x32xf32> to vector<2x4x6x32xf32>
    %21 = arith.mulf %17, %20 : vector<2x4x6x32xf32>
    %cst_13 = arith.constant dense<0.000000e+00> : vector<2x4x6xf32>
    %22 = vector.multi_reduction <add>, %21, %cst_13 [3] : vector<2x4x6x32xf32> to vector<2x4x6xf32>
    "tpu.trace_start"() <{level = 10 : i32, message = "bqs,bsh->bqh"}> : () -> ()
    %cst_14 = arith.constant dense<0.000000e+00> : vector<2x4x32xf32>
    %23 = tpu.matmul %22, %6, %cst_14 {dimension_numbers = #tpu.dot_dimension_numbers<[2], [1], [1], [2], [0, 0, 0, 1, 1, 2], [0], [0]>} : vector<2x4x6xf32>, vector<2x6x32xf32>, vector<2x4x32xf32> -> vector<2x4x32xf32>
    "tpu.trace_stop"() : () -> ()
    %24 = vector.shape_cast %23 : vector<2x4x32xf32> to vector<8x32xf32>
    %c0_15 = arith.constant 0 : index
    %c0_16 = arith.constant 0 : index
    %25 = vector.load %arg3[%c0_15, %c0_16] : memref<32x32xf32, #tpu.memory_space<vmem>>, vector<32x32xf32>
    %cst_17 = arith.constant dense<0.000000e+00> : vector<8x32xf32>
    %26 = tpu.matmul %24, %25, %cst_17 {dimension_numbers = #tpu.dot_dimension_numbers<[1], [0], [0], [1], [0, 0, 1, 1], [], []>} : vector<8x32xf32>, vector<32x32xf32>, vector<8x32xf32> -> vector<8x32xf32>
    %27 = vector.shape_cast %26 : vector<8x32xf32> to vector<2x4x32xf32>
    %28 = vector.shape_cast %5 : vector<2x6x32xf32> to vector<2x1x6x32xf32>
    %29 = vector.shape_cast %27 : vector<2x4x32xf32> to vector<2x4x1x32xf32>
    %30 = vector.broadcast %28 : vector<2x1x6x32xf32> to vector<2x4x6x32xf32>
    %31 = vector.broadcast %29 : vector<2x4x1x32xf32> to vector<2x4x6x32xf32>
    %32 = arith.addf %30, %31 : vector<2x4x6x32xf32>
    %33 = math.tanh %32 : vector<2x4x6x32xf32>
    %c0_18 = arith.constant 0 : index
    %c0_19 = arith.constant 0 : index
    %c0_20 = arith.constant 0 : index
    %34 = vector.load %arg4[%c0_18, %c0_19, %c0_20] : memref<1x1x32xf32, #tpu.memory_space<vmem>>, vector<1x1x32xf32>
    %35 = vector.shape_cast %34 : vector<1x1x32xf32> to vector<1x1x1x32xf32>
    %36 = vector.broadcast %35 : vector<1x1x1x32xf32> to vector<2x4x6x32xf32>
    %37 = arith.mulf %33, %36 : vector<2x4x6x32xf32>
    %cst_21 = arith.constant dense<0.000000e+00> : vector<2x4x6xf32>
    %38 = vector.multi_reduction <add>, %37, %cst_21 [3] : vector<2x4x6x32xf32> to vector<2x4x6xf32>
    %cst_22 = arith.constant 0.000000e+00 : f32
    %39 = vector.broadcast %cst_22 : f32 to vector<2x4x122xf32>
    %40 = tpu.concatenate %38, %39 in 2 : vector<2x4x6xf32>, vector<2x4x122xf32> -> vector<2x4x128xf32>
    %c0_23 = arith.constant 0 : index
    %c0_24 = arith.constant 0 : index
    %c0_25 = arith.constant 0 : index
    %41 = vector.load %arg7[%c0_23, %c0_24, %c0_25] : memref<2x4x128xf32, #tpu.memory_space<vmem>>, vector<2x4x128xf32>
    tpu.vector_store %arg7[%c0_23, %c0_24, %c0_25], %40 {strides = array<i32>} : memref<2x4x128xf32, #tpu.memory_space<vmem>>, vector<2x4x128xf32>,
    return
  }
}

</mosaic_0001>

<bundles_post_ra>
// kernel: ptr_extract_summ_forward.4
= control target key start
LH: loop header
LB: loop body
LE: loop exit
PB: predicated region body
PF: predicated region fallthrough
CT: control target
= control target key end

     0   :  { %v2274_v0 = vmov 0.0   ;;  %vm2275_vm0 = vmmov 0   ;;  %vm60_vm1 = vcmask 785408   ;;  %vm1781_vm2 = vcmask 261120   ;;  %s3089_s3 = inlined_call_operand.vmem [shape: f32[96,32], index: 3, kind: input, shape index: {}]   ;;  %s3090_s5 = inlined_call_operand.vmem [shape: f32[160,32], index: 5, kind: input, shape index: {}]   ;;  %s3091_s0 = inlined_call_operand.vmem [shape: f32[72,96], index: 0, kind: input, shape index: {}]   ;;  %s3092_s4 = inlined_call_operand.vmem [shape: f32[128,32], index: 4, kind: input, shape index: {}]   ;;  %s3093_s1 = inlined_call_operand.vmem [shape: f32[60,128], index: 1, kind: input, shape index: {}]   ;;  %s3094_s2 = inlined_call_operand.vmem [shape: f32[48,160], index: 2, kind: input, shape index: {}]   ;;  %s3095_s6 = inlined_call_operand.vmem [shape: f32[1,32], index: 6, kind: input, shape index: {}]   ;;  %s3096_s7 = inlined_call_operand.vmem [shape: f32[1,32], index: 7, kind: input, shape index: {}]   ;;  %s3097_s8 = inlined_call_operand.vmem [shape: f32[1,32], index: 8, kind: input, shape index: {}]   ;;  %s3098_s9 = inlined_call_operand.vmem [shape: f32[12,128], index: 9, kind: output, shape index: {}]  }
   0x1   :  { %2173 = vmatprep.subr.mxu1 %v2274_v0  ;;  %v52_v1 = vld [vmem:[%s3089_s3 + $0x58] sm:$0xff]  ;;  %v51_v2 = vld [vmem:[%s3089_s3 + $0x50] sm:$0xff]  ;;  %1800 = vmatprep.subr.mxu0 %v2274_v0  ;;  %v50_v3 = vld [vmem:[%s3089_s3 + $0x48] sm:$0xff]  ;;  %vm573_vm3 = vcmask 259072   ;;  %vm1919_vm4 = vcmask 257024   ;;  %vm1657_vm5 = vcmask 258048  }
   0x2   :  { %2174 = vmatpush3.msra.mxu1 %v52_v1  ;;  %2197 = vmatprep.mubr.msk.f32.mxu1 %vm2275_vm0, %v2274_v0  ;;  %v1769_v4 = vld [vmem:[%s3090_s5 + $0x78] sm:$0xff]  ;;  %v49_v5 = vld [vmem:[%s3089_s3 + $0x40] sm:$0xff]  ;;  %v1768_v6 = vld [vmem:[%s3090_s5 + $0x70] sm:$0xff]  ;;  %vm2016_vm6 = vcmask 1041409   ;;  %vm2018_vm7 = vcmask 1042434   ;;  %vm2020_vm8 = vcmask 1043459  }
   0x3   :  { %2175 = vmatprep.subr.mxu1 %v2274_v0  ;;  %1801 = vmatpush1.msra.mxu0 %v1769_v4  ;;  %v1767_v7 = vld [vmem:[%s3090_s5 + $0x68] sm:$0xff]  ;;  %v48_v8 = vld [vmem:[%s3089_s3 + $0x38] sm:$0xff]  ;;  %v1766_v9 = vld [vmem:[%s3090_s5 + $0x60] sm:$0xff]  ;;  %vm2022_vm9 = vcmask 1044484   ;;  %vm2024_vm10 = vcmask 1045509   ;;  %vm2026_vm11 = vcmask 1046534  }
   0x4   :  { %2176 = vmatpush3.msra.mxu1 %v51_v2  ;;  %1802 = vmatprep.subr.mxu0 %v2274_v0  ;;  %v47_v10 = vld [vmem:[%s3089_s3 + $0x30] sm:$0xff]  ;;  %v1765_v11 = vld [vmem:[%s3090_s5 + $0x58] sm:$0xff]  ;;  %v46_v12 = vld [vmem:[%s3089_s3 + $0x28] sm:$0xff]  ;;  %vm2028_vm12 = vcmask 1047559   ;;  %vm2093_vm13 = vcmask 523264  }
   0x5   :  { %2177 = vmatprep.subr.mxu1 %v2274_v0  ;;  %1803 = vmatpush1.msra.mxu0 %v1768_v6  ;;  %v1764_v13 = vld [vmem:[%s3090_s5 + $0x50] sm:$0xff]  ;;  %v45_v14 = vld [vmem:[%s3089_s3 + $0x20] sm:$0xff]  ;;  %v1763_v15 = vld [vmem:[%s3090_s5 + $0x48] sm:$0xff] }
   0x6   :  { %2178 = vmatpush3.msra.mxu1 %v50_v3  ;;  %1804 = vmatprep.subr.mxu0 %v2274_v0  ;;  %v44_v16 = vld [vmem:[%s3089_s3 + $0x18] sm:$0xff]  ;;  %v1762_v17 = vld [vmem:[%s3090_s5 + $0x40] sm:$0xff]  ;;  %v43_v18 = vld [vmem:[%s3089_s3 + $0x10] sm:$0xff] }
   0x7   :  { %2179 = vmatprep.subr.mxu1 %v2274_v0  ;;  %1805 = vmatpush1.msra.mxu0 %v1767_v7  ;;  %v1761_v19 = vld [vmem:[%s3090_s5 + $0x38] sm:$0xff]  ;;  %v42_v20 = vld [vmem:[%s3089_s3 + $0x8] sm:$0xff]  ;;  %v1760_v21 = vld [vmem:[%s3090_s5 + $0x30] sm:$0xff] }
   0x8   :  { %2180 = vmatpush3.msra.mxu1 %v49_v5  ;;  %1806 = vmatprep.subr.mxu0 %v2274_v0  ;;  %v41_v22 = vld [vmem:[%s3089_s3] sm:$0xff]  ;;  %v681_v24 = vld [vmem:[%s3092_s4 + $0x78] sm:$0xff]  ;;  %v680_v25 = vld [vmem:[%s3092_s4 + $0x70] sm:$0xff] }
   0x9   :  { %2181 = vmatprep.subr.mxu1 %v2274_v0  ;;  %1807 = vmatpush1.msra.mxu0 %v1766_v9  ;;  %v32_v23 = vld [vmem:[%s3091_s0] sm:$0xff]  ;;  %v1759_v26 = vld [vmem:[%s3090_s5 + $0x28] sm:$0xff]  ;;  %v34_v31 = vld [vmem:[%s3091_s0 + $0x10] sm:$0xff] }
   0xa   :  { %2182 = vmatpush3.msra.mxu1 %v48_v8  ;;  %1808 = vmatprep.subr.mxu0 %v2274_v0  ;;  %v33_v27 = vld [vmem:[%s3091_s0 + $0x8] sm:$0xff]  ;;  %v678_v29 = vld [vmem:[%s3092_s4 + $0x60] sm:$0xff]  ;;  %v677_v32 = vld [vmem:[%s3092_s4 + $0x58] sm:$0xff] }
   0xb   :  { %2183 = vmatprep.subr.mxu1 %v2274_v0  ;;  %1809 = vmatpush1.msra.mxu0 %v1765_v11  ;;  %v679_v28 = vld [vmem:[%s3092_s4 + $0x68] sm:$0xff]  ;;  %v1758_v30 = vld [vmem:[%s3090_s5 + $0x20] sm:$0xff]  ;;  %v676_v33 = vld [vmem:[%s3092_s4 + $0x50] sm:$0xff] }
   0xc   :  { %2184 = vmatpush3.msra.mxu1 %v47_v10  ;;  %1810 = vmatprep.subr.mxu0 %v2274_v0  ;;  %v1757_v34 = vld [vmem:[%s3090_s5 + $0x18] sm:$0xff]  ;;  %v675_v36 = vld [vmem:[%s3092_s4 + $0x48] sm:$0xff]  ;;  %v674_v37 = vld [vmem:[%s3092_s4 + $0x40] sm:$0xff] }
   0xd   :  { %2185 = vmatprep.subr.mxu1 %v2274_v0  ;;  %1811 = vmatpush1.msra.mxu0 %v1764_v13  ;;  %v35_v35 = vld [vmem:[%s3091_s0 + $0x18] sm:$0xff]  ;;  %v1756_v38 = vld [vmem:[%s3090_s5 + $0x10] sm:$0xff]  ;;  %v36_v39 = vld [vmem:[%s3091_s0 + $0x20] sm:$0xff] }
   0xe   :  { %2186 = vmatpush3.msra.mxu1 %v46_v12  ;;  %1812 = vmatprep.subr.mxu0 %v2274_v0  ;;  %v673_v40 = vld [vmem:[%s3092_s4 + $0x38] sm:$0xff]  ;;  %v672_v41 = vld [vmem:[%s3092_s4 + $0x30] sm:$0xff]  ;;  %v1755_v42 = vld [vmem:[%s3090_s5 + $0x8] sm:$0xff] }
   0xf   :  { %2187 = vmatprep.subr.mxu1 %v2274_v0  ;;  %1813 = vmatpush1.msra.mxu0 %v1763_v15  ;;  %v37_v43 = vld [vmem:[%s3091_s0 + $0x28] sm:$0xff]  ;;  %v670_v45 = vld [vmem:[%s3092_s4 + $0x20] sm:$0xff]  ;;  %v38_v47 = vld [vmem:[%s3091_s0 + $0x30] sm:$0xff] }
  0x10   :  { %2188 = vmatpush3.msra.mxu1 %v45_v14  ;;  %1814 = vmatprep.subr.mxu0 %v2274_v0  ;;  %v671_v44 = vld [vmem:[%s3092_s4 + $0x28] sm:$0xff]  ;;  %v1754_v46 = vld [vmem:[%s3090_s5] sm:$0xff]  ;;  %v669_v48 = vld [vmem:[%s3092_s4 + $0x18] sm:$0xff]  ;;  %v2276_v14 = vmov 1983009808  }
  0x11   :  { %2189 = vmatprep.subr.mxu1 %v2274_v0  ;;  %1815 = vmatpush1.msra.mxu0 %v1762_v17  ;;  %v1773_v49 = vld [vmem:[%s3090_s5 + $0x98] sm:$0xff]  ;;  %v668_v50 = vld [vmem:[%s3092_s4 + $0x10] sm:$0xff]  ;;  %v667_v53 = vld [vmem:[%s3092_s4 + $0x8] sm:$0xff]  ;;  %v218_v15 = vunpack.c.l.s4 %v2276_v14 }
  0x12   :  { %2190 = vmatpush3.msra.mxu1 %v44_v16  ;;  %1816 = vmatprep.subr.mxu0 %v2274_v0  ;;  %v39_v51 = vld [vmem:[%s3091_s0 + $0x38] sm:$0xff]  ;;  %v1772_v52 = vld [vmem:[%s3090_s5 + $0x90] sm:$0xff]  ;;  %v1771_v54 = vld [vmem:[%s3090_s5 + $0x88] sm:$0xff]  ;;  %v220_v16 = vlaneseq }
  0x13   :  { %2191 = vmatprep.subr.mxu1 %v2274_v0  ;;  %1817 = vmatpush1.msra.mxu0 %v1761_v19  ;;  %v666_v55 = vld [vmem:[%s3092_s4] sm:$0xff]  ;;  %v1743_v59 = vld [vmem:[%s3094_s2 + $0x8] sm:$0xff]  ;;  %v1745_v62 = vld [vmem:[%s3094_s2 + $0x18] sm:$0xff]  ;;  %v219_v17 = vunpack.c.0.s8 %v218_v15 }
  0x14   :  { %2192 = vmatpush3.msra.mxu1 %v43_v18  ;;  %1818 = vmatprep.subr.mxu0 %v2274_v0  ;;  %v40_v56 = vld [vmem:[%s3091_s0 + $0x40] sm:$0xff]  ;;  %v659_v61 = vld [vmem:[%s3093_s1 + $0x8] sm:$0xff]  ;;  %v660_v63 = vld [vmem:[%s3093_s1 + $0x10] sm:$0xff]  ;;  %v2626_v18 = vshrl.u32 %v220_v16, 7 }
  0x15   :  { %2193 = vmatprep.subr.mxu1 %v2274_v0  ;;  %1819 = vmatpush1.msra.mxu0 %v1760_v21  ;;  %v658_v57 = vld [vmem:[%s3093_s1] sm:$0xff]  ;;  %v661_v1 = vld [vmem:[%s3093_s1 + $0x18] sm:$0xff]  ;;  %v1747_v2 = vld [vmem:[%s3094_s2 + $0x28] sm:$0xff] }
  0x16   :  { %2194 = vmatpush3.msra.mxu1 %v42_v20  ;;  %1820 = vmatprep.subr.mxu0 %v2274_v0  ;;  %v1770_v58 = vld [vmem:[%s3090_s5 + $0x80] sm:$0xff]  ;;  %v663_v5 = vld [vmem:[%s3093_s1 + $0x28] sm:$0xff]  ;;  %v1749_v6 = vld [vmem:[%s3094_s2 + $0x38] sm:$0xff] }
  0x17   :  { %2195 = vmatprep.subr.mxu1 %v2274_v0  ;;  %1821 = vmatpush1.msra.mxu0 %v1759_v26  ;;  %v1742_v60 = vld [vmem:[%s3094_s2] sm:$0xff]  ;;  %v664_v7 = vld [vmem:[%s3093_s1 + $0x30] sm:$0xff]  ;;  %v665_v9 = vld [vmem:[%s3093_s1 + $0x38] sm:$0xf] }
  0x18   :  { %2196 = vmatpush3.msra.mxu1 %v41_v22  ;;  %1822 = vmatprep.subr.mxu0 %v2274_v0  ;;  %v662_v3 = vld [vmem:[%s3093_s1 + $0x20] sm:$0xff]  ;;  %v1748_v8 = vld [vmem:[%s3094_s2 + $0x30] sm:$0xff]  ;;  %v1751_v10 = vld [vmem:[%s3094_s2 + $0x48] sm:$0xff]  ;;  %v2635_v22 = vsub.s32 %v219_v17, %v2626_v18 }
  0x19   :  { %2198 = vmatmul.mubr.msk.f32.vlgmr.msra.gmra.mxu1 %vm60_vm1, %v32_v23  ;;  %2224 = vmatprep.subr.mxu1 %v681_v24  ;;  %v1746_v4 = vld [vmem:[%s3094_s2 + $0x20] sm:$0xff]  ;;  %v1753_v12 = vld [vmem:[%s3094_s2 + $0x58] sm:$0xff]  ;;  %v1752_v13 = vld [vmem:[%s3094_s2 + $0x50] sm:$0xff] }
  0x1a   :  { %2225 = vmatpush3.msra.mxu1 %v681_v24  ;;  %2200 = vmatprep.mubr.msk.f32.mxu1 %vm2275_vm0, %v2274_v0  ;;  %v1750_v11 = vld [vmem:[%s3094_s2 + $0x40] sm:$0xff] }
  0x1b   :  { %2226 = vmatprep.subr.mxu1 %v680_v25  ;;  %1823 = vmatpush1.msra.mxu0 %v1758_v30  ;;  %v2631_v19 = vld [vmem:[%s3095_s6] ss:$0 sm:$0xff] }
  0x1c   :  { %2227 = vmatpush3.msra.mxu1 %v680_v25  ;;  %1824 = vmatprep.subr.mxu0 %v2274_v0 }
  0x1d   :  { %2201 = vmatmul.mubr.msk.f32.gmra.mxu1 %vm60_vm1, %v33_v27  ;;  %2228 = vmatprep.subr.mxu1 %v679_v28 }
  0x1e   :  { %2229 = vmatpush3.msra.mxu1 %v679_v28  ;;  %2203 = vmatprep.mubr.msk.f32.mxu1 %vm2275_vm0, %v2274_v0 }
  0x1f   :  { %2230 = vmatprep.subr.mxu1 %v678_v29  ;;  %1825 = vmatpush1.msra.mxu0 %v1757_v34 }
  0x20   :  { %2231 = vmatpush3.msra.mxu1 %v678_v29  ;;  %1826 = vmatprep.subr.mxu0 %v2274_v0 }
  0x21   :  { %2204 = vmatmul.mubr.msk.f32.gmra.mxu1 %vm60_vm1, %v34_v31  ;;  %2232 = vmatprep.subr.mxu1 %v677_v32 }
  0x22   :  { %2233 = vmatpush3.msra.mxu1 %v677_v32  ;;  %2206 = vmatprep.mubr.msk.f32.mxu1 %vm2275_vm0, %v2274_v0 }
  0x23   :  { %2234 = vmatprep.subr.mxu1 %v676_v33  ;;  %1827 = vmatpush1.msra.mxu0 %v1756_v38 }
  0x24   :  { %2235 = vmatpush3.msra.mxu1 %v676_v33  ;;  %1828 = vmatprep.subr.mxu0 %v2274_v0 }
  0x25   :  { %2207 = vmatmul.mubr.msk.f32.gmra.mxu1 %vm60_vm1, %v35_v35  ;;  %2236 = vmatprep.subr.mxu1 %v675_v36 }
  0x26   :  { %2209 = vmatprep.mubr.msk.f32.mxu1 %vm2275_vm0, %v2274_v0  ;;  %2237 = vmatpush3.msra.mxu1 %v675_v36 }
  0x27   :  { %2238 = vmatprep.subr.mxu1 %v674_v37  ;;  %1829 = vmatpush1.msra.mxu0 %v1755_v42 }
  0x28   :  { %2239 = vmatpush3.msra.mxu1 %v674_v37  ;;  %1830 = vmatprep.subr.mxu0 %v2274_v0 }
  0x29   :  { %2210 = vmatmul.mubr.msk.f32.gmra.mxu1 %vm60_vm1, %v36_v39  ;;  %2240 = vmatprep.subr.mxu1 %v673_v40 }
  0x2a   :  { %2212 = vmatprep.mubr.msk.f32.mxu1 %vm2275_vm0, %v2274_v0  ;;  %2241 = vmatpush3.msra.mxu1 %v673_v40 }
  0x2b   :  { %2242 = vmatprep.subr.mxu1 %v672_v41  ;;  %1831 = vmatpush1.msra.mxu0 %v1754_v46 }
  0x2c   :  { %2243 = vmatpush3.msra.mxu1 %v672_v41  ;;  %1856 = vmatprep.subr.mxu0 %v2274_v0 }
  0x2d   :  { %2213 = vmatmul.mubr.msk.f32.gmra.mxu1 %vm60_vm1, %v37_v43  ;;  %2244 = vmatprep.subr.mxu1 %v671_v44  ;;  %v2277_v43 = vmov 1966171168  }
  0x2e   :  { %2215 = vmatprep.mubr.msk.f32.mxu1 %vm2275_vm0, %v2274_v0  ;;  %2245 = vmatpush3.msra.mxu1 %v671_v44  ;;  %v2645_v44 = vunpack.c.l.s4 %v2277_v43 }
  0x2f   :  { %2246 = vmatprep.subr.mxu1 %v670_v45  ;;  %1857 = vmatpush2.msra.mxu0 %v1773_v49 }
  0x30   :  { %2247 = vmatpush3.msra.mxu1 %v670_v45  ;;  %1858 = vmatprep.subr.mxu0 %v2274_v0 }
  0x31   :  { %2216 = vmatmul.mubr.msk.f32.gmra.mxu1 %vm60_vm1, %v38_v47  ;;  %2248 = vmatprep.subr.mxu1 %v669_v48 }
  0x32   :  { %2218 = vmatprep.mubr.msk.f32.mxu1 %vm2275_vm0, %v2274_v0  ;;  %2249 = vmatpush3.msra.mxu1 %v669_v48 }
  0x33   :  { %2250 = vmatprep.subr.mxu1 %v668_v50  ;;  %1859 = vmatpush2.msra.mxu0 %v1772_v52 }
  0x34   :  { %2251 = vmatpush3.msra.mxu1 %v668_v50  ;;  %1860 = vmatprep.subr.mxu0 %v2274_v0 }
  0x35   :  { %2219 = vmatmul.mubr.msk.f32.gmra.mxu1 %vm60_vm1, %v39_v51  ;;  %2252 = vmatprep.subr.mxu1 %v667_v53 }
  0x36   :  { %2221 = vmatprep.mubr.msk.f32.mxu1 %vm2275_vm0, %v2274_v0  ;;  %2253 = vmatpush3.msra.mxu1 %v667_v53 }
  0x37   :  { %1861 = vmatpush2.msra.mxu0 %v1771_v54  ;;  %2254 = vmatprep.subr.mxu1 %v666_v55 }
  0x38   :  { %1862 = vmatprep.subr.mxu0 %v2274_v0  ;;  %2255 = vmatpush3.msra.mxu1 %v666_v55  ;;  %v1744_v0 = vld [vmem:[%s3094_s2 + $0x10] sm:$0xff] }
  0x39   :  { %2222 = vmatmul.mubr.msk.f32.gmra.mxu1 %vm60_vm1, %v40_v56  ;;  %1863 = vmatpush2.msra.mxu0 %v1770_v58 }
  0x3a   :  { %2256 = vmatprep.mubr.f32.mxu1 %v658_v57  ;;  %2122 = vmatprep.mubr.msk.f32.mxu0 %vm1781_vm2, %v1743_v59 }
  0x3b   :  { %1865 = vmatmul.mubr.f32.vlgmr.msra.gmra.mxu0 %v1742_v60  ;;  %v813_v60 = vunpack.c.0.s8 %v2645_v44 }
  0x3c   :  { %2123 = vmatprep.mubr.msk.f32.mxu0 %vm1781_vm2, %v1745_v62 }
  0x3d   :  { %2257 = vmatmul.mubr.f32.vlgmr.msra.gmra.mxu1 %v659_v61 }
  0x3e   :  { %2259 = vmatprep.mubr.f32.mxu1 %v660_v63 }
  0x3f   :  { %1870 = vmatmul.mubr.f32.gmra.mxu0 %v1744_v0 }
  0x40   :  { %2124 = vmatprep.mubr.msk.f32.mxu0 %vm1781_vm2, %v1747_v2 }
  0x41   :  { %2260 = vmatmul.mubr.f32.gmra.mxu1 %v661_v1 }
  0x42   :  { %2262 = vmatprep.mubr.f32.mxu1 %v662_v3 }
  0x43   :  { %1875 = vmatmul.mubr.f32.gmra.mxu0 %v1746_v4 }
  0x44   :  { %2125 = vmatprep.mubr.msk.f32.mxu0 %vm1781_vm2, %v1749_v6 }
  0x45   :  { %2263 = vmatmul.mubr.f32.gmra.mxu1 %v663_v5 }
  0x46   :  { %2265 = vmatprep.mubr.f32.mxu1 %v664_v7 }
  0x47   :  { %1880 = vmatmul.mubr.f32.gmra.mxu0 %v1748_v8 }
  0x48   :  { %2126 = vmatprep.mubr.msk.f32.mxu0 %vm1781_vm2, %v1751_v10 }
  0x49   :  { %2266 = vmatmul.mubr.f32.gmra.mxu1 %v665_v9 }
  0x4b   :  { %1885 = vmatmul.mubr.f32.gmra.mxu0 %v1750_v11 }
  0x4c   :  { %2127 = vmatprep.mubr.msk.f32.mxu0 %vm1781_vm2, %v1753_v12 }
  0x4f   :  { %1890 = vmatmul.mubr.f32.gmra.mxu0 %v1752_v13 }
  0xd9   :  { %v154_v20 = vpop.f32.mrf.mxu1 }
  0xda   :  { %v155_v21 = vadd.f32 %v2631_v19, %v154_v20 }
  0xdb   :  { %v2199_v23 = vpop.f32.mrf.mxu1 }
  0xdc   :  { %v198_v24 = vmax.f32 %v155_v21, 0.0 }
  0xdd   :  { %v159_v25 = vpop.f32.mrf.mxu1 }
  0xde   :  { %v216_v26 = vcombine.high %v198_v24, %v198_v24  ;;  %v223_v27 = vrot.slane %v198_v24, %v2635_v22  ;;  %v160_v28 = vadd.f32 %v2631_v19, %v159_v25 }
  0xdf   :  { %v2202_v29 = vpop.f32.mrf.mxu1 }
  0xe0   :  { %v230_v30 = vrot.slane %v216_v26, %v2635_v22  ;;  %v231_v31 = vcombine.high %v223_v27, %v223_v27  ;;  %v199_v32 = vmax.f32 %v160_v28, 0.0 }
  0xe1   :  { %v164_v33 = vpop.f32.mrf.mxu1 }
  0xe2   :  { %v369_v34 = vcombine.low %v223_v27, %v231_v31  ;;  %v383_v35 = vrot.slane %v230_v30, %v2635_v22  ;;  %v232_v36 = vcombine.high %v230_v30, %v230_v30  ;;  %v233_v37 = vcombine.high %v199_v32, %v199_v32 }
  0xe3   :  { %v240_v38 = vrot.slane %v199_v32, %v2635_v22  ;;  %v165_v39 = vadd.f32 %v2631_v19, %v164_v33  ;;  %v2205_v40 = vpop.f32.mrf.mxu1 }
  0xe4   :  { %v376_v41 = vrot.slane %v369_v34, %v2635_v22  ;;  %v247_v42 = vrot.slane %v233_v37, %v2635_v22 }
  0xe5   :  { %v248_v45 = vcombine.high %v240_v38, %v240_v38  ;;  %v385_v46 = vcombine.low %v232_v36, %v240_v38  ;;  %v200_v47 = vmax.f32 %v165_v39, 0.0  ;;  %v169_v48 = vpop.f32.mrf.mxu1 }
  0xe6   :  { %v384_v49 = vcombine.low %v376_v41, %v383_v35  ;;  %v249_v50 = vcombine.high %v247_v42, %v247_v42  ;;  %v170_v51 = vadd.f32 %v2631_v19, %v169_v48 }
  0xe7   :  { %v392_v52 = vrot.slane %v385_v46, %v2635_v22  ;;  %v399_v53 = vrot.slane %v248_v45, %v2635_v22  ;;  %v250_v54 = vcombine.high %v200_v47, %v200_v47  ;;  %v257_v55 = vrot.slane %v200_v47, %v2635_v22  ;;  %v2208_v56 = vpop.f32.mrf.mxu1 }
  0xe8   :  { %v574_v57 = vsel %vm573_vm3, %v384_v49, -inf  ;;  %v401_v58 = vcombine.low %v247_v42, %v249_v50  ;;  %v201_v59 = vmax.f32 %v170_v51, 0.0  ;;  %v2670_v49 = vsub.s32 %v813_v60, %v2626_v18 }
  0xe9   :  { %v575_v61 = vrot.slane %v574_v57, 4  ;;  %v400_v62 = vcombine.low %v392_v52, %v399_v53  ;;  %v264_v63 = vrot.slane %v250_v54, %v2635_v22  ;;  %v265_v0 = vcombine.high %v257_v55, %v257_v55  ;;  %v174_v1 = vpop.f32.mrf.mxu1 }
  0xea   :  { %v408_v2 = vrot.slane %v401_v58, %v2635_v22  ;;  %v415_v3 = vrot.slane %v257_v55, %v2635_v22  ;;  %v267_v4 = vcombine.high %v201_v59, %v201_v59  ;;  %v274_v5 = vrot.slane %v201_v59, %v2635_v22 }
  0xeb   :  { %v576_v6 = vmax.f32 %v574_v57, %v575_v61  ;;  %v581_v7 = vsel %vm573_vm3, %v400_v62, -inf  ;;  %v266_v8 = vcombine.high %v264_v63, %v264_v63  ;;  %v417_v9 = vcombine.low %v265_v0, %v264_v63  ;;  %v2211_v10 = vpop.f32.mrf.mxu1 }
  0xec   :  { %v582_v11 = vrot.slane %v581_v7, 4  ;;  %v416_v12 = vcombine.low %v408_v2, %v415_v3  ;;  %v281_v13 = vrot.slane %v267_v4, %v2635_v22  ;;  %v282_v14 = vcombine.high %v274_v5, %v274_v5 }
  0xed   :  { %v577_v15 = vrot.slane %v576_v6, 2  ;;  %v424_v16 = vrot.slane %v417_v9, %v2635_v22  ;;  %v431_v17 = vrot.slane %v266_v8, %v2635_v22  ;;  %v175_v20 = vadd.f32 %v2631_v19, %v174_v1  ;;  %v179_v21 = vpop.f32.mrf.mxu1 }
  0xee   :  { %v583_v23 = vmax.f32 %v581_v7, %v582_v11  ;;  %v588_v24 = vsel %vm573_vm3, %v416_v12, -inf  ;;  %v433_v25 = vcombine.low %v274_v5, %v282_v14  ;;  %v447_v26 = vrot.slane %v281_v13, %v2635_v22 }
  0xef   :  { %v578_v27 = vmax.f32 %v576_v6, %v577_v15  ;;  %v432_v28 = vcombine.low %v424_v16, %v431_v17  ;;  %v589_v29 = vrot.slane %v588_v24, 4  ;;  %v202_v30 = vmax.f32 %v175_v20, 0.0  ;;  %v2214_v31 = vpop.f32.mrf.mxu1 }
  0xf0   :  { %v584_v32 = vrot.slane %v583_v23, 2  ;;  %v440_v33 = vrot.slane %v433_v25, %v2635_v22  ;;  %v283_v34 = vcombine.high %v281_v13, %v281_v13  ;;  %v180_v35 = vadd.f32 %v2631_v19, %v179_v21 }
  0xf1   :  { %v579_v36 = vrot.slane %v578_v27, 1  ;;  %v590_v37 = vmax.f32 %v588_v24, %v589_v29  ;;  %v595_v38 = vsel %vm573_vm3, %v432_v28, -inf  ;;  %v284_v39 = vcombine.high %v202_v30, %v202_v30  ;;  %v184_v40 = vpop.f32.mrf.mxu1 }
  0xf2   :  { %v585_v41 = vmax.f32 %v583_v23, %v584_v32  ;;  %v596_v42 = vrot.slane %v595_v38, 4  ;;  %v448_v43 = vcombine.low %v440_v33, %v447_v26  ;;  %v291_v44 = vrot.slane %v202_v30, %v2635_v22 }
  0xf3   :  { %v591_v45 = vrot.slane %v590_v37, 2  ;;  %v298_v46 = vrot.slane %v284_v39, %v2635_v22  ;;  %v203_v47 = vmax.f32 %v180_v35, 0.0  ;;  %v2217_v48 = vpop.f32.mrf.mxu1  ;;  %v2673_v59 = vmax.f32 %v578_v27, %v579_v36 }
  0xf4   :  { %v586_v50 = vrot.slane %v585_v41, 1  ;;  %v597_v51 = vmax.f32 %v595_v38, %v596_v42  ;;  %v602_v52 = vsel %vm573_vm3, %v448_v43, -inf  ;;  %v299_v53 = vcombine.high %v291_v44, %v291_v44 }
  0xf5   :  { %v592_v54 = vmax.f32 %v590_v37, %v591_v45  ;;  %v603_v55 = vrot.slane %v602_v52, 4  ;;  %v300_v56 = vcombine.high %v298_v46, %v298_v46  ;;  %v449_v57 = vcombine.low %v283_v34, %v291_v44  ;;  %v189_v58 = vpop.f32.mrf.mxu1 }
  0xf6   :  { %v598_v61 = vrot.slane %v597_v51, 2  ;;  %v463_v62 = vrot.slane %v299_v53, %v2635_v22  ;;  %v301_v63 = vcombine.high %v203_v47, %v203_v47  ;;  %v308_v4 = vrot.slane %v203_v47, %v2635_v22 }
  0xf7   :  { %v593_v0 = vrot.slane %v592_v54, 1  ;;  %v604_v1 = vmax.f32 %v602_v52, %v603_v55  ;;  %v456_v18 = vrot.slane %v449_v57, %v2635_v22  ;;  %v465_v60 = vcombine.low %v298_v46, %v300_v56  ;;  %v2220_v2 = vpop.f32.mrf.mxu1  ;;  %v2711_v56 = vld [vmem:[%s3096_s7] ss:$0 sm:$0xff]  ;;  %s2278_s7 = smov 64  }
  0xf8   :  { %v2677_v3 = vmax.f32 %v597_v51, %v598_v61  ;;  %v315_v5 = vrot.slane %v301_v63, %v2635_v22  ;;  %v185_v6 = vadd.f32 %v2631_v19, %v184_v40  ;;  %v2682_v7 = vmax.f32 %v585_v41, %v586_v50  ;;  %v2721_v2 = vld [vmem:[%s3097_s8] ss:$0 sm:$0xff]  ;;  %s2279_s8 = smov 32  }
  0xf9   :  { %v605_v8 = vrot.slane %v604_v1, 2  ;;  %v464_v9 = vcombine.low %v456_v18, %v463_v62  ;;  %v472_v10 = vrot.slane %v465_v60, %v2635_v22  ;;  %v194_v11 = vpop.f32.mrf.mxu1  ;;  %v2685_v12 = vmax.f32 %v592_v54, %v593_v0 }
  0xfa   :  { %v316_v13 = vcombine.high %v308_v4, %v308_v4  ;;  %v317_v14 = vcombine.high %v315_v5, %v315_v5  ;;  %v479_v15 = vrot.slane %v308_v4, %v2635_v22  ;;  %v204_v20 = vmax.f32 %v185_v6, 0.0 }
  0xfb   :  { %v609_v17 = vsel %vm573_vm3, %v464_v9, -inf  ;;  %v190_v21 = vadd.f32 %v2631_v19, %v189_v58  ;;  %v2223_v23 = vpop.f32.mrf.mxu1  ;;  %v1866_v28 = vpop.f32.mrf.mxu0  ;;  %v2692_v29 = vmax.f32 %v604_v1, %v605_v8  ;;  %v195_v36 = vadd.f32 %v2631_v19, %v194_v11 }
  0xfc   :  { %v610_v24 = vrot.slane %v609_v17, 4  ;;  %v480_v25 = vcombine.low %v472_v10, %v479_v15  ;;  %v481_v26 = vcombine.low %v316_v13, %v315_v5  ;;  %v495_v27 = vrot.slane %v317_v14, %v2635_v22 }
  0xfd   :  { %v318_v30 = vcombine.high %v204_v20, %v204_v20  ;;  %v325_v31 = vrot.slane %v204_v20, %v2635_v22  ;;  %v205_v32 = vmax.f32 %v190_v21, 0.0  ;;  %v1868_v37 = vpop.f32.mrf.mxu0  ;;  %v206_v45 = vmax.f32 %v195_v36, 0.0  ;;  %v2258_v55 = vpop.f32.mrf.mxu1 }
  0xfe   :  { %v611_v33 = vmax.f32 %v609_v17, %v610_v24  ;;  %v488_v34 = vrot.slane %v481_v26, %v2635_v22  ;;  %v616_v35 = vsel %vm573_vm3, %v480_v25, -inf  ;;  %v761_v9 = vadd.f32 %v2258_v55, %v2711_v56 }
  0xff   :  { %v617_v38 = vrot.slane %v616_v35, 4  ;;  %v332_v39 = vrot.slane %v318_v30, %v2635_v22  ;;  %v333_v40 = vcombine.high %v325_v31, %v325_v31  ;;  %v335_v41 = vcombine.high %v205_v32, %v205_v32  ;;  %v2700_v46 = vpop.f32.mrf.mxu0 }
 0x100   :  { %v612_v42 = vrot.slane %v611_v33, 2  ;;  %v496_v43 = vcombine.low %v488_v34, %v495_v27  ;;  %v342_v44 = vrot.slane %v205_v32, %v2635_v22  ;;  %v352_v18 = vcombine.high %v206_v45, %v206_v45 }
 0x101   :  { %v618_v47 = vmax.f32 %v616_v35, %v617_v38  ;;  %v497_v48 = vcombine.low %v325_v31, %v333_v40  ;;  %v511_v50 = vrot.slane %v332_v39, %v2635_v22  ;;  %v334_v51 = vcombine.high %v332_v39, %v332_v39  ;;  %v1873_v57 = vpop.f32.mrf.mxu0  ;;  %v755_v39 = vpop.f32.mrf.mxu1 }
 0x102   :  { %v2705_v52 = vsel %vm573_vm3, %v496_v43, -inf  ;;  %v349_v53 = vrot.slane %v335_v41, %v2635_v22  ;;  %v350_v54 = vcombine.high %v342_v44, %v342_v44  ;;  %v2713_v58 = vmax.f32 %v611_v33, %v612_v42 }
 0x103   :  { %v619_v61 = vrot.slane %v618_v47, 2  ;;  %v504_v62 = vrot.slane %v497_v48, %v2635_v22  ;;  %v513_v63 = vcombine.low %v334_v51, %v342_v44  ;;  %v359_v60 = vrot.slane %v206_v45, %v2635_v22  ;;  %v2723_v4 = vpop.f32.mrf.mxu0 }
 0x104   :  { %v351_v0 = vcombine.high %v349_v53, %v349_v53  ;;  %v527_v1 = vrot.slane %v350_v54, %v2635_v22  ;;  %v366_v11 = vrot.slane %v352_v18, %v2635_v22  ;;  %v795_v21 = vmax.f32 %v761_v9, 0.0 }
 0x105   :  { %v512_v6 = vcombine.low %v504_v62, %v511_v50  ;;  %v520_v8 = vrot.slane %v513_v63, %v2635_v22  ;;  %v367_v13 = vcombine.high %v359_v60, %v359_v60  ;;  %v543_v14 = vrot.slane %v359_v60, %v2635_v22  ;;  %v1878_v15 = vpop.f32.mrf.mxu0  ;;  %v2261_v63 = vpop.f32.mrf.mxu1 }
 0x106   :  { %v529_v10 = vcombine.low %v349_v53, %v351_v0  ;;  %v1867_v23 = vadd.f32 %v2721_v2, %v1866_v28  ;;  %v368_v25 = vcombine.high %v366_v11, %v366_v11  ;;  %v859_v32 = vcombine.high %v795_v21, %v795_v21 }
 0x107   :  { %v630_v17 = vsel %vm573_vm3, %v512_v6, -inf  ;;  %v528_v20 = vcombine.low %v520_v8, %v527_v1  ;;  %v545_v27 = vcombine.low %v367_v13, %v366_v11  ;;  %v2733_v30 = vpop.f32.mrf.mxu0  ;;  %v866_v33 = vrot.slane %v795_v21, %v2670_v49 }
 0x108   :  { %v631_v24 = vrot.slane %v630_v17, 4  ;;  %v536_v26 = vrot.slane %v529_v10, %v2635_v22  ;;  %v1895_v34 = vmax.f32 %v1867_v23, 0.0  ;;  %v2738_v40 = vmax.f32 %v618_v47, %v619_v61 }
 0x109   :  { %v637_v31 = vsel %vm573_vm3, %v528_v20, -inf  ;;  %v552_v38 = vrot.slane %v545_v27, %v2635_v22  ;;  %v1883_v28 = vpop.f32.mrf.mxu0  ;;  %v559_v41 = vrot.slane %v368_v25, %v2635_v22  ;;  %v873_v42 = vrot.slane %v859_v32, %v2670_v49 }
 0x10a   :  { %v632_v35 = vmax.f32 %v630_v17, %v631_v24  ;;  %v638_v36 = vrot.slane %v637_v31, 4  ;;  %v544_v37 = vcombine.low %v536_v26, %v543_v14  ;;  %v874_v43 = vcombine.high %v866_v33, %v866_v33  ;;  %v765_v26 = vpop.f32.mrf.mxu1 }
 0x10b   :  { %v2744_v50 = vrot.slane %v866_v33, %v2670_v49  ;;  %v2746_v51 = vpop.f32.mrf.mxu0  ;;  %v560_v53 = vcombine.low %v552_v38, %v559_v41  ;;  %v875_v55 = vcombine.high %v873_v42, %v873_v42  ;;  %v889_v47 = vrot.slane %v873_v42, %v2670_v49 }
 0x10c   :  { %v633_v44 = vrot.slane %v632_v35, 2  ;;  %v639_v45 = vmax.f32 %v637_v31, %v638_v36  ;;  %v644_v48 = vsel %vm573_vm3, %v544_v37, -inf  ;;  %v896_v22 = vrot.slane %v874_v43, %v2670_v49 }
 0x10d   :  { %v645_v54 = vrot.slane %v644_v48, 4  ;;  %v1907_v61 = vcombine.high %v1895_v34, %v1895_v34  ;;  %v1920_v62 = vsel %vm1919_vm4, %v1895_v34, -inf  ;;  %v1888_v0 = vpop.f32.mrf.mxu0  ;;  %v2754_v18 = vsel %vm573_vm3, %v560_v53, -inf }
 0x10e   :  { %v640_v57 = vrot.slane %v639_v45, 2  ;;  %v2757_v60 = vrot.slane %v875_v55, %v2670_v49  ;;  %v905_v6 = vcombine.high %v889_v47, %v889_v47  ;;  %v2759_v8 = vmax.f32 %v632_v35, %v633_v44 }
 0x10f   :  { %v2751_v1 = vmax.f32 %v644_v48, %v645_v54  ;;  %v1238_v10 = vrot.slane %v896_v22, %v2670_v49  ;;  %v2116_v11 = vcombine.high %v2744_v50, %v896_v22  ;;  %v2765_v13 = vpop.f32.mrf.mxu0  ;;  %v1921_v20 = vrot.slane %v1920_v62, 4 }
 0x110   :  { %v2761_v9 = vmax.f32 %v639_v45, %v640_v57  ;;  %v1256_v15 = vcombine.low %v889_v47, %v2757_v60  ;;  %v1277_v17 = vrot.slane %v905_v6, %v2670_v49  ;;  %v1927_v24 = vsel %vm1919_vm4, %v1907_v61, -inf }
 0x111   :  { %v2772_v23 = vrot.slane %v1238_v10, %v2670_v49  ;;  %v756_v25 = vadd.f32 %v2711_v56, %v755_v39  ;;  %v1893_v27 = vpop.f32.mrf.mxu0  ;;  %v1263_v31 = vrot.slane %v2116_v11, %v2670_v49  ;;  %v1922_v34 = vmax.f32 %v1920_v62, %v1921_v20 }
 0x112   :  { %v1270_v32 = vrot.slane %v1256_v15, %v2670_v49  ;;  %v1292_v33 = vrot.slane %v1277_v17, %v2670_v49  ;;  %v1928_v35 = vrot.slane %v1927_v24, 4  ;;  %v771_v37 = vadd.f32 %v2261_v63, %v2711_v56 }
 0x113   :  { %v794_v36 = vmax.f32 %v756_v25, 0.0  ;;  %v1872_v38 = vadd.f32 %v2721_v2, %v2700_v46  ;;  %v1923_v41 = vrot.slane %v1922_v34, 2  ;;  %v766_v39 = vadd.f32 %v2711_v56, %v765_v26 }
 0x114   :  { %v1278_v28 = vcombine.low %v1263_v31, %v1270_v32  ;;  %v907_v42 = vcombine.high %v2757_v60, %v2757_v60  ;;  %v1929_v43 = vmax.f32 %v1927_v24, %v1928_v35  ;;  %v797_v48 = vmax.f32 %v771_v37, 0.0 }
 0x115   :  { %v810_v44 = vcombine.high %v794_v36, %v794_v36  ;;  %v817_v45 = vrot.slane %v794_v36, %v2670_v49  ;;  %v1924_v54 = vmax.f32 %v1922_v34, %v1923_v41  ;;  %v1896_v55 = vmax.f32 %v1872_v38, 0.0 }
 0x116   :  { %v1285_v53 = vrot.slane %v1278_v28, %v2670_v49  ;;  %v2787_v47 = vmax.f32 %v766_v39, 0.0  ;;  %v1930_v46 = vrot.slane %v1929_v43, 2  ;;  %v957_v0 = vcombine.high %v797_v48, %v797_v48 }
 0x117   :  { %v824_v57 = vrot.slane %v810_v44, %v2670_v49  ;;  %v825_v22 = vcombine.high %v817_v45, %v817_v45  ;;  %v833_v61 = vrot.slane %v817_v45, %v2670_v49  ;;  %v1925_v63 = vrot.slane %v1924_v54, 1 }
 0x118   :  { %v1293_v62 = vcombine.low %v1285_v53, %v1292_v33  ;;  %v964_v6 = vrot.slane %v797_v48, %v2670_v49  ;;  %v1931_v10 = vmax.f32 %v1929_v43, %v1930_v46  ;;  %v971_v25 = vrot.slane %v957_v0, %v2670_v49 }
 0x119   :  { %v826_v11 = vcombine.high %v824_v57, %v824_v57  ;;  %v840_v15 = vrot.slane %v824_v57, %v2670_v49  ;;  %v847_v17 = vrot.slane %v825_v22, %v2670_v49  ;;  %v1926_v24 = vmax.f32 %v1924_v54, %v1925_v63 }
 0x11a   :  { %v1672_v20 = vsel %vm1657_vm5, %v1293_v62, -inf  ;;  %v972_v26 = vcombine.high %v964_v6, %v964_v6  ;;  %v1932_v31 = vrot.slane %v1931_v10, 1  ;;  %v973_v37 = vcombine.high %v971_v25, %v971_v25 }
 0x11b   :  { %v1673_v27 = vrot.slane %v1672_v20, 4  ;;  %v854_v32 = vrot.slane %v826_v11, %v2670_v49  ;;  %v856_v33 = vcombine.high %v840_v15, %v840_v15  ;;  %v1177_v34 = vcombine.low %v833_v61, %v847_v17 }
 0x11c   :  { %v2115_v35 = vcombine.high %v833_v61, %v847_v17  ;;  %v1199_v36 = vrot.slane %v840_v15, %v2670_v49  ;;  %v1933_v28 = vmax.f32 %v1931_v10, %v1932_v31  ;;  %v980_v48 = vrot.slane %v964_v6, %v2670_v49 }
 0x11d   :  { %v2798_v38 = vmax.f32 %v1672_v20, %v1673_v27  ;;  %v858_v41 = vcombine.high %v854_v32, %v854_v32  ;;  %v1216_v39 = vcombine.low %v854_v32, %v856_v33  ;;  %v1185_v43 = vrot.slane %v1177_v34, %v2670_v49 }
 0x11e   :  { %v1192_v44 = vrot.slane %v2115_v35, %v2670_v49  ;;  %v1214_v45 = vrot.slane %v1199_v36, %v2670_v49  ;;  %v2806_v54 = vsel %vm2016_vm6, %v1933_v28, %v1926_v24  ;;  %v987_v61 = vrot.slane %v971_v25, %v2670_v49 }
 0x11f   :  { %v1675_v53 = vrot.slane %v2798_v38, 2  ;;  %v1217_v46 = vcombine.low %v858_v41, %v2744_v50  ;;  %v1224_v57 = vrot.slane %v1216_v39, %v2670_v49  ;;  %v994_v62 = vrot.slane %v972_v26, %v2670_v49  ;;  %v2264_v41 = vpop.f32.mrf.mxu1 }
 0x120   :  { %v1200_v22 = vcombine.low %v1185_v43, %v1192_v44  ;;  %v1001_v63 = vrot.slane %v973_v37, %v2670_v49  ;;  %v1002_v10 = vcombine.high %v980_v48, %v980_v48  ;;  %v1355_v6 = vrot.slane %v980_v48, %v2670_v49 }
 0x121   :  { %v1231_v0 = vrot.slane %v1217_v46, %v2670_v49  ;;  %v1908_v11 = vcombine.high %v1896_v55, %v1896_v55  ;;  %v1004_v17 = vcombine.high %v994_v62, %v994_v62  ;;  %v1934_v26 = vsel %vm1919_vm4, %v1896_v55, -inf }
 0x122   :  { %v1207_v15 = vrot.slane %v1200_v22, %v2670_v49  ;;  %v1394_v50 = vrot.slane %v1001_v63, %v2670_v49  ;;  %v2118_v20 = vcombine.high %v987_v61, %v1001_v63  ;;  %v2818_v27 = vrot.slane %v1355_v6, %v2670_v49 }
 0x123   :  { %v1239_v24 = vcombine.low %v1224_v57, %v1231_v0  ;;  %v1372_v25 = vcombine.low %v994_v62, %v1002_v10  ;;  %v1373_v32 = vcombine.low %v1004_v17, %v987_v61  ;;  %v1935_v37 = vrot.slane %v1934_v26, 4 }
 0x124   :  { %v1215_v31 = vcombine.low %v1207_v15, %v1214_v45  ;;  %v1409_v33 = vrot.slane %v1394_v50, %v2670_v49  ;;  %v2823_v34 = vrot.slane %v2118_v20, %v2670_v49  ;;  %v1941_v28 = vsel %vm1919_vm4, %v1908_v11, -inf }
 0x125   :  { %v1246_v35 = vrot.slane %v1239_v24, %v2670_v49  ;;  %v1380_v36 = vrot.slane %v1372_v25, %v2670_v49  ;;  %v1387_v43 = vrot.slane %v1373_v32, %v2670_v49  ;;  %v1942_v55 = vrot.slane %v1941_v28, 4 }
 0x126   :  { %v1658_v39 = vsel %vm1657_vm5, %v1215_v31, -inf  ;;  %v908_v44 = vcombine.high %v2787_v47, %v2787_v47  ;;  %v1936_v46 = vmax.f32 %v1934_v26, %v1935_v37  ;;  %v915_v57 = vrot.slane %v2787_v47, %v2670_v49 }
 0x127   :  { %v1254_v45 = vcombine.low %v1246_v35, %v2772_v23  ;;  %v1659_v48 = vrot.slane %v1658_v39, 4  ;;  %v1395_v22 = vcombine.low %v1380_v36, %v1387_v43  ;;  %v1943_v61 = vmax.f32 %v1941_v28, %v1942_v55 }
 0x128   :  { %v922_v62 = vrot.slane %v908_v44, %v2670_v49  ;;  %v781_v63 = vadd.f32 %v2264_v41, %v2711_v56  ;;  %v1937_v6 = vrot.slane %v1936_v46, 2  ;;  %v923_v11 = vcombine.high %v915_v57, %v915_v57 }
 0x129   :  { %v1660_v0 = vmax.f32 %v1658_v39, %v1659_v48  ;;  %v1665_v10 = vsel %vm1657_vm5, %v1254_v45, -inf  ;;  %v1402_v17 = vrot.slane %v1395_v22, %v2670_v49  ;;  %v1944_v23 = vrot.slane %v1943_v61, 2  ;;  %v775_v39 = vpop.f32.mrf.mxu1 }
 0x12a   :  { %v1666_v15 = vrot.slane %v1665_v10, 4  ;;  %v924_v50 = vcombine.high %v922_v62, %v922_v62  ;;  %v1938_v24 = vmax.f32 %v1936_v46, %v1937_v6  ;;  %v931_v47 = vrot.slane %v915_v57, %v2670_v49 }
 0x12b   :  { %v1661_v20 = vrot.slane %v1660_v0, 2  ;;  %v938_v25 = vrot.slane %v922_v62, %v2670_v49  ;;  %v2843_v31 = vcombine.low %v1402_v17, %v1409_v33  ;;  %v1945_v32 = vmax.f32 %v1943_v61, %v1944_v23 }
 0x12c   :  { %v2841_v26 = vmax.f32 %v1665_v10, %v1666_v15  ;;  %v945_v35 = vrot.slane %v923_v11, %v2670_v49  ;;  %v1939_v37 = vrot.slane %v1938_v24, 1  ;;  %v952_v28 = vrot.slane %v924_v50, %v2670_v49 }
 0x12d   :  { %v2846_v36 = vmax.f32 %v1660_v0, %v1661_v20  ;;  %v953_v41 = vcombine.high %v931_v47, %v931_v47  ;;  %v1946_v43 = vrot.slane %v1945_v32, 1  ;;  %v1294_v44 = vcombine.low %v907_v42, %v931_v47 }
 0x12e   :  { %v955_v55 = vcombine.high %v945_v35, %v945_v35  ;;  %v799_v45 = vmax.f32 %v781_v63, 0.0  ;;  %v2853_v48 = vmax.f32 %v1938_v24, %v1939_v37  ;;  %v1333_v57 = vcombine.low %v938_v25, %v952_v28  ;;  %v2267_v63 = vpop.f32.mrf.mxu1 }
 0x12f   :  { %v1663_v33 = vrot.slane %v2846_v36, 1  ;;  %v1295_v46 = vcombine.low %v945_v35, %v953_v41  ;;  %v2855_v22 = vmax.f32 %v1945_v32, %v1946_v43  ;;  %v1302_v61 = vrot.slane %v1294_v44, %v2670_v49 }
 0x130   :  { %v1316_v62 = vrot.slane %v955_v55, %v2670_v49  ;;  %v2117_v0 = vcombine.high %v938_v25, %v952_v28  ;;  %v1341_v6 = vrot.slane %v1333_v57, %v2670_v49  ;;  %v1055_v60 = vcombine.high %v799_v45, %v799_v45 }
 0x131   :  { %v1309_v10 = vrot.slane %v1295_v46, %v2670_v49  ;;  %v1062_v42 = vrot.slane %v799_v45, %v2670_v49  ;;  %v1877_v17 = vadd.f32 %v2721_v2, %v2723_v4  ;;  %v776_v23 = vadd.f32 %v2711_v56, %v775_v39 }
 0x132   :  { %v1331_v11 = vrot.slane %v1316_v62, %v2670_v49  ;;  %v1348_v15 = vrot.slane %v2117_v0, %v2670_v49  ;;  %v1069_v20 = vrot.slane %v1055_v60, %v2670_v49  ;;  %v791_v37 = vadd.f32 %v2267_v63, %v2711_v56 }
 0x133   :  { %v1317_v50 = vcombine.low %v1302_v61, %v1309_v10  ;;  %v1070_v24 = vcombine.high %v1062_v42, %v1062_v42  ;;  %v1078_v47 = vrot.slane %v1062_v42, %v2670_v49  ;;  %v1897_v32 = vmax.f32 %v1877_v17, 0.0  ;;  %v785_v17 = vpop.f32.mrf.mxu1 }
 0x134   :  { %v1356_v25 = vcombine.low %v1341_v6, %v1348_v15  ;;  %v798_v35 = vmax.f32 %v776_v23, 0.0  ;;  %v1071_v41 = vcombine.high %v1069_v20, %v1069_v20  ;;  %v1085_v43 = vrot.slane %v1069_v20, %v2670_v49 }
 0x135   :  { %v1324_v28 = vrot.slane %v1317_v50, %v2670_v49  ;;  %v1092_v4 = vrot.slane %v1070_v24, %v2670_v49  ;;  %v1909_v55 = vcombine.high %v1897_v32, %v1897_v32  ;;  %v1948_v44 = vsel %vm1919_vm4, %v1897_v32, -inf }
 0x136   :  { %v2874_v39 = vrot.slane %v1356_v25, %v2670_v49  ;;  %v1006_v45 = vcombine.high %v798_v35, %v798_v35  ;;  %v2878_v57 = vrot.slane %v1071_v41, %v2670_v49  ;;  %v1101_v61 = vcombine.high %v1085_v43, %v1085_v43 }
 0x137   :  { %v1332_v46 = vcombine.low %v1324_v28, %v1331_v11  ;;  %v1489_v62 = vcombine.low %v1078_v47, %v1092_v4  ;;  %v2119_v10 = vcombine.high %v1078_v47, %v1092_v4  ;;  %v1511_v6 = vrot.slane %v1085_v43, %v2670_v49 }
 0x138   :  { %v1371_v0 = vcombine.low %v2874_v39, %v2818_v27  ;;  %v1949_v60 = vrot.slane %v1948_v44, 4  ;;  %v2888_v15 = vcombine.low %v2878_v57, %v1101_v61  ;;  %v1955_v11 = vsel %vm1919_vm4, %v1909_v55, -inf }
 0x139   :  { %v2884_v42 = vsel %vm1657_vm5, %v1332_v46, -inf  ;;  %v1497_v63 = vrot.slane %v1489_v62, %v2670_v49  ;;  %v1504_v50 = vrot.slane %v2119_v10, %v2670_v49  ;;  %v1526_v20 = vrot.slane %v1511_v6, %v2670_v49 }
 0x13a   :  { %v1680_v23 = vrot.slane %v2884_v42, 4  ;;  %v1950_v24 = vmax.f32 %v1948_v44, %v1949_v60  ;;  %v1956_v47 = vrot.slane %v1955_v11, 4  ;;  %v1013_v25 = vrot.slane %v798_v35, %v2670_v49 }
 0x13b   :  { %v1020_v32 = vrot.slane %v1006_v45, %v2670_v49  ;;  %v801_v28 = vmax.f32 %v791_v37, 0.0  ;;  %v1512_v41 = vcombine.low %v1497_v63, %v1504_v50  ;;  %v1882_v4 = vadd.f32 %v2721_v2, %v2733_v30 }
 0x13c   :  { %v1951_v43 = vrot.slane %v1950_v24, 2  ;;  %v786_v55 = vadd.f32 %v2711_v56, %v785_v17  ;;  %v1957_v46 = vmax.f32 %v1955_v11, %v1956_v47  ;;  %v1021_v61 = vcombine.high %v1013_v25, %v1013_v25 }
 0x13d   :  { %v1022_v62 = vcombine.high %v1020_v32, %v1020_v32  ;;  %v1029_v10 = vrot.slane %v1013_v25, %v2670_v49  ;;  %v1519_v44 = vrot.slane %v1512_v41, %v2670_v49  ;;  %v1036_v35 = vrot.slane %v1020_v32, %v2670_v49 }
 0x13e   :  { %v1952_v6 = vmax.f32 %v1950_v24, %v1951_v43  ;;  %v1159_v45 = vrot.slane %v801_v28, %v2670_v49  ;;  %v1958_v37 = vrot.slane %v1957_v46, 2  ;;  %v1043_v60 = vrot.slane %v1021_v61, %v2670_v49 }
 0x13f   :  { %v1050_v63 = vrot.slane %v1022_v62, %v2670_v49  ;;  %v1051_v30 = vcombine.high %v1029_v10, %v1029_v10  ;;  %v1527_v50 = vcombine.low %v1519_v44, %v1526_v20  ;;  %v1052_v11 = vcombine.high %v1036_v35, %v1036_v35 }
 0x140   :  { %v1953_v56 = vrot.slane %v1952_v6, 1  ;;  %v1160_v17 = vcombine.high %v1159_v45, %v1159_v45  ;;  %v2905_v47 = vmax.f32 %v1957_v46, %v1958_v37  ;;  %v1053_v25 = vcombine.high %v1043_v60, %v1043_v60 }
 0x141   :  { %v1054_v14 = vcombine.high %v1050_v63, %v1050_v63  ;;  %v1412_v41 = vcombine.low %v1029_v10, %v1043_v60  ;;  %v2908_v24 = vsel %vm1657_vm5, %v1527_v50, -inf  ;;  %v1433_v28 = vrot.slane %v1051_v30, %v2670_v49 }
 0x142   :  { %v2910_v32 = vmax.f32 %v1952_v6, %v1953_v56  ;;  %v1451_v43 = vcombine.low %v1050_v63, %v1052_v11  ;;  %v1960_v20 = vrot.slane %v2905_v47, 1  ;;  %v1450_v44 = vcombine.low %v1053_v25, %v1036_v35 }
 0x143   :  { %v1426_v62 = vrot.slane %v1412_v41, %v2670_v49  ;;  %v1448_v46 = vrot.slane %v1433_v28, %v2670_v49  ;;  %v2919_v10 = vrot.slane %v1054_v14, %v2670_v49  ;;  %v1167_v6 = vrot.slane %v1159_v45, %v2670_v49 }
 0x144   :  { %v1465_v37 = vrot.slane %v1451_v43, %v2670_v49  ;;  %v1458_v63 = vrot.slane %v1450_v44, %v2670_v49  ;;  %v1174_v30 = vrot.slane %v1160_v17, %v2670_v49  ;;  %v1898_v50 = vmax.f32 %v1882_v4, 0.0 }
 0x145   :  { %v1434_v60 = vcombine.low %v2823_v34, %v1426_v62  ;;  %v1175_v56 = vcombine.high %v1167_v6, %v1167_v6  ;;  %v800_v11 = vmax.f32 %v786_v55, 0.0  ;;  %v1103_v35 = vcombine.high %v2878_v57, %v2878_v57 }
 0x146   :  { %v1536_v25 = vrot.slane %v2888_v15, %v2670_v49  ;;  %v2930_v41 = vcombine.low %v1458_v63, %v1465_v37  ;;  %v1176_v45 = vcombine.high %v1174_v30, %v1174_v30  ;;  %v1910_v28 = vcombine.high %v1898_v50, %v1898_v50 }
 0x147   :  { %v1441_v14 = vrot.slane %v1434_v60, %v2670_v49  ;;  %v2932_v34 = vcombine.low %v1174_v30, %v1175_v56  ;;  %v1962_v43 = vsel %vm1919_vm4, %v1898_v50, -inf  ;;  %v1104_v17 = vcombine.high %v800_v11, %v800_v11 }
 0x148   :  { %v1111_v4 = vrot.slane %v800_v11, %v2670_v49  ;;  %v2939_v57 = vrot.slane %v1176_v45, %v2670_v49  ;;  %v1963_v62 = vrot.slane %v1962_v43, 4  ;;  %v1969_v15 = vsel %vm1919_vm4, %v1910_v28, -inf }
 0x149   :  { %v2936_v55 = vcombine.low %v1441_v14, %v1448_v46  ;;  %v1621_v44 = vrot.slane %v2932_v34, %v2670_v49  ;;  %v1970_v37 = vrot.slane %v1969_v15, 4  ;;  %v1118_v60 = vrot.slane %v1104_v17, %v2670_v49 }
 0x14a   :  { %v1119_v63 = vcombine.high %v1111_v4, %v1111_v4  ;;  %v1643_v30 = vrot.slane %v2939_v57, %v2670_v49  ;;  %v1964_v50 = vmax.f32 %v1962_v43, %v1963_v62  ;;  %v1127_v46 = vrot.slane %v1111_v4, %v2670_v49 }
 0x14b   :  { %v1887_v56 = vadd.f32 %v2721_v2, %v2746_v51  ;;  %v1971_v11 = vmax.f32 %v1969_v15, %v1970_v37  ;;  %v1120_v14 = vcombine.high %v1118_v60, %v1118_v60  ;;  %v1134_v45 = vrot.slane %v1118_v60, %v2670_v49 }
 0x14c   :  { %v1141_v28 = vrot.slane %v1119_v63, %v2670_v49  ;;  %v1965_v34 = vrot.slane %v1964_v50, 2  ;;  %v1529_v5 = vcombine.low %v1103_v35, %v1127_v46  ;;  %v1892_v17 = vadd.f32 %v2721_v2, %v2765_v13 }
 0x14d   :  { %v1899_v19 = vmax.f32 %v1887_v56, 0.0  ;;  %v1972_v16 = vrot.slane %v1971_v11, 2  ;;  %v1148_v43 = vrot.slane %v1120_v14, %v2670_v49  ;;  %v1150_v62 = vcombine.high %v1134_v45, %v1134_v45 }
 0x14e   :  { %v1550_v4 = vrot.slane %v1141_v28, %v2670_v49  ;;  %v1966_v21 = vmax.f32 %v1964_v50, %v1965_v34  ;;  %v1543_v51 = vrot.slane %v1529_v5, %v2670_v49  ;;  %v2120_v15 = vcombine.high %v1127_v46, %v1141_v28 }
 0x14f   :  { %v1911_v37 = vcombine.high %v1899_v19, %v1899_v19  ;;  %v1152_v60 = vcombine.high %v1148_v43, %v1148_v43  ;;  %v1568_v61 = vcombine.low %v1134_v45, %v1148_v43  ;;  %v1589_v35 = vrot.slane %v1150_v62, %v2670_v49 }
 0x150   :  { %v1565_v63 = vrot.slane %v1550_v4, %v2670_v49  ;;  %v1967_v56 = vrot.slane %v1966_v21, 1  ;;  %v1551_v2 = vcombine.low %v1536_v25, %v1543_v51  ;;  %v1575_v13 = vrot.slane %v2120_v15, %v2670_v49 }
 0x151   :  { %v1976_v14 = vsel %vm1919_vm4, %v1899_v19, -inf  ;;  %v1582_v50 = vrot.slane %v1568_v61, %v2670_v49  ;;  %v1604_v5 = vrot.slane %v1589_v35, %v2670_v49  ;;  %v1606_v46 = vcombine.low %v1152_v60, %v1167_v6 }
 0x152   :  { %v1977_v28 = vrot.slane %v1976_v14, 4  ;;  %v1558_v34 = vrot.slane %v1551_v2, %v2670_v49  ;;  %v1983_v45 = vsel %vm1919_vm4, %v1911_v37, -inf  ;;  %v1900_v43 = vmax.f32 %v1892_v17, 0.0 }
 0x153   :  { %v1961_v25 = vmax.f32 %v2905_v47, %v1960_v20  ;;  %v1590_v62 = vcombine.low %v1575_v13, %v1582_v50  ;;  %v1614_v19 = vrot.slane %v1606_v46, %v2670_v49  ;;  %v1984_v61 = vrot.slane %v1983_v45, 4 }
 0x154   :  { %v1978_v4 = vmax.f32 %v1976_v14, %v1977_v28  ;;  %v1566_v51 = vcombine.low %v1558_v34, %v1565_v63  ;;  %v1912_v6 = vcombine.high %v1900_v43, %v1900_v43  ;;  %v1990_v15 = vsel %vm1919_vm4, %v1900_v43, -inf }
 0x155   :  { %v1968_v60 = vmax.f32 %v1966_v21, %v1967_v56  ;;  %v1597_v37 = vrot.slane %v1590_v62, %v2670_v49  ;;  %v2971_v17 = vcombine.low %v1614_v19, %v1621_v44  ;;  %v1985_v2 = vmax.f32 %v1983_v45, %v1984_v61 }
 0x156   :  { %v1979_v35 = vrot.slane %v1978_v4, 2  ;;  %v2974_v47 = vsel %vm1657_vm5, %v1566_v51, -inf  ;;  %v1991_v20 = vrot.slane %v1990_v15, 4  ;;  %v1997_v13 = vsel %vm1919_vm4, %v1912_v6, -inf }
 0x157   :  { %v1973_v14 = vmax.f32 %v1971_v11, %v1972_v16  ;;  %v2977_v50 = vcombine.low %v1597_v37, %v1604_v5  ;;  %v1722_v63 = vrot.slane %v2974_v47, 4  ;;  %v1986_v21 = vrot.slane %v1985_v2, 2 }
 0x158   :  { %v1980_v46 = vmax.f32 %v1978_v4, %v1979_v35  ;;  %v1992_v56 = vmax.f32 %v1990_v15, %v1991_v20  ;;  %v1998_v28 = vrot.slane %v1997_v13, 4  ;;  %v2076_v44 = vsel %vm2018_vm7, %v2853_v48, %v2806_v54 }
 0x159   :  { %v1974_v34 = vrot.slane %v1973_v14, 1  ;;  %v1987_v43 = vmax.f32 %v1985_v2, %v1986_v21  ;;  %v2077_v62 = vsel %vm2020_vm8, %v2855_v22, %v2076_v44  ;;  %v1480_v16 = vrot.slane %v2930_v41, %v2670_v49 }
 0x15a   :  { %v1981_v45 = vrot.slane %v1980_v46, 1  ;;  %v1993_v11 = vrot.slane %v1992_v56, 2  ;;  %v1999_v5 = vmax.f32 %v1997_v13, %v1998_v28  ;;  %v2078_v4 = vsel %vm2022_vm9, %v2910_v32, %v2077_v62 }
 0x15b   :  { %v1975_v19 = vmax.f32 %v1973_v14, %v1974_v34  ;;  %v1988_v51 = vrot.slane %v1987_v43, 1  ;;  %v2079_v6 = vsel %vm2024_vm10, %v1961_v25, %v2078_v4  ;;  %v1487_v54 = vrot.slane %v2919_v10, %v2670_v49 }
 0x15c   :  { %v1982_v61 = vmax.f32 %v1980_v46, %v1981_v45  ;;  %v1994_v48 = vmax.f32 %v1992_v56, %v1993_v11  ;;  %v2000_v15 = vrot.slane %v1999_v5, 2  ;;  %v2080_v22 = vsel %vm2026_vm11, %v1968_v60, %v2079_v6 }
 0x15d   :  { %v1664_v41 = vmax.f32 %v2846_v36, %v1663_v33  ;;  %v1989_v37 = vmax.f32 %v1987_v43, %v1988_v51  ;;  %v2081_v35 = vsel %vm2028_vm12, %v1975_v19, %v2080_v22  ;;  %v1488_v2 = vcombine.low %v1480_v16, %v1487_v54 }
 0x15e   :  { %v1668_v32 = vrot.slane %v2841_v26, 2  ;;  %v1995_v20 = vrot.slane %v1994_v48, 1  ;;  %v2001_v13 = vmax.f32 %v1999_v5, %v2000_v15  ;;  %2085 = vrot.lane.b32.xlu1 %v2081_v35, %s2278_s7  ;;  %v1676_v10 = vmax.f32 %v2798_v38, %v1675_v53 }
 0x15f   :  { %v1681_v25 = vmax.f32 %v2884_v42, %v1680_v23  ;;  %v2082_v36 = vsel %vm2016_vm6, %v1989_v37, %v1982_v61  ;;  %v1686_v60 = vsel %vm1657_vm5, %v1371_v0, -inf  ;;  %v1693_v14 = vsel %vm1657_vm5, %v2843_v31, -inf }
 0x160   :  { %v1669_v33 = vmax.f32 %v2841_v26, %v1668_v32  ;;  %v1996_v46 = vmax.f32 %v1994_v48, %v1995_v20  ;;  %v2002_v21 = vrot.slane %v2001_v13, 1  ;;  %v1677_v56 = vrot.slane %v1676_v10, 1 }
 0x161   :  { %v1682_v38 = vrot.slane %v1681_v25, 2  ;;  %v1687_v28 = vrot.slane %v1686_v60, 4  ;;  %v1694_v34 = vrot.slane %v1693_v14, 4  ;;  %v1700_v42 = vsel %vm1657_vm5, %v2936_v55, -inf }
 0x162   :  { %v1670_v53 = vrot.slane %v1669_v33, 1  ;;  %v2003_v23 = vmax.f32 %v2001_v13, %v2002_v21  ;;  %v2083_v26 = vsel %vm2018_vm7, %v1996_v46, %v2082_v36  ;;  %v1678_v44 = vmax.f32 %v1676_v10, %v1677_v56 }
 0x163   :  { %v1683_v27 = vmax.f32 %v1681_v25, %v1682_v38  ;;  %v1688_v0 = vmax.f32 %v1686_v60, %v1687_v28  ;;  %v1695_v45 = vmax.f32 %v1693_v14, %v1694_v34  ;;  %v1701_v43 = vrot.slane %v1700_v42, 4 }
 0x164   :  { %v1671_v39 = vmax.f32 %v1669_v33, %v1670_v53  ;;  %v2084_v31 = vsel %vm2020_vm8, %v2003_v23, %v2083_v26  ;;  %v1707_v16 = vsel %vm1657_vm5, %v1488_v2, -inf  ;;  %v1636_v11 = vrot.slane %v2971_v17, %v2670_v49 }
 0x165   :  { %v1684_v62 = vrot.slane %v1683_v27, 1  ;;  %2087 = vrot.lane.b32.xlu1 %v2084_v31, %s2278_s7  ;;  %v1689_v5 = vrot.slane %v1688_v0, 2  ;;  %v1696_v55 = vrot.slane %v1695_v45, 2  ;;  %v1702_v19 = vmax.f32 %v1700_v42, %v1701_v43 }
 0x166   :  { %v1708_v4 = vrot.slane %v1707_v16, 4  ;;  %v2047_v51 = vsel %vm2016_vm6, %v1671_v39, %v1664_v41  ;;  %v1644_v6 = vcombine.low %v1636_v11, %v1643_v30  ;;  %v3099_v54 = vrot.slane %v2908_v24, 4 }
 0x167   :  { %v1685_v61 = vmax.f32 %v1683_v27, %v1684_v62  ;;  %v1690_v15 = vmax.f32 %v1688_v0, %v1689_v5  ;;  %v1697_v22 = vmax.f32 %v1695_v45, %v1696_v55  ;;  %v1703_v37 = vrot.slane %v1702_v19, 2 }
 0x168   :  { %v1716_v48 = vmax.f32 %v2908_v24, %v3099_v54  ;;  %v1709_v17 = vmax.f32 %v1707_v16, %v1708_v4  ;;  %v2048_v35 = vsel %vm2018_vm7, %v1678_v44, %v2047_v51  ;;  %v1723_v32 = vmax.f32 %v2974_v47, %v1722_v63 }
 0x169   :  { %v1728_v41 = vsel %vm1657_vm5, %v2977_v50, -inf  ;;  %v1691_v49 = vrot.slane %v1690_v15, 1  ;;  %v1698_v57 = vrot.slane %v1697_v22, 1  ;;  %v1704_v30 = vmax.f32 %v1702_v19, %v1703_v37 }
 0x16a   :  { %v1717_v2 = vrot.slane %v1716_v48, 2  ;;  %v1710_v20 = vrot.slane %v1709_v17, 2  ;;  %v2049_v24 = vsel %vm2020_vm8, %v1685_v61, %v2048_v35  ;;  %v1724_v10 = vrot.slane %v1723_v32, 2 }
 0x16b   :  { %v1729_v25 = vrot.slane %v1728_v41, 4  ;;  %v3100_v36 = vrot.slane %v2751_v1, 2  ;;  %v1692_v60 = vmax.f32 %v1690_v15, %v1691_v49  ;;  %v1705_v14 = vrot.slane %v1704_v30, 1 }
 0x16c   :  { %v1718_v13 = vmax.f32 %v1716_v48, %v1717_v2  ;;  %v1711_v46 = vmax.f32 %v1709_v17, %v1710_v20  ;;  %v1699_v47 = vmax.f32 %v1697_v22, %v1698_v57  ;;  %v1725_v63 = vmax.f32 %v1723_v32, %v1724_v10 }
 0x16d   :  { %v648_v33 = vmax.f32 %v2751_v1, %v3100_v36  ;;  %v1730_v21 = vmax.f32 %v1728_v41, %v1729_v25  ;;  %v1735_v50 = vsel %vm1657_vm5, %v1644_v6, -inf  ;;  %v1706_v56 = vmax.f32 %v1704_v30, %v1705_v14 }
 0x16e   :  { %v1712_v38 = vrot.slane %v1711_v46, 1  ;;  %v2050_v53 = vsel %vm2022_vm9, %v1692_v60, %v2049_v24  ;;  %v1736_v28 = vrot.slane %v1735_v50, 4  ;;  %v1719_v42 = vrot.slane %v1718_v13, 1 }
 0x16f   :  { %v2051_v34 = vsel %vm2024_vm10, %v1699_v47, %v2050_v53  ;;  %v1726_v23 = vrot.slane %v1725_v63, 1  ;;  %v1731_v26 = vrot.slane %v1730_v21, 2  ;;  %v3101_v39 = vrot.slane %v2677_v3, 1 }
 0x170   :  { %v1713_v44 = vmax.f32 %v1711_v46, %v1712_v38  ;;  %v2052_v1 = vsel %vm2026_vm11, %v1706_v56, %v2051_v34  ;;  %v1737_v27 = vmax.f32 %v1735_v50, %v1736_v28  ;;  %v3102_v31 = vrot.slane %v2692_v29, 1 }
 0x171   :  { %v601_v0 = vmax.f32 %v2677_v3, %v3101_v39  ;;  %v1727_v45 = vmax.f32 %v1725_v63, %v1726_v23  ;;  %v1732_v43 = vmax.f32 %v1730_v21, %v1731_v26  ;;  %v614_v16 = vrot.slane %v2713_v58, 1 }
 0x172   :  { %v608_v62 = vmax.f32 %v2692_v29, %v3102_v31  ;;  %v2053_v11 = vsel %vm2028_vm12, %v1713_v44, %v2052_v1  ;;  %v1738_v5 = vrot.slane %v1737_v27, 2  ;;  %v621_v55 = vrot.slane %v2738_v40, 1 }
 0x173   :  { %v3103_v19 = vrot.slane %v2705_v52, 4  ;;  %2057 = vrot.lane.b32.xlu0 %v2053_v11, %s2279_s8  ;;  %v1720_v3 = vmax.f32 %v1718_v13, %v1719_v42  ;;  %v1733_v61 = vrot.slane %v1732_v43, 1  ;;  %v615_v51 = vmax.f32 %v2713_v58, %v614_v16 }
 0x174   :  { %v2017_v29 = vsel %vm2016_vm6, %v2682_v7, %v2673_v59  ;;  %v1739_v6 = vmax.f32 %v1737_v27, %v1738_v5  ;;  %v622_v54 = vmax.f32 %v2738_v40, %v621_v55  ;;  %v635_v17 = vrot.slane %v2759_v8, 1 }
 0x175   :  { %v625_v4 = vmax.f32 %v2705_v52, %v3103_v19  ;;  %v2019_v15 = vsel %vm2018_vm7, %v2685_v12, %v2017_v29  ;;  %v1734_v22 = vmax.f32 %v1732_v43, %v1733_v61  ;;  %v2054_v52 = vsel %vm2016_vm6, %v1727_v45, %v1720_v3 }
 0x176   :  { %v2021_v37 = vsel %vm2020_vm8, %v601_v0, %v2019_v15  ;;  %v1740_v35 = vrot.slane %v1739_v6, 1  ;;  %v642_v59 = vrot.slane %v2761_v9, 1  ;;  %v636_v32 = vmax.f32 %v2759_v8, %v635_v17 }
 0x177   :  { %v626_v48 = vrot.slane %v625_v4, 2  ;;  %v2023_v2 = vsel %vm2022_vm9, %v608_v62, %v2021_v37  ;;  %v2055_v7 = vsel %vm2018_vm7, %v1734_v22, %v2054_v52  ;;  %v649_v12 = vrot.slane %v648_v33, 1 }
 0x178   :  { %v2025_v40 = vsel %vm2024_vm10, %v615_v51, %v2023_v2  ;;  %v1741_v41 = vmax.f32 %v1739_v6, %v1740_v35  ;;  %v643_v30 = vmax.f32 %v2761_v9, %v642_v59  ;;  %v3104_v24 = vrot.slane %v2754_v18, 4 }
 0x179   :  { %v627_v58 = vmax.f32 %v625_v4, %v626_v48  ;;  %v2027_v57 = vsel %vm2026_vm11, %v622_v54, %v2025_v40  ;;  %v650_v20 = vmax.f32 %v648_v33, %v649_v12 }
 0x17a   :  { %v653_v13 = vmax.f32 %v2754_v18, %v3104_v24  ;;  %v2056_v10 = vsel %vm2020_vm8, %v1741_v41, %v2055_v7  ;;  %v2030_v36 = vsel %vm2016_vm6, %v643_v30, %v636_v32 }
 0x17b   :  { %v628_v49 = vrot.slane %v627_v58, 1  ;;  %2059 = vrot.lane.b32.xlu0 %v2056_v10, %s2279_s8  ;;  %v2031_v60 = vsel %vm2018_vm7, %v650_v20, %v2030_v36 }
 0x17c   :  { %v654_v8 = vrot.slane %v653_v13, 2 }
 0x17d   :  { %v629_v25 = vmax.f32 %v627_v58, %v628_v49 }
 0x17e   :  { %v655_v46 = vmax.f32 %v653_v13, %v654_v8 }
 0x17f   :  { %v2029_v14 = vsel %vm2028_vm12, %v629_v25, %v2027_v57 }
 0x180   :  { %v656_v47 = vrot.slane %v655_v46, 1 }
 0x182   :  { %v657_v9 = vmax.f32 %v655_v46, %v656_v47 }
 0x184   :  { %v2032_v33 = vsel %vm2020_vm8, %v657_v9, %v2031_v60 }
 0x1d0   :  { %v2086_v18 = vpop.permute.xlu1 %2085 }
 0x1d7   :  { %v2088_v53 = vpop.permute.xlu1 %2087 }
 0x1e5   :  { %v2058_v63 = vpop.permute.xlu0 %2057 }
 0x1e6   :  { %v2091_v21 = vsel %vm1781_vm2, %v2029_v14, %v2058_v63 }
 0x1e7   :  { %v2094_v50 = vsel %vm2093_vm13, %v2091_v21, %v2086_v18 }
 0x1e8   :  { %v2096_v56 = vsel %vm60_vm1, %v2094_v50, 0.0 }
 0x1e9   :  { %2098 = vst [vmem:[%s3098_s9] sm:$0xff] %v2096_v56 }
 0x1ed   :  { %v2060_v38 = vpop.permute.xlu0 %2059 }
 0x1ee   :  { %v2092_v28 = vsel %vm1781_vm2, %v2032_v33, %v2060_v38 }
 0x1ef   :  { %v2095_v34 = vsel %vm2093_vm13, %v2092_v28, %v2088_v53 }
 0x1f0   :  { %v2097_v42 = vsel %vm60_vm1, %v2095_v34, 0.0 }
 0x1f1   :  { %2099 = vst [vmem:[%s3098_s9 + $0x8] sm:$0xf] %v2097_v42 }

// kernel: ptr_extract_summ_forward.5
= control target key start
LH: loop header
LB: loop body
LE: loop exit
PB: predicated region body
PF: predicated region fallthrough
CT: control target
= control target key end

     0   :  { %v59_v0 = vlaneseq  ;;  %v2110_v3 = vmov 0.0   ;;  %v2111_v4 = vmov 1983009808   ;;  %vm2112_vm0 = vmmov 0   ;;  %s2113_s20 = smov 64   ;;  %s2114_s23 = smov 32   ;;  %s2619_s1 = inlined_call_operand.vmem [shape: f32[2,96,128], index: 1, kind: input, shape index: {}]   ;;  %s2620_s2 = inlined_call_operand.vmem [shape: f32[2,32,128], index: 2, kind: input, shape index: {}]   ;;  %s2621_s0 = inlined_call_operand.vmem [shape: f32[6,2,96], index: 0, kind: input, shape index: {}]   ;;  %s2622_s4 = inlined_call_operand.vmem [shape: f32[2,2,32], index: 4, kind: input, shape index: {}]   ;;  %s2623_s3 = inlined_call_operand.vmem [shape: f32[2,1,128], index: 3, kind: input, shape index: {}]   ;;  %s2624_s5 = inlined_call_operand.vmem [shape: f32[2,2,32], index: 5, kind: input, shape index: {}]   ;;  %s2625_s6 = inlined_call_operand.vmem [shape: f32[6,2,64], index: 6, kind: output, shape index: {}]  }
   0x1   :  { %v40_v1 = vld [vmem:[%s2619_s1 + $0x58] sm:$0xff]  ;;  %v39_v2 = vld [vmem:[%s2619_s1 + $0x50] sm:$0xff]  ;;  %1850 = vmatprep.subr.mxu1 %v2110_v3  ;;  %v57_v5 = vunpack.c.l.s4 %v2111_v4  ;;  %1858 = vmatprep.mubr.msk.f32.mxu1 %vm2112_vm0, %v2110_v3  ;;  %v38_v7 = vld [vmem:[%s2619_s1 + $0x48] sm:$0xff]  ;;  %vm198_vm1 = vcmask 261120   ;;  %vm79_vm2 = vcmask 785408   ;;  %vm1673_vm3 = vcmask 517120  }
   0x2   :  { %1823 = vmatprep.subr.mxu0 %v40_v1  ;;  %v60_v6 = vshrl.u32 %v59_v0, 7  ;;  %v2165_v9 = vld [vmem:[%s2620_s2 + $0x18] sm:$0xff]  ;;  %v37_v10 = vld [vmem:[%s2619_s1 + $0x40] sm:$0xff]  ;;  %v2189_v17 = vld [vmem:[%s2620_s2 + $0x10] sm:$0xff] }
   0x3   :  { %1824 = vmatpush3.msra.mxu0 %v40_v1  ;;  %v58_v8 = vunpack.c.0.s8 %v57_v5  ;;  %1851 = vmatpush3.msra.mxu1 %v2165_v9  ;;  %v23_v11 = vld [vmem:[%s2621_s0] sm:$0x3]  ;;  %v24_v12 = vld [vmem:[%s2621_s0 + $0x2] sm:$0x3]  ;;  %v25_v14 = vld [vmem:[%s2621_s0 + $0x4] sm:$0x3] }
   0x4   :  { %1825 = vmatprep.subr.mxu0 %v39_v2  ;;  %1852 = vmatprep.subr.mxu1 %v2110_v3  ;;  %v26_v15 = vld [vmem:[%s2621_s0 + $0x6] sm:$0x3]  ;;  %v54_v16 = vcombine.low %v23_v11, %v24_v12  ;;  %v36_v18 = vld [vmem:[%s2619_s1 + $0x38] sm:$0xff]  ;;  %v2198_v20 = vld [vmem:[%s2620_s2 + $0x8] sm:$0xff] }
   0x5   :  { %1826 = vmatpush3.msra.mxu0 %v39_v2  ;;  %v2177_v13 = vsub.s32 %v58_v8, %v60_v6  ;;  %v55_v19 = vcombine.low %v25_v14, %v26_v15  ;;  %1853 = vmatpush3.msra.mxu1 %v2189_v17  ;;  %v2205_v22 = vld [vmem:[%s2620_s2] sm:$0xff]  ;;  %v35_v23 = vld [vmem:[%s2619_s1 + $0x30] sm:$0xff]  ;;  %v34_v26 = vld [vmem:[%s2619_s1 + $0x28] sm:$0xff] }
   0x6   :  { %1827 = vmatprep.subr.mxu0 %v38_v7  ;;  %1854 = vmatprep.subr.mxu1 %v2110_v3  ;;  %v196_v25 = vld [vmem:[%s2622_s4] sm:$0x3]  ;;  %v32_v29 = vld [vmem:[%s2619_s1 + $0x18] sm:$0xff]  ;;  %v27_v30 = vld [vmem:[%s2621_s0 + $0x8] sm:$0x3] }
   0x7   :  { %1828 = vmatpush3.msra.mxu0 %v38_v7  ;;  %v62_v21 = vrot.slane %v54_v16, %v2177_v13  ;;  %v69_v24 = vrot.slane %v55_v19, %v2177_v13  ;;  %1855 = vmatpush3.msra.mxu1 %v2198_v20  ;;  %v33_v28 = vld [vmem:[%s2619_s1 + $0x20] sm:$0xff]  ;;  %v28_v31 = vld [vmem:[%s2621_s0 + $0xa] sm:$0x3]  ;;  %v31_v32 = vld [vmem:[%s2619_s1 + $0x10] sm:$0xff] }
   0x8   :  { %1829 = vmatprep.subr.mxu0 %v37_v10  ;;  %1856 = vmatprep.subr.mxu1 %v2110_v3  ;;  %v71_v33 = vcombine.low %v27_v30, %v28_v31  ;;  %v30_v34 = vld [vmem:[%s2619_s1 + $0x8] sm:$0xff]  ;;  %v29_v35 = vld [vmem:[%s2619_s1] sm:$0xff] }
   0x9   :  { %1830 = vmatpush3.msra.mxu0 %v37_v10  ;;  %v2219_v27 = vcombine.low %v62_v21, %v69_v24  ;;  %1857 = vmatpush3.msra.mxu1 %v2205_v22  ;;  %v1684_v39 = vld [vmem:[%s2623_s3] ss:$0 sm:$0xff] }
   0xa   :  { %1831 = vmatprep.subr.mxu0 %v36_v18  ;;  %1859 = vmatmul.mubr.msk.f32.vlgmr.msra.gmra.mxu1 %vm198_vm1, %v196_v25  ;;  %v2255_v36 = vrot.slane %v71_v33, %v2177_v13  ;;  %v1689_v47 = vld.sshfl [vmem:[%s2624_s5] sm:$0x3 pattern:$0x76325410] }
   0xb   :  { %1832 = vmatpush3.msra.mxu0 %v36_v18  ;;  %1847 = vmatprep.mubr.msk.f32.mxu0 %vm79_vm2, %v2219_v27 }
   0xc   :  { %1833 = vmatprep.subr.mxu0 %v35_v23  ;;  %1861 = vmatprep.subr.mxu1 %v2110_v3 }
   0xd   :  { %1834 = vmatpush3.msra.mxu0 %v35_v23  ;;  %1862 = vmatpush3.msra.mxu1 %v2165_v9 }
   0xe   :  { %1835 = vmatprep.subr.mxu0 %v34_v26  ;;  %1863 = vmatprep.subr.mxu1 %v2110_v3 }
   0xf   :  { %1836 = vmatpush3.msra.mxu0 %v34_v26  ;;  %1864 = vmatpush3.msra.mxu1 %v2189_v17 }
  0x10   :  { %1837 = vmatprep.subr.mxu0 %v33_v28  ;;  %1865 = vmatprep.subr.mxu1 %v2110_v3 }
  0x11   :  { %1838 = vmatpush3.msra.mxu0 %v33_v28  ;;  %1866 = vmatpush3.msra.mxu1 %v2198_v20 }
  0x12   :  { %1839 = vmatprep.subr.mxu0 %v32_v29  ;;  %1867 = vmatprep.subr.mxu1 %v2110_v3 }
  0x13   :  { %1840 = vmatpush3.msra.mxu0 %v32_v29  ;;  %1868 = vmatpush3.msra.mxu1 %v2205_v22 }
  0x14   :  { %1841 = vmatprep.subr.mxu0 %v31_v32  ;;  %1869 = vmatprep.mubr.msk.f32.mxu1 %vm2112_vm0, %v2110_v3 }
  0x15   :  { %1842 = vmatpush3.msra.mxu0 %v31_v32  ;;  %1872 = vmatprep.subr.mxu1 %v2110_v3 }
  0x16   :  { %1843 = vmatprep.subr.mxu0 %v30_v34 }
  0x17   :  { %1844 = vmatpush3.msra.mxu0 %v30_v34 }
  0x18   :  { %1845 = vmatprep.subr.mxu0 %v29_v35 }
  0x19   :  { %1846 = vmatpush3.msra.mxu0 %v29_v35 }
  0x1a   :  { %1848 = vmatmul.mubr.msk.f32.vlgmr.msra.gmra.mxu0 %vm79_vm2, %v2255_v36  ;;  %1883 = vmatprep.subr.mxu0 %v2110_v3 }
  0x1b   :  { %1884 = vmatpush3.msra.mxu0 %v2165_v9  ;;  %1891 = vmatprep.mubr.msk.f32.mxu0 %vm2112_vm0, %v2110_v3 }
  0x1c   :  { %1885 = vmatprep.subr.mxu0 %v2110_v3 }
  0x1d   :  { %1886 = vmatpush3.msra.mxu0 %v2189_v17 }
  0x1e   :  { %1887 = vmatprep.subr.mxu0 %v2110_v3 }
  0x1f   :  { %1888 = vmatpush3.msra.mxu0 %v2198_v20 }
  0x20   :  { %1889 = vmatprep.subr.mxu0 %v2110_v3 }
  0x21   :  { %1890 = vmatpush3.msra.mxu0 %v2205_v22 }
  0x22   :  { %1905 = vmatprep.subr.mxu0 %v2110_v3 }
  0xca   :  { %v268_v37 = vpop.f32.mrf.mxu1 }
  0xcc   :  { %v1860_v38 = vpop.f32.mrf.mxu1 }
  0xda   :  { %v1849_v40 = vpop.f32.mrf.mxu0 }
  0xdb   :  { %v2276_v41 = vadd.f32 %v1849_v40, %v1684_v39 }
  0xdc   :  { %v150_v42 = vpop.f32.mrf.mxu0 }
  0xdd   :  { %v2278_v43 = vadd.f32 %v1684_v39, %v150_v42 }
  0xdf   :  { %v168_v44 = vrot.slane %v2278_v43, %v2177_v13  ;;  %v161_v24 = vcombine.high %v2278_v43, %v2278_v43 }
  0xe1   :  { %v272_v45 = vadd.f32 %v268_v37, %v168_v44  ;;  %v176_v63 = vcombine.high %v168_v44, %v168_v44  ;;  %v175_v25 = vrot.slane %v161_v24, %v2177_v13  ;;  %v1706_v24 = vld [vmem:[%s2619_s1 + $0x90] sm:$0xff] }
  0xe3   :  { %2014 = vtanh.f32 %v272_v45  ;;  %v1688_v48 = vmul.f32 -1.442695, %v272_v45 }
  0xe5   :  { %2016 = vpow2.f32 %v1688_v48 }
  0xf0   :  { %v2015_v46 = vpop.eup %2014 }
  0xf1   :  { %293 = vrot.lane.b32.xlu0 %v2015_v46, %s2113_s20 }
  0xf2   :  { %v2017_v49 = vpop.eup %2016 }
  0xf3   :  { %v276_v50 = vadd.f32 1.0, %v2017_v49 }
  0xf5   :  { %288 = vrot.lane.b32.xlu0 %v1689_v47, %s2114_s23  ;;  %2018 = vrcp.f32 %v276_v50  ;;  %v177_v47 = vcombine.high %v175_v25, %v175_v25 }
 0x102   :  { %v2019_v51 = vpop.eup %2018 }
 0x163   :  { %v294_v52 = vpop.permute.xlu0 %293 }
 0x164   :  { %v296_v53 = vmul.f32 %v2019_v51, %v294_v52 }
 0x166   :  { %298 = vrot.lane.b32.xlu1 %v296_v53, %s2114_s23 }
 0x167   :  { %v289_v54 = vpop.permute.xlu0 %288 }
 0x168   :  { %v291_v55 = vmul.f32 %v2019_v51, %v289_v54 }
 0x1d8   :  { %v299_v56 = vpop.permute.xlu1 %298 }
 0x1d9   :  { %v301_v57 = vadd.f32 %v299_v56, %v291_v55 }
 0x1db   :  { %2020 = vtanh.f32 %v301_v57 }
 0x1e8   :  { %v2021_v58 = vpop.eup %2020 }
 0x1e9   :  { %304 = vrot.lane.b32.xlu1 %v2021_v58, %s2113_s20 }
 0x25b   :  { %v305_v59 = vpop.permute.xlu1 %304 }
 0x25c   :  { %v307_v60 = vmul.f32 %v2019_v51, %v305_v59 }
 0x25e   :  { %v315_v61 = vrot.slane %v307_v60, %v2177_v13 }
 0x260   :  { %316 = vrot.lane.b32.xlu0 %v315_v61, %s2114_s23 }
 0x2d2   :  { %v2291_v62 = vpop.permute.xlu0 %316 }
 0x2d3   :  { %1870 = vmatmul.mubr.msk.f32.vlgmr.msra.gmra.mxu1 %vm198_vm1, %v2291_v62 }
 0x2d4   :  { %1873 = vmatpush3.msra.mxu1 %v2165_v9  ;;  %1880 = vmatprep.mubr.msk.f32.mxu1 %vm2112_vm0, %v2110_v3 }
 0x2d5   :  { %1874 = vmatprep.subr.mxu1 %v2110_v3 }
 0x2d6   :  { %1875 = vmatpush3.msra.mxu1 %v2189_v17 }
 0x2d7   :  { %1876 = vmatprep.subr.mxu1 %v2110_v3 }
 0x2d8   :  { %1877 = vmatpush3.msra.mxu1 %v2198_v20 }
 0x2d9   :  { %1878 = vmatprep.subr.mxu1 %v2110_v3 }
 0x2da   :  { %1879 = vmatpush3.msra.mxu1 %v2205_v22 }
 0x2db   :  { %1894 = vmatprep.subr.mxu1 %v2110_v3 }
 0x393   :  { %v386_v0 = vpop.f32.mrf.mxu1 }
 0x394   :  { %v390_v1 = vadd.f32 %v386_v0, %v176_v63  ;;  %v2358_v63 = vrot.slane %v2276_v41, %v2177_v13 }
 0x395   :  { %v1871_v2 = vpop.f32.mrf.mxu1 }
 0x396   :  { %2022 = vtanh.f32 %v390_v1  ;;  %v1691_v5 = vmul.f32 -1.442695, %v390_v1 }
 0x398   :  { %2024 = vpow2.f32 %v1691_v5 }
 0x3a3   :  { %v2023_v4 = vpop.eup %2022 }
 0x3a4   :  { %400 = vrot.lane.b32.xlu1 %v2023_v4, %s2113_s20 }
 0x3a5   :  { %v2025_v6 = vpop.eup %2024 }
 0x3a6   :  { %v394_v7 = vadd.f32 1.0, %v2025_v6 }
 0x3a8   :  { %2026 = vrcp.f32 %v394_v7 }
 0x3b5   :  { %v2027_v8 = vpop.eup %2026 }
 0x3b6   :  { %v398_v12 = vmul.f32 %v2027_v8, %v301_v57 }
 0x416   :  { %v401_v10 = vpop.permute.xlu1 %400 }
 0x417   :  { %v403_v11 = vmul.f32 %v2027_v8, %v401_v10 }
 0x419   :  { %405 = vrot.lane.b32.xlu0 %v403_v11, %s2114_s23 }
 0x48b   :  { %v406_v14 = vpop.permute.xlu0 %405 }
 0x48c   :  { %v408_v15 = vadd.f32 %v406_v14, %v398_v12  ;;  %v1711_v14 = vld [vmem:[%s2619_s1 + $0xb8] sm:$0xff] }
 0x48e   :  { %2028 = vtanh.f32 %v408_v15 }
 0x49b   :  { %v2029_v16 = vpop.eup %2028 }
 0x49c   :  { %411 = vrot.lane.b32.xlu1 %v2029_v16, %s2113_s20  ;;  %v1709_v16 = vld [vmem:[%s2619_s1 + $0xa8] sm:$0xff] }
 0x50e   :  { %v412_v18 = vpop.permute.xlu1 %411 }
 0x50f   :  { %v414_v19 = vmul.f32 %v2027_v8, %v412_v18  ;;  %v1708_v18 = vld [vmem:[%s2619_s1 + $0xa0] sm:$0xff] }
 0x511   :  { %v422_v21 = vrot.slane %v414_v19, %v2177_v13  ;;  %v1707_v19 = vld [vmem:[%s2619_s1 + $0x98] sm:$0xff] }
 0x513   :  { %423 = vrot.lane.b32.xlu0 %v422_v21, %s2114_s23 }
 0x585   :  { %v2310_v23 = vpop.permute.xlu0 %423 }
 0x586   :  { %1881 = vmatmul.mubr.msk.f32.vlgmr.msra.gmra.mxu1 %vm198_vm1, %v2310_v23 }
 0x587   :  { %1895 = vmatpush3.msra.mxu1 %v2165_v9  ;;  %1902 = vmatprep.mubr.msk.f32.mxu1 %vm2112_vm0, %v2110_v3 }
 0x588   :  { %1896 = vmatprep.subr.mxu1 %v2110_v3 }
 0x589   :  { %1897 = vmatpush3.msra.mxu1 %v2189_v17 }
 0x58a   :  { %1898 = vmatprep.subr.mxu1 %v2110_v3 }
 0x58b   :  { %1899 = vmatpush3.msra.mxu1 %v2198_v20 }
 0x58c   :  { %1900 = vmatprep.subr.mxu1 %v2110_v3 }
 0x58d   :  { %1901 = vmatpush3.msra.mxu1 %v2205_v22 }
 0x58e   :  { %1916 = vmatprep.subr.mxu1 %v1711_v14 }
 0x646   :  { %v493_v26 = vpop.f32.mrf.mxu1 }
 0x647   :  { %v497_v28 = vadd.f32 %v493_v26, %v175_v25  ;;  %v1705_v25 = vld [vmem:[%s2619_s1 + $0x88] sm:$0xff]  ;;  %v1704_v26 = vld [vmem:[%s2619_s1 + $0x80] sm:$0xff] }
 0x648   :  { %v1882_v29 = vpop.f32.mrf.mxu1 }
 0x649   :  { %2030 = vtanh.f32 %v497_v28  ;;  %v1693_v31 = vmul.f32 -1.442695, %v497_v28  ;;  %v1703_v28 = vld [vmem:[%s2619_s1 + $0x78] sm:$0xff]  ;;  %v1702_v29 = vld [vmem:[%s2619_s1 + $0x70] sm:$0xff] }
 0x64b   :  { %2032 = vpow2.f32 %v1693_v31  ;;  %v1700_v31 = vld [vmem:[%s2619_s1 + $0x60] sm:$0xff] }
 0x656   :  { %v2031_v30 = vpop.eup %2030 }
 0x657   :  { %507 = vrot.lane.b32.xlu1 %v2031_v30, %s2113_s20  ;;  %v1701_v30 = vld [vmem:[%s2619_s1 + $0x68] sm:$0xff] }
 0x658   :  { %v2033_v32 = vpop.eup %2032 }
 0x659   :  { %v501_v33 = vadd.f32 1.0, %v2033_v32  ;;  %v2411_v32 = vld [vmem:[%s2620_s2 + $0x38] sm:$0xff] }
 0x65b   :  { %2034 = vrcp.f32 %v501_v33  ;;  %v2418_v33 = vld [vmem:[%s2620_s2 + $0x30] sm:$0xff] }
 0x668   :  { %v2035_v34 = vpop.eup %2034 }
 0x669   :  { %v505_v38 = vmul.f32 %v2035_v34, %v408_v15  ;;  %v1710_v15 = vld [vmem:[%s2619_s1 + $0xb0] sm:$0xff] }
 0x6c9   :  { %v508_v35 = vpop.permute.xlu1 %507 }
 0x6ca   :  { %v510_v37 = vmul.f32 %v2035_v34, %v508_v35 }
 0x6cc   :  { %512 = vrot.lane.b32.xlu0 %v510_v37, %s2114_s23 }
 0x73e   :  { %v513_v39 = vpop.permute.xlu0 %512 }
 0x73f   :  { %v515_v40 = vadd.f32 %v513_v39, %v505_v38  ;;  %v1724_v39 = vld.sshfl [vmem:[%s2624_s5 + $0x2] sm:$0x3 pattern:$0x76325410] }
 0x741   :  { %2036 = vtanh.f32 %v515_v40 }
 0x74e   :  { %v2037_v42 = vpop.eup %2036 }
 0x74f   :  { %518 = vrot.lane.b32.xlu1 %v2037_v42, %s2113_s20  ;;  %v1720_v42 = vld [vmem:[%s2622_s4 + $0x2] sm:$0x3] }
 0x7c1   :  { %v519_v43 = vpop.permute.xlu1 %518 }
 0x7c2   :  { %v521_v44 = vmul.f32 %v2035_v34, %v519_v43  ;;  %v2431_v34 = vld [vmem:[%s2620_s2 + $0x20] sm:$0xff] }
 0x7c3   :  { %v2473_v43 = vld [vmem:[%s2623_s3 + $0x1] ss:$0 sm:$0xff] }
 0x7c4   :  { %v529_v45 = vrot.slane %v521_v44, %v2177_v13 }
 0x7c6   :  { %530 = vrot.lane.b32.xlu0 %v529_v45, %s2114_s23 }
 0x838   :  { %v2331_v46 = vpop.permute.xlu0 %530 }
 0x839   :  { %1892 = vmatmul.mubr.msk.f32.vlgmr.msra.gmra.mxu0 %vm198_vm1, %v2331_v46 }
 0x83a   :  { %1906 = vmatpush3.msra.mxu0 %v2165_v9  ;;  %1913 = vmatprep.mubr.msk.f32.mxu0 %vm2112_vm0, %v2110_v3 }
 0x83b   :  { %1907 = vmatprep.subr.mxu0 %v2110_v3 }
 0x83c   :  { %1908 = vmatpush3.msra.mxu0 %v2189_v17 }
 0x83d   :  { %1909 = vmatprep.subr.mxu0 %v2110_v3 }
 0x83e   :  { %1910 = vmatpush3.msra.mxu0 %v2198_v20 }
 0x83f   :  { %1911 = vmatprep.subr.mxu0 %v2110_v3 }
 0x840   :  { %1912 = vmatpush3.msra.mxu0 %v2205_v22 }
 0x841   :  { %1943 = vmatprep.subr.mxu0 %v2110_v3 }
 0x8f9   :  { %v600_v48 = vpop.f32.mrf.mxu0 }
 0x8fa   :  { %v604_v9 = vadd.f32 %v600_v48, %v177_v47 }
 0x8fb   :  { %v1893_v49 = vpop.f32.mrf.mxu0 }
 0x8fc   :  { %2038 = vtanh.f32 %v604_v9  ;;  %v1695_v51 = vmul.f32 -1.442695, %v604_v9 }
 0x8fe   :  { %2040 = vpow2.f32 %v1695_v51 }
 0x909   :  { %v2039_v50 = vpop.eup %2038 }
 0x90a   :  { %614 = vrot.lane.b32.xlu1 %v2039_v50, %s2113_s20 }
 0x90b   :  { %v2041_v17 = vpop.eup %2040 }
 0x90c   :  { %v608_v52 = vadd.f32 1.0, %v2041_v17 }
 0x90e   :  { %2042 = vrcp.f32 %v608_v52 }
 0x91b   :  { %v2043_v20 = vpop.eup %2042 }
 0x91c   :  { %v612_v22 = vmul.f32 %v2043_v20, %v515_v40 }
 0x97c   :  { %v615_v53 = vpop.permute.xlu1 %614 }
 0x97d   :  { %v617_v54 = vmul.f32 %v2043_v20, %v615_v53 }
 0x97f   :  { %619 = vrot.lane.b32.xlu0 %v617_v54, %s2114_s23 }
 0x9f1   :  { %v620_v55 = vpop.permute.xlu0 %619 }
 0x9f2   :  { %v622_v56 = vadd.f32 %v620_v55, %v612_v22 }
 0x9f4   :  { %2044 = vtanh.f32 %v622_v56 }
 0xa01   :  { %v2045_v57 = vpop.eup %2044 }
 0xa02   :  { %625 = vrot.lane.b32.xlu1 %v2045_v57, %s2113_s20 }
 0xa74   :  { %v626_v58 = vpop.permute.xlu1 %625 }
 0xa75   :  { %v628_v59 = vmul.f32 %v2043_v20, %v626_v58 }
 0xa77   :  { %v636_v60 = vrot.slane %v628_v59, %v2177_v13 }
 0xa79   :  { %637 = vrot.lane.b32.xlu0 %v636_v60, %s2114_s23 }
 0xaeb   :  { %v2350_v61 = vpop.permute.xlu0 %637 }
 0xaec   :  { %1903 = vmatmul.mubr.msk.f32.vlgmr.msra.gmra.mxu1 %vm198_vm1, %v2350_v61 }
 0xaed   :  { %1940 = vmatprep.mubr.msk.f32.mxu1 %vm79_vm2, %v2219_v27  ;;  %1917 = vmatpush3.msra.mxu1 %v1711_v14 }
 0xaee   :  { %1918 = vmatprep.subr.mxu1 %v1710_v15 }
 0xaef   :  { %1919 = vmatpush3.msra.mxu1 %v1710_v15 }
 0xaf0   :  { %1920 = vmatprep.subr.mxu1 %v1709_v16 }
 0xaf1   :  { %1921 = vmatpush3.msra.mxu1 %v1709_v16 }
 0xaf2   :  { %1922 = vmatprep.subr.mxu1 %v1708_v18 }
 0xaf3   :  { %1923 = vmatpush3.msra.mxu1 %v1708_v18 }
 0xaf4   :  { %1924 = vmatprep.subr.mxu1 %v1707_v19 }
 0xaf5   :  { %1925 = vmatpush3.msra.mxu1 %v1707_v19 }
 0xaf6   :  { %1926 = vmatprep.subr.mxu1 %v1706_v24 }
 0xaf7   :  { %1927 = vmatpush3.msra.mxu1 %v1706_v24 }
 0xaf8   :  { %1928 = vmatprep.subr.mxu1 %v1705_v25 }
 0xaf9   :  { %1929 = vmatpush3.msra.mxu1 %v1705_v25 }
 0xafa   :  { %1930 = vmatprep.subr.mxu1 %v1704_v26 }
 0xafb   :  { %1931 = vmatpush3.msra.mxu1 %v1704_v26 }
 0xafc   :  { %1932 = vmatprep.subr.mxu1 %v1703_v28 }
 0xafd   :  { %1933 = vmatpush3.msra.mxu1 %v1703_v28 }
 0xafe   :  { %1934 = vmatprep.subr.mxu1 %v1702_v29 }
 0xaff   :  { %1935 = vmatpush3.msra.mxu1 %v1702_v29 }
 0xb00   :  { %1936 = vmatprep.subr.mxu1 %v1701_v30 }
 0xb01   :  { %1937 = vmatpush3.msra.mxu1 %v1701_v30 }
 0xb02   :  { %1938 = vmatprep.subr.mxu1 %v1700_v31 }
 0xb03   :  { %1939 = vmatpush3.msra.mxu1 %v1700_v31 }
 0xb04   :  { %1941 = vmatmul.mubr.msk.f32.vlgmr.msra.gmra.mxu1 %vm79_vm2, %v2255_v36  ;;  %1976 = vmatprep.subr.mxu1 %v2110_v3  ;;  %v2424_v36 = vld [vmem:[%s2620_s2 + $0x28] sm:$0xff] }
 0xb05   :  { %1984 = vmatprep.mubr.msk.f32.mxu1 %vm2112_vm0, %v2110_v3  ;;  %1977 = vmatpush3.msra.mxu1 %v2411_v32 }
 0xb06   :  { %1978 = vmatprep.subr.mxu1 %v2110_v3 }
 0xb07   :  { %1979 = vmatpush3.msra.mxu1 %v2418_v33 }
 0xb08   :  { %1980 = vmatprep.subr.mxu1 %v2110_v3 }
 0xb09   :  { %1981 = vmatpush3.msra.mxu1 %v2424_v36 }
 0xb0a   :  { %1982 = vmatprep.subr.mxu1 %v2110_v3 }
 0xb0b   :  { %1983 = vmatpush3.msra.mxu1 %v2431_v34 }
 0xb0c   :  { %1998 = vmatprep.subr.mxu1 %v2110_v3 }
 0xbac   :  { %v707_v0 = vpop.f32.mrf.mxu1 }
 0xbad   :  { %v711_v1 = vadd.f32 %v707_v0, %v2358_v63 }
 0xbae   :  { %v1904_v2 = vpop.f32.mrf.mxu1 }
 0xbaf   :  { %2046 = vtanh.f32 %v711_v1  ;;  %v1697_v5 = vmul.f32 -1.442695, %v711_v1 }
 0xbb1   :  { %2048 = vpow2.f32 %v1697_v5 }
 0xbbc   :  { %v2047_v4 = vpop.eup %2046 }
 0xbbd   :  { %721 = vrot.lane.b32.xlu1 %v2047_v4, %s2113_s20 }
 0xbbe   :  { %v2049_v6 = vpop.eup %2048 }
 0xbbf   :  { %v715_v7 = vadd.f32 1.0, %v2049_v6 }
 0xbc1   :  { %2050 = vrcp.f32 %v715_v7 }
 0xbc4   :  { %v1942_v44 = vpop.f32.mrf.mxu1 }
 0xbc5   :  { %v936_v45 = vadd.f32 %v1942_v44, %v2473_v43 }
 0xbc6   :  { %v930_v30 = vpop.f32.mrf.mxu1 }
 0xbc7   :  { %v964_v48 = vrot.slane %v936_v45, %v2177_v13  ;;  %v2517_v31 = vadd.f32 %v2473_v43, %v930_v30 }
 0xbc9   :  { %v965_v49 = vcombine.high %v964_v48, %v964_v48 }
 0xbce   :  { %v2051_v8 = vpop.eup %2050 }
 0xbcf   :  { %v719_v41 = vmul.f32 %v2051_v8, %v622_v56 }
 0xc2f   :  { %v722_v10 = vpop.permute.xlu1 %721 }
 0xc30   :  { %v724_v27 = vmul.f32 %v2051_v8, %v722_v10 }
 0xc32   :  { %726 = vrot.lane.b32.xlu0 %v724_v27, %s2114_s23 }
 0xca4   :  { %v727_v11 = vpop.permute.xlu0 %726 }
 0xca5   :  { %v2363_v12 = vadd.f32 %v727_v11, %v719_v41 }
 0xca7   :  { %2052 = vtanh.f32 %v2363_v12 }
 0xcb4   :  { %v2053_v21 = vpop.eup %2052 }
 0xcb5   :  { %732 = vrot.lane.b32.xlu1 %v2053_v21, %s2113_s20 }
 0xd27   :  { %v733_v35 = vpop.permute.xlu1 %732 }
 0xd28   :  { %v735_v37 = vmul.f32 %v2051_v8, %v733_v35  ;;  %v941_v35 = vcombine.high %v2517_v31, %v2517_v31 }
 0xd2a   :  { %v743_v38 = vrot.slane %v735_v37, %v2177_v13  ;;  %v955_v37 = vrot.slane %v941_v35, %v2177_v13  ;;  %v185_v35 = vcombine.high %v2358_v63, %v2358_v63 }
 0xd2c   :  { %744 = vrot.lane.b32.xlu0 %v743_v38, %s2114_s23  ;;  %v957_v38 = vcombine.high %v955_v37, %v955_v37 }
 0xd30   :  { %1070 = vrot.lane.b32.xlu0 %v1724_v39, %s2114_s23 }
 0xd9e   :  { %v2442_v40 = vpop.permute.xlu0 %744 }
 0xd9f   :  { %1914 = vmatmul.mubr.msk.f32.vlgmr.msra.gmra.mxu0 %vm198_vm1, %v2442_v40 }
 0xda0   :  { %1944 = vmatpush3.msra.mxu0 %v2411_v32  ;;  %1951 = vmatprep.mubr.msk.f32.mxu0 %vm2112_vm0, %v2110_v3 }
 0xda1   :  { %1945 = vmatprep.subr.mxu0 %v2110_v3 }
 0xda2   :  { %1946 = vmatpush3.msra.mxu0 %v2418_v33  ;;  %v1071_v57 = vpop.permute.xlu0 %1070 }
 0xda3   :  { %1947 = vmatprep.subr.mxu0 %v2110_v3 }
 0xda4   :  { %1948 = vmatpush3.msra.mxu0 %v2424_v36 }
 0xda5   :  { %1949 = vmatprep.subr.mxu0 %v2110_v3 }
 0xda6   :  { %1950 = vmatpush3.msra.mxu0 %v2431_v34 }
 0xda7   :  { %1952 = vmatmul.mubr.msk.f32.vlgmr.msra.gmra.mxu0 %vm198_vm1, %v1720_v42  ;;  %1954 = vmatprep.subr.mxu0 %v2110_v3 }
 0xda8   :  { %1955 = vmatpush3.msra.mxu0 %v2411_v32  ;;  %1962 = vmatprep.mubr.msk.f32.mxu0 %vm2112_vm0, %v2110_v3 }
 0xda9   :  { %1956 = vmatprep.subr.mxu0 %v2110_v3 }
 0xdaa   :  { %1957 = vmatpush3.msra.mxu0 %v2418_v33 }
 0xdab   :  { %1958 = vmatprep.subr.mxu0 %v2110_v3 }
 0xdac   :  { %1959 = vmatpush3.msra.mxu0 %v2424_v36 }
 0xdad   :  { %1960 = vmatprep.subr.mxu0 %v2110_v3 }
 0xdae   :  { %1961 = vmatpush3.msra.mxu0 %v2431_v34 }
 0xdaf   :  { %1965 = vmatprep.subr.mxu0 %v2110_v3 }
 0xe5f   :  { %v2476_v47 = vpop.f32.mrf.mxu0 }
 0xe61   :  { %v1915_v9 = vpop.f32.mrf.mxu0 }
 0xe67   :  { %v1050_v50 = vpop.f32.mrf.mxu0 }
 0xe68   :  { %v1054_v51 = vadd.f32 %v1050_v50, %v965_v49 }
 0xe69   :  { %v1953_v17 = vpop.f32.mrf.mxu0 }
 0xe6a   :  { %2054 = vtanh.f32 %v1054_v51  ;;  %v1723_v20 = vmul.f32 -1.442695, %v1054_v51 }
 0xe6c   :  { %2056 = vpow2.f32 %v1723_v20 }
 0xe77   :  { %v2055_v52 = vpop.eup %2054 }
 0xe78   :  { %1075 = vrot.lane.b32.xlu1 %v2055_v52, %s2113_s20 }
 0xe79   :  { %v2057_v53 = vpop.eup %2056 }
 0xe7a   :  { %v1058_v54 = vadd.f32 1.0, %v2057_v53 }
 0xe7c   :  { %2058 = vrcp.f32 %v1058_v54 }
 0xe89   :  { %v2059_v22 = vpop.eup %2058 }
 0xe8a   :  { %v1073_v58 = vmul.f32 %v2059_v22, %v1071_v57 }
 0xeea   :  { %v1076_v55 = vpop.permute.xlu1 %1075 }
 0xeeb   :  { %v1078_v56 = vmul.f32 %v2059_v22, %v1076_v55 }
 0xeed   :  { %1080 = vrot.lane.b32.xlu1 %v1078_v56, %s2114_s23 }
 0xf5f   :  { %v1081_v59 = vpop.permute.xlu1 %1080 }
 0xf60   :  { %v1083_v60 = vadd.f32 %v1081_v59, %v1073_v58 }
 0xf62   :  { %2060 = vtanh.f32 %v1083_v60 }
 0xf6f   :  { %v2061_v0 = vpop.eup %2060 }
 0xf70   :  { %1086 = vrot.lane.b32.xlu0 %v2061_v0, %s2113_s20 }
 0xfe2   :  { %v1087_v1 = vpop.permute.xlu0 %1086 }
 0xfe3   :  { %v1089_v2 = vmul.f32 %v2059_v22, %v1087_v1 }
 0xfe5   :  { %v2483_v4 = vrot.slane %v1089_v2, %v2177_v13 }
 0xfe7   :  { %1098 = vrot.lane.b32.xlu1 %v2483_v4, %s2114_s23 }
0x1059   :  { %v1099_v5 = vpop.permute.xlu1 %1098 }
0x105a   :  { %1963 = vmatmul.mubr.msk.f32.vlgmr.msra.gmra.mxu0 %vm198_vm1, %v1099_v5 }
0x105b   :  { %1966 = vmatpush3.msra.mxu0 %v2411_v32  ;;  %1973 = vmatprep.mubr.msk.f32.mxu0 %vm2112_vm0, %v2110_v3 }
0x105c   :  { %1967 = vmatprep.subr.mxu0 %v2110_v3 }
0x105d   :  { %1968 = vmatpush3.msra.mxu0 %v2418_v33 }
0x105e   :  { %1969 = vmatprep.subr.mxu0 %v2110_v3 }
0x105f   :  { %1970 = vmatpush3.msra.mxu0 %v2424_v36 }
0x1060   :  { %1971 = vmatprep.subr.mxu0 %v2110_v3 }
0x1061   :  { %1972 = vmatpush3.msra.mxu0 %v2431_v34 }
0x1062   :  { %1987 = vmatprep.subr.mxu0 %v2110_v3 }
0x111a   :  { %v1168_v6 = vpop.f32.mrf.mxu0 }
0x111b   :  { %v1172_v7 = vadd.f32 %v1168_v6, %v964_v48 }
0x111c   :  { %v1964_v8 = vpop.f32.mrf.mxu0 }
0x111d   :  { %2062 = vtanh.f32 %v1172_v7  ;;  %v1726_v27 = vmul.f32 -1.442695, %v1172_v7 }
0x111f   :  { %2064 = vpow2.f32 %v1726_v27 }
0x112a   :  { %v2063_v10 = vpop.eup %2062 }
0x112b   :  { %1182 = vrot.lane.b32.xlu0 %v2063_v10, %s2113_s20 }
0x112c   :  { %v2065_v41 = vpop.eup %2064 }
0x112d   :  { %v1176_v11 = vadd.f32 1.0, %v2065_v41  ;;  %v948_v41 = vrot.slane %v2517_v31, %v2177_v13 }
0x112f   :  { %2066 = vrcp.f32 %v1176_v11  ;;  %v956_v11 = vcombine.high %v948_v41, %v948_v41 }
0x113c   :  { %v2067_v14 = vpop.eup %2066 }
0x113d   :  { %v1180_v18 = vmul.f32 %v2067_v14, %v1083_v60 }
0x119d   :  { %v1183_v15 = vpop.permute.xlu0 %1182 }
0x119e   :  { %v1185_v16 = vmul.f32 %v2067_v14, %v1183_v15 }
0x11a0   :  { %1187 = vrot.lane.b32.xlu1 %v1185_v16, %s2114_s23 }
0x1212   :  { %v1188_v19 = vpop.permute.xlu1 %1187 }
0x1213   :  { %v1190_v21 = vadd.f32 %v1188_v19, %v1180_v18 }
0x1215   :  { %2068 = vtanh.f32 %v1190_v21 }
0x1222   :  { %v2069_v24 = vpop.eup %2068 }
0x1223   :  { %1193 = vrot.lane.b32.xlu0 %v2069_v24, %s2113_s20 }
0x1295   :  { %v1194_v25 = vpop.permute.xlu0 %1193 }
0x1296   :  { %v1196_v26 = vmul.f32 %v2067_v14, %v1194_v25 }
0x1298   :  { %v2502_v28 = vrot.slane %v1196_v26, %v2177_v13 }
0x129a   :  { %1205 = vrot.lane.b32.xlu1 %v2502_v28, %s2114_s23 }
0x130c   :  { %v1206_v29 = vpop.permute.xlu1 %1205 }
0x130d   :  { %1974 = vmatmul.mubr.msk.f32.vlgmr.msra.gmra.mxu0 %vm198_vm1, %v1206_v29 }
0x130e   :  { %1988 = vmatpush3.msra.mxu0 %v2411_v32  ;;  %1995 = vmatprep.mubr.msk.f32.mxu0 %vm2112_vm0, %v2110_v3 }
0x130f   :  { %1989 = vmatprep.subr.mxu0 %v2110_v3 }
0x1310   :  { %1990 = vmatpush3.msra.mxu0 %v2418_v33 }
0x1311   :  { %1991 = vmatprep.subr.mxu0 %v2110_v3 }
0x1312   :  { %1992 = vmatpush3.msra.mxu0 %v2424_v36 }
0x1313   :  { %1993 = vmatprep.subr.mxu0 %v2110_v3 }
0x1314   :  { %1994 = vmatpush3.msra.mxu0 %v2431_v34 }
0x13cd   :  { %v1275_v39 = vpop.f32.mrf.mxu0 }
0x13ce   :  { %v1279_v42 = vadd.f32 %v1275_v39, %v957_v38  ;;  %v818_v38 = vadd.f32 %v2476_v47, %v185_v35 }
0x13cf   :  { %v1975_v44 = vpop.f32.mrf.mxu0 }
0x13d0   :  { %2070 = vtanh.f32 %v1279_v42  ;;  %v1728_v48 = vmul.f32 -1.442695, %v1279_v42  ;;  %v1699_v44 = vmul.f32 -1.442695, %v818_v38 }
0x13d2   :  { %2072 = vpow2.f32 %v1728_v48 }
0x13dd   :  { %v2071_v45 = vpop.eup %2070 }
0x13de   :  { %1289 = vrot.lane.b32.xlu0 %v2071_v45, %s2113_s20 }
0x13df   :  { %v2073_v9 = vpop.eup %2072 }
0x13e0   :  { %v1283_v49 = vadd.f32 1.0, %v2073_v9 }
0x13e2   :  { %2074 = vrcp.f32 %v1283_v49 }
0x13ef   :  { %v2075_v43 = vpop.eup %2074 }
0x13f0   :  { %v1287_v17 = vmul.f32 %v2075_v43, %v1190_v21 }
0x1450   :  { %v1290_v50 = vpop.permute.xlu0 %1289 }
0x1451   :  { %v1292_v51 = vmul.f32 %v2075_v43, %v1290_v50 }
0x1453   :  { %1294 = vrot.lane.b32.xlu1 %v1292_v51, %s2114_s23 }
0x14c5   :  { %v1295_v52 = vpop.permute.xlu1 %1294 }
0x14c6   :  { %v1297_v20 = vadd.f32 %v1295_v52, %v1287_v17 }
0x14c8   :  { %2076 = vtanh.f32 %v1297_v20 }
0x14d5   :  { %v2077_v53 = vpop.eup %2076 }
0x14d6   :  { %1300 = vrot.lane.b32.xlu0 %v2077_v53, %s2113_s20 }
0x1548   :  { %v1301_v54 = vpop.permute.xlu0 %1300 }
0x1549   :  { %v1303_v22 = vmul.f32 %v2075_v43, %v1301_v54 }
0x154b   :  { %v2526_v55 = vrot.slane %v1303_v22, %v2177_v13 }
0x154d   :  { %1312 = vrot.lane.b32.xlu1 %v2526_v55, %s2114_s23 }
0x15bf   :  { %v1313_v56 = vpop.permute.xlu1 %1312 }
0x15c0   :  { %1985 = vmatmul.mubr.msk.f32.vlgmr.msra.gmra.mxu1 %vm198_vm1, %v1313_v56 }
0x15c1   :  { %1999 = vmatpush3.msra.mxu1 %v2411_v32  ;;  %2006 = vmatprep.mubr.msk.f32.mxu1 %vm2112_vm0, %v2110_v3 }
0x15c2   :  { %2000 = vmatprep.subr.mxu1 %v2110_v3 }
0x15c3   :  { %2001 = vmatpush3.msra.mxu1 %v2418_v33 }
0x15c4   :  { %2002 = vmatprep.subr.mxu1 %v2110_v3 }
0x15c5   :  { %2003 = vmatpush3.msra.mxu1 %v2424_v36 }
0x15c6   :  { %2004 = vmatprep.subr.mxu1 %v2110_v3 }
0x15c7   :  { %2005 = vmatpush3.msra.mxu1 %v2431_v34 }
0x1680   :  { %v1382_v57 = vpop.f32.mrf.mxu1 }
0x1681   :  { %v1386_v58 = vadd.f32 %v1382_v57, %v955_v37 }
0x1682   :  { %v1986_v59 = vpop.f32.mrf.mxu1 }
0x1683   :  { %2078 = vtanh.f32 %v1386_v58  ;;  %v1730_v60 = vmul.f32 -1.442695, %v1386_v58 }
0x1685   :  { %2080 = vpow2.f32 %v1730_v60 }
0x1690   :  { %v2079_v32 = vpop.eup %2078 }
0x1691   :  { %1396 = vrot.lane.b32.xlu0 %v2079_v32, %s2113_s20 }
0x1692   :  { %v2081_v0 = vpop.eup %2080 }
0x1693   :  { %v1390_v1 = vadd.f32 1.0, %v2081_v0 }
0x1695   :  { %2082 = vrcp.f32 %v1390_v1 }
0x16a2   :  { %v2083_v33 = vpop.eup %2082 }
0x16a3   :  { %v1394_v3 = vmul.f32 %v2083_v33, %v1297_v20 }
0x1703   :  { %v1397_v2 = vpop.permute.xlu0 %1396 }
0x1704   :  { %v1399_v5 = vmul.f32 %v2083_v33, %v1397_v2 }
0x1706   :  { %1401 = vrot.lane.b32.xlu1 %v1399_v5, %s2114_s23 }
0x1778   :  { %v1402_v36 = vpop.permute.xlu1 %1401 }
0x1779   :  { %v1404_v34 = vadd.f32 %v1402_v36, %v1394_v3 }
0x177b   :  { %2084 = vtanh.f32 %v1404_v34 }
0x1788   :  { %v2085_v6 = vpop.eup %2084 }
0x1789   :  { %1407 = vrot.lane.b32.xlu0 %v2085_v6, %s2113_s20 }
0x17fb   :  { %v1408_v7 = vpop.permute.xlu0 %1407 }
0x17fc   :  { %v1410_v8 = vmul.f32 %v2083_v33, %v1408_v7 }
0x17fe   :  { %v2544_v10 = vrot.slane %v1410_v8, %v2177_v13 }
0x1800   :  { %1419 = vrot.lane.b32.xlu1 %v2544_v10, %s2114_s23 }
0x1872   :  { %v1420_v27 = vpop.permute.xlu1 %1419 }
0x1873   :  { %1996 = vmatmul.mubr.msk.f32.vlgmr.msra.gmra.mxu0 %vm198_vm1, %v1420_v27 }
0x1933   :  { %v1489_v14 = vpop.f32.mrf.mxu0 }
0x1934   :  { %v1493_v15 = vadd.f32 %v1489_v14, %v956_v11 }
0x1935   :  { %v1997_v16 = vpop.f32.mrf.mxu0 }
0x1936   :  { %2086 = vtanh.f32 %v1493_v15  ;;  %v1732_v19 = vmul.f32 -1.442695, %v1493_v15 }
0x1938   :  { %2088 = vpow2.f32 %v1732_v19 }
0x1943   :  { %v2087_v18 = vpop.eup %2086 }
0x1944   :  { %1503 = vrot.lane.b32.xlu0 %v2087_v18, %s2113_s20 }
0x1945   :  { %v2089_v21 = vpop.eup %2088 }
0x1946   :  { %v1497_v24 = vadd.f32 1.0, %v2089_v21 }
0x1948   :  { %2090 = vrcp.f32 %v1497_v24 }
0x1955   :  { %v2091_v25 = vpop.eup %2090 }
0x1956   :  { %v1501_v30 = vmul.f32 %v2091_v25, %v1404_v34 }
0x19b6   :  { %v1504_v26 = vpop.permute.xlu0 %1503 }
0x19b7   :  { %v1506_v29 = vmul.f32 %v2091_v25, %v1504_v26 }
0x19b9   :  { %1508 = vrot.lane.b32.xlu1 %v1506_v29, %s2114_s23 }
0x1a2b   :  { %v1509_v31 = vpop.permute.xlu1 %1508 }
0x1a2c   :  { %v2555_v37 = vadd.f32 %v1509_v31, %v1501_v30 }
0x1a2e   :  { %2092 = vtanh.f32 %v2555_v37 }
0x1a2f   :  { %2094 = vtanh.f32 %v818_v38 }
0x1a30   :  { %2096 = vpow2.f32 %v1699_v44 }
0x1a3b   :  { %v2093_v39 = vpop.eup %2092 }
0x1a3c   :  { %1514 = vrot.lane.b32.xlu0 %v2093_v39, %s2113_s20  ;;  %v2095_v42 = vpop.eup %2094 }
0x1a3d   :  { %v2097_v45 = vpop.eup %2096 }
0x1a3e   :  { %v822_v48 = vadd.f32 1.0, %v2097_v45 }
0x1a40   :  { %828 = vrot.lane.b32.xlu0 %v2095_v42, %s2113_s20  ;;  %2098 = vrcp.f32 %v822_v48 }
0x1a4d   :  { %v2099_v43 = vpop.eup %2098 }
0x1a4e   :  { %v826_v17 = vmul.f32 %v2099_v43, %v2363_v12 }
0x1aae   :  { %v1515_v9 = vpop.permute.xlu0 %1514 }
0x1aaf   :  { %v1517_v63 = vmul.f32 %v2091_v25, %v1515_v9 }
0x1ab1   :  { %v1525_v49 = vrot.slane %v1517_v63, %v2177_v13 }
0x1ab2   :  { %v829_v47 = vpop.permute.xlu0 %828 }
0x1ab3   :  { %v831_v50 = vmul.f32 %v2099_v43, %v829_v47  ;;  %1526 = vrot.lane.b32.xlu1 %v1525_v49, %s2114_s23 }
0x1ab5   :  { %833 = vrot.lane.b32.xlu0 %v831_v50, %s2114_s23 }
0x1b25   :  { %v1527_v51 = vpop.permute.xlu1 %1526 }
0x1b26   :  { %2007 = vmatmul.mubr.msk.f32.vlgmr.msra.gmra.mxu1 %vm198_vm1, %v1527_v51 }
0x1b27   :  { %v834_v52 = vpop.permute.xlu0 %833 }
0x1b28   :  { %v836_v20 = vadd.f32 %v834_v52, %v826_v17 }
0x1b2a   :  { %2100 = vtanh.f32 %v836_v20 }
0x1b37   :  { %v2101_v53 = vpop.eup %2100 }
0x1b38   :  { %839 = vrot.lane.b32.xlu0 %v2101_v53, %s2113_s20 }
0x1baa   :  { %v840_v54 = vpop.permute.xlu0 %839 }
0x1bab   :  { %v842_v22 = vmul.f32 %v2099_v43, %v840_v54 }
0x1bad   :  { %v1632_v56 = vrot.slane %v842_v22, %v2177_v13 }
0x1baf   :  { %1633 = vrot.lane.b32.xlu0 %v1632_v56, %s2114_s23 }
0x1bb3   :  { %1651 = vrot.lane.b32.xlu0 %v1525_v49, %s2113_s20 }
0x1bb7   :  { %1655 = vrot.lane.b32.xlu0 %v2526_v55, %s2113_s20 }
0x1bbb   :  { %1659 = vrot.lane.b32.xlu0 %v2483_v4, %s2113_s20 }
0x1be6   :  { %v1596_v12 = vpop.f32.mrf.mxu1 }
0x1be7   :  { %v1600_v57 = vadd.f32 %v1596_v12, %v948_v41 }
0x1be8   :  { %v2008_v58 = vpop.f32.mrf.mxu1 }
0x1be9   :  { %2102 = vtanh.f32 %v1600_v57 }
0x1bf6   :  { %v2103_v59 = vpop.eup %2102 }
0x1bf7   :  { %1610 = vrot.lane.b32.xlu1 %v2103_v59, %s2113_s20 }
0x1c21   :  { %v1634_v32 = vpop.permute.xlu0 %1633 }
0x1c25   :  { %v1652_v60 = vpop.permute.xlu0 %1651 }
0x1c26   :  { %v1668_v0 = vsel %vm198_vm1, %v2310_v23, %v1652_v60  ;;  %v1734_v23 = vmul.f32 -1.442695, %v1600_v57 }
0x1c27   :  { %1675 = vst.msk [vmem:[%s2625_s6 + $0x2] sm:$0x3] %vm1673_vm3, %v1668_v0 }
0x1c28   :  { %2104 = vpow2.f32 %v1734_v23 }
0x1c29   :  { %v1656_v55 = vpop.permute.xlu0 %1655 }
0x1c2a   :  { %v1670_v4 = vsel %vm198_vm1, %v2350_v61, %v1656_v55 }
0x1c2b   :  { %1677 = vst.msk [vmem:[%s2625_s6 + $0x6] sm:$0x3] %vm1673_vm3, %v1670_v4 }
0x1c2d   :  { %v1660_v1 = vpop.permute.xlu0 %1659 }
0x1c2e   :  { %v1672_v33 = vsel %vm198_vm1, %v1634_v32, %v1660_v1 }
0x1c2f   :  { %1679 = vst.msk [vmem:[%s2625_s6 + $0xa] sm:$0x3] %vm1673_vm3, %v1672_v33 }
0x1c35   :  { %v2105_v2 = vpop.eup %2104 }
0x1c36   :  { %v1604_v5 = vadd.f32 1.0, %v2105_v2 }
0x1c38   :  { %2106 = vrcp.f32 %v1604_v5 }
0x1c45   :  { %v2107_v3 = vpop.eup %2106 }
0x1c46   :  { %v1608_v34 = vmul.f32 %v2107_v3, %v2555_v37 }
0x1c69   :  { %v1611_v61 = vpop.permute.xlu1 %1610 }
0x1c6a   :  { %v1613_v36 = vmul.f32 %v2107_v3, %v1611_v61 }
0x1c6c   :  { %1615 = vrot.lane.b32.xlu1 %v1613_v36, %s2114_s23 }
0x1cde   :  { %v1616_v6 = vpop.permute.xlu1 %1615 }
0x1cdf   :  { %v1618_v7 = vadd.f32 %v1616_v6, %v1608_v34 }
0x1ce1   :  { %2108 = vtanh.f32 %v1618_v7 }
0x1cee   :  { %v2109_v8 = vpop.eup %2108 }
0x1cef   :  { %1621 = vrot.lane.b32.xlu1 %v2109_v8, %s2113_s20 }
0x1cf3   :  { %1653 = vrot.lane.b32.xlu1 %v2544_v10, %s2113_s20 }
0x1d61   :  { %v1622_v27 = vpop.permute.xlu1 %1621 }
0x1d62   :  { %v1624_v41 = vmul.f32 %v2107_v3, %v1622_v27 }
0x1d64   :  { %v1648_v11 = vrot.slane %v1624_v41, %v2177_v13 }
0x1d65   :  { %v1654_v14 = vpop.permute.xlu1 %1653 }
0x1d66   :  { %v1669_v15 = vsel %vm198_vm1, %v2331_v46, %v1654_v14  ;;  %1649 = vrot.lane.b32.xlu1 %v1648_v11, %s2113_s20 }
0x1d67   :  { %1676 = vst.msk [vmem:[%s2625_s6 + $0x4] sm:$0x3] %vm1673_vm3, %v1669_v15 }
0x1d6a   :  { %1657 = vrot.lane.b32.xlu1 %v2502_v28, %s2113_s20 }
0x1dd8   :  { %v1650_v16 = vpop.permute.xlu1 %1649 }
0x1dd9   :  { %v1667_v10 = vsel %vm198_vm1, %v2291_v62, %v1650_v16 }
0x1dda   :  { %1674 = vst.msk [vmem:[%s2625_s6] sm:$0x3] %vm1673_vm3, %v1667_v10 }
0x1ddc   :  { %v1658_v13 = vpop.permute.xlu1 %1657 }
0x1ddd   :  { %v1671_v46 = vsel %vm198_vm1, %v2442_v40, %v1658_v13 }
0x1dde   :  { %1678 = vst.msk [vmem:[%s2625_s6 + $0x8] sm:$0x3] %vm1673_vm3, %v1671_v46 }

// kernel: ptr_extract_summ_forward.6
= control target key start
LH: loop header
LB: loop body
LE: loop exit
PB: predicated region body
PF: predicated region fallthrough
CT: control target
= control target key end

     0   :  { %v51_v0 = vlaneseq  ;;  %v758_v1 = vmov 0.0   ;;  %v759_v4 = vmov 1983009808   ;;  %vm760_vm0 = vmmov 0   ;;  %s761_s29 = smov 64   ;;  %s762_s8 = smov 32   ;;  %s965_s1 = inlined_call_operand.vmem [shape: f32[1,64,128], index: 1, kind: input, shape index: {}]   ;;  %s966_s2 = inlined_call_operand.vmem [shape: f32[1,32,128], index: 2, kind: input, shape index: {}]   ;;  %s967_s0 = inlined_call_operand.vmem [shape: f32[4,2,64], index: 0, kind: input, shape index: {}]   ;;  %s968_s4 = inlined_call_operand.vmem [shape: f32[1,2,32], index: 4, kind: input, shape index: {}]   ;;  %s969_s3 = inlined_call_operand.vmem [shape: f32[1,1,128], index: 3, kind: input, shape index: {}]   ;;  %s970_s5 = inlined_call_operand.vmem [shape: f32[1,2,32], index: 5, kind: input, shape index: {}]   ;;  %s971_s6 = inlined_call_operand.vmem [shape: f32[4,2,32], index: 6, kind: output, shape index: {}]  }
   0x1   :  { %658 = vmatprep.subr.mxu0 %v758_v1  ;;  %v34_v2 = vld [vmem:[%s965_s1 + $0x38] sm:$0xff]  ;;  %v33_v3 = vld [vmem:[%s965_s1 + $0x30] sm:$0xff]  ;;  %677 = vmatprep.subr.mxu1 %v758_v1  ;;  %v49_v5 = vunpack.c.l.s4 %v759_v4  ;;  %v32_v7 = vld [vmem:[%s965_s1 + $0x28] sm:$0xff]  ;;  %vm164_vm1 = vcmask 261120   ;;  %vm63_vm2 = vcmask 523264   ;;  %vm609_vm3 = vcmask 254976  }
   0x2   :  { %659 = vmatpush3.msra.mxu0 %v34_v2  ;;  %674 = vmatprep.mubr.msk.f32.mxu0 %vm760_vm0, %v758_v1  ;;  %v52_v6 = vshrl.u32 %v51_v0, 7  ;;  %v815_v8 = vld [vmem:[%s966_s2 + $0x18] sm:$0xff]  ;;  %v820_v9 = vld [vmem:[%s966_s2 + $0x10] sm:$0xff]  ;;  %v31_v11 = vld [vmem:[%s965_s1 + $0x20] sm:$0xff] }
   0x3   :  { %660 = vmatprep.subr.mxu0 %v758_v1  ;;  %v50_v10 = vunpack.c.0.s8 %v49_v5  ;;  %685 = vmatprep.mubr.msk.f32.mxu1 %vm760_vm0, %v758_v1  ;;  %v831_v12 = vld [vmem:[%s966_s2 + $0x8] sm:$0xff]  ;;  %v23_v13 = vld [vmem:[%s967_s0] sm:$0x3]  ;;  %v24_v14 = vld [vmem:[%s967_s0 + $0x2] sm:$0x3] }
   0x4   :  { %661 = vmatpush3.msra.mxu0 %v33_v3  ;;  %678 = vmatpush3.msra.mxu1 %v815_v8  ;;  %v25_v15 = vld [vmem:[%s967_s0 + $0x4] sm:$0x3]  ;;  %v26_v16 = vld [vmem:[%s967_s0 + $0x6] sm:$0x3]  ;;  %v46_v18 = vcombine.low %v23_v13, %v24_v14  ;;  %v30_v20 = vld [vmem:[%s965_s1 + $0x18] sm:$0xff] }
   0x5   :  { %662 = vmatprep.subr.mxu0 %v758_v1  ;;  %679 = vmatprep.subr.mxu1 %v758_v1  ;;  %v847_v17 = vsub.s32 %v50_v10, %v52_v6  ;;  %v47_v19 = vcombine.low %v25_v15, %v26_v16  ;;  %v858_v21 = vld [vmem:[%s966_s2] sm:$0xff]  ;;  %v29_v23 = vld [vmem:[%s965_s1 + $0x10] sm:$0xff]  ;;  %v28_v26 = vld [vmem:[%s965_s1 + $0x8] sm:$0xff] }
   0x6   :  { %663 = vmatpush3.msra.mxu0 %v32_v7  ;;  %680 = vmatpush3.msra.mxu1 %v820_v9  ;;  %v162_v22 = vld [vmem:[%s968_s4] sm:$0x3] }
   0x7   :  { %664 = vmatprep.subr.mxu0 %v758_v1  ;;  %681 = vmatprep.subr.mxu1 %v758_v1  ;;  %v54_v24 = vrot.slane %v46_v18, %v847_v17  ;;  %v61_v25 = vrot.slane %v47_v19, %v847_v17  ;;  %v27_v27 = vld [vmem:[%s965_s1] sm:$0xff] }
   0x8   :  { %665 = vmatpush3.msra.mxu0 %v31_v11  ;;  %682 = vmatpush3.msra.mxu1 %v831_v12  ;;  %v618_v31 = vld [vmem:[%s969_s3] ss:$0 sm:$0xff] }
   0x9   :  { %666 = vmatprep.subr.mxu0 %v758_v1  ;;  %683 = vmatprep.subr.mxu1 %v758_v1  ;;  %v62_v28 = vcombine.low %v54_v24, %v61_v25  ;;  %v622_v38 = vld.sshfl [vmem:[%s970_s5] sm:$0x3 pattern:$0x76325410] }
   0xa   :  { %667 = vmatpush3.msra.mxu0 %v30_v20  ;;  %684 = vmatpush3.msra.mxu1 %v858_v21 }
   0xb   :  { %668 = vmatprep.subr.mxu0 %v758_v1  ;;  %686 = vmatmul.mubr.msk.f32.vlgmr.msra.gmra.mxu1 %vm164_vm1, %v162_v22 }
   0xc   :  { %669 = vmatpush3.msra.mxu0 %v29_v23  ;;  %688 = vmatprep.subr.mxu1 %v758_v1 }
   0xd   :  { %670 = vmatprep.subr.mxu0 %v758_v1  ;;  %689 = vmatpush3.msra.mxu1 %v815_v8 }
   0xe   :  { %671 = vmatpush3.msra.mxu0 %v28_v26  ;;  %690 = vmatprep.subr.mxu1 %v758_v1 }
   0xf   :  { %672 = vmatprep.subr.mxu0 %v758_v1  ;;  %691 = vmatpush3.msra.mxu1 %v820_v9 }
  0x10   :  { %673 = vmatpush3.msra.mxu0 %v27_v27  ;;  %692 = vmatprep.subr.mxu1 %v758_v1 }
  0x11   :  { %675 = vmatmul.mubr.msk.f32.vlgmr.msra.gmra.mxu0 %vm63_vm2, %v62_v28  ;;  %693 = vmatpush3.msra.mxu1 %v831_v12 }
  0x12   :  { %694 = vmatprep.subr.mxu1 %v758_v1  ;;  %696 = vmatprep.mubr.msk.f32.mxu1 %vm760_vm0, %v758_v1 }
  0x13   :  { %695 = vmatpush3.msra.mxu1 %v858_v21  ;;  %699 = vmatprep.subr.mxu0 %v758_v1 }
  0x14   :  { %700 = vmatpush3.msra.mxu0 %v815_v8  ;;  %707 = vmatprep.mubr.msk.f32.mxu0 %vm760_vm0, %v758_v1 }
  0x15   :  { %701 = vmatprep.subr.mxu0 %v758_v1  ;;  %710 = vmatprep.subr.mxu1 %v758_v1 }
  0x16   :  { %702 = vmatpush3.msra.mxu0 %v820_v9 }
  0x17   :  { %703 = vmatprep.subr.mxu0 %v758_v1 }
  0x18   :  { %704 = vmatpush3.msra.mxu0 %v831_v12 }
  0x19   :  { %705 = vmatprep.subr.mxu0 %v758_v1 }
  0x1a   :  { %706 = vmatpush3.msra.mxu0 %v858_v21 }
  0xcb   :  { %v234_v29 = vpop.f32.mrf.mxu1 }
  0xcd   :  { %v687_v30 = vpop.f32.mrf.mxu1 }
  0xd1   :  { %v132_v32 = vpop.f32.mrf.mxu0 }
  0xd2   :  { %v906_v33 = vadd.f32 %v618_v31, %v132_v32 }
  0xd3   :  { %v676_v34 = vpop.f32.mrf.mxu0 }
  0xd4   :  { %v144_v35 = vrot.slane %v906_v33, %v847_v17 }
  0xd6   :  { %v238_v36 = vadd.f32 %v234_v29, %v144_v35  ;;  %v152_v54 = vcombine.high %v144_v35, %v144_v35 }
  0xd8   :  { %726 = vtanh.f32 %v238_v36  ;;  %v621_v39 = vmul.f32 -1.442695, %v238_v36 }
  0xda   :  { %728 = vpow2.f32 %v621_v39 }
  0xe5   :  { %v727_v37 = vpop.eup %726 }
  0xe6   :  { %259 = vrot.lane.b32.xlu0 %v727_v37, %s761_s29 }
  0xe7   :  { %v729_v40 = vpop.eup %728 }
  0xe8   :  { %v242_v41 = vadd.f32 1.0, %v729_v40 }
  0xea   :  { %254 = vrot.lane.b32.xlu0 %v622_v38, %s762_s8  ;;  %730 = vrcp.f32 %v242_v41 }
  0xf7   :  { %v731_v42 = vpop.eup %730 }
 0x158   :  { %v260_v43 = vpop.permute.xlu0 %259 }
 0x159   :  { %v262_v44 = vmul.f32 %v731_v42, %v260_v43 }
 0x15b   :  { %264 = vrot.lane.b32.xlu1 %v262_v44, %s762_s8 }
 0x15c   :  { %v255_v45 = vpop.permute.xlu0 %254 }
 0x15d   :  { %v257_v46 = vmul.f32 %v731_v42, %v255_v45 }
 0x1cd   :  { %v265_v47 = vpop.permute.xlu1 %264 }
 0x1ce   :  { %v267_v48 = vadd.f32 %v265_v47, %v257_v46 }
 0x1d0   :  { %732 = vtanh.f32 %v267_v48 }
 0x1dd   :  { %v733_v49 = vpop.eup %732 }
 0x1de   :  { %270 = vrot.lane.b32.xlu1 %v733_v49, %s761_s29 }
 0x250   :  { %v271_v50 = vpop.permute.xlu1 %270 }
 0x251   :  { %v273_v51 = vmul.f32 %v731_v42, %v271_v50 }
 0x253   :  { %v281_v52 = vrot.slane %v273_v51, %v847_v17 }
 0x255   :  { %282 = vrot.lane.b32.xlu0 %v281_v52, %s762_s8 }
 0x2c7   :  { %v283_v53 = vpop.permute.xlu0 %282 }
 0x2c8   :  { %610 = vst.msk [vmem:[%s971_s6] sm:$0x3] %vm609_vm3, %v283_v53  ;;  %697 = vmatmul.mubr.msk.f32.vlgmr.msra.gmra.mxu1 %vm164_vm1, %v283_v53 }
 0x2c9   :  { %711 = vmatpush3.msra.mxu1 %v815_v8  ;;  %718 = vmatprep.mubr.msk.f32.mxu1 %vm760_vm0, %v758_v1 }
 0x2ca   :  { %712 = vmatprep.subr.mxu1 %v758_v1 }
 0x2cb   :  { %713 = vmatpush3.msra.mxu1 %v820_v9  ;;  %v137_v9 = vcombine.high %v906_v33, %v906_v33 }
 0x2cc   :  { %714 = vmatprep.subr.mxu1 %v758_v1 }
 0x2cd   :  { %715 = vmatpush3.msra.mxu1 %v831_v12  ;;  %v151_v10 = vrot.slane %v137_v9, %v847_v17 }
 0x2ce   :  { %716 = vmatprep.subr.mxu1 %v758_v1 }
 0x2cf   :  { %717 = vmatpush3.msra.mxu1 %v858_v21  ;;  %v153_v30 = vcombine.high %v151_v10, %v151_v10 }
 0x388   :  { %v352_v55 = vpop.f32.mrf.mxu1 }
 0x389   :  { %v356_v56 = vadd.f32 %v352_v55, %v152_v54 }
 0x38a   :  { %v698_v57 = vpop.f32.mrf.mxu1 }
 0x38b   :  { %734 = vtanh.f32 %v356_v56  ;;  %v624_v59 = vmul.f32 -1.442695, %v356_v56 }
 0x38d   :  { %736 = vpow2.f32 %v624_v59 }
 0x398   :  { %v735_v58 = vpop.eup %734 }
 0x399   :  { %366 = vrot.lane.b32.xlu1 %v735_v58, %s761_s29 }
 0x39a   :  { %v737_v60 = vpop.eup %736 }
 0x39b   :  { %v360_v61 = vadd.f32 1.0, %v737_v60 }
 0x39d   :  { %738 = vrcp.f32 %v360_v61 }
 0x3aa   :  { %v739_v62 = vpop.eup %738 }
 0x3ab   :  { %v364_v1 = vmul.f32 %v739_v62, %v267_v48 }
 0x40b   :  { %v367_v63 = vpop.permute.xlu1 %366 }
 0x40c   :  { %v369_v0 = vmul.f32 %v739_v62, %v367_v63 }
 0x40e   :  { %371 = vrot.lane.b32.xlu0 %v369_v0, %s762_s8 }
 0x480   :  { %v372_v2 = vpop.permute.xlu0 %371 }
 0x481   :  { %v374_v3 = vadd.f32 %v372_v2, %v364_v1 }
 0x483   :  { %740 = vtanh.f32 %v374_v3 }
 0x490   :  { %v741_v4 = vpop.eup %740 }
 0x491   :  { %377 = vrot.lane.b32.xlu1 %v741_v4, %s761_s29 }
 0x503   :  { %v378_v5 = vpop.permute.xlu1 %377 }
 0x504   :  { %v380_v6 = vmul.f32 %v739_v62, %v378_v5 }
 0x506   :  { %v388_v7 = vrot.slane %v380_v6, %v847_v17 }
 0x508   :  { %389 = vrot.lane.b32.xlu0 %v388_v7, %s762_s8 }
 0x57a   :  { %v390_v8 = vpop.permute.xlu0 %389 }
 0x57b   :  { %611 = vst.msk [vmem:[%s971_s6 + $0x2] sm:$0x3] %vm609_vm3, %v390_v8  ;;  %708 = vmatmul.mubr.msk.f32.vlgmr.msra.gmra.mxu0 %vm164_vm1, %v390_v8 }
 0x63b   :  { %v459_v11 = vpop.f32.mrf.mxu0 }
 0x63c   :  { %v463_v12 = vadd.f32 %v459_v11, %v151_v10 }
 0x63d   :  { %v709_v13 = vpop.f32.mrf.mxu0 }
 0x63e   :  { %742 = vtanh.f32 %v463_v12  ;;  %v626_v15 = vmul.f32 -1.442695, %v463_v12 }
 0x640   :  { %744 = vpow2.f32 %v626_v15 }
 0x64b   :  { %v743_v14 = vpop.eup %742 }
 0x64c   :  { %473 = vrot.lane.b32.xlu1 %v743_v14, %s761_s29 }
 0x64d   :  { %v745_v16 = vpop.eup %744 }
 0x64e   :  { %v467_v18 = vadd.f32 1.0, %v745_v16 }
 0x650   :  { %746 = vrcp.f32 %v467_v18 }
 0x65d   :  { %v747_v19 = vpop.eup %746 }
 0x65e   :  { %v471_v22 = vmul.f32 %v747_v19, %v374_v3 }
 0x6be   :  { %v474_v20 = vpop.permute.xlu1 %473 }
 0x6bf   :  { %v476_v21 = vmul.f32 %v747_v19, %v474_v20 }
 0x6c1   :  { %478 = vrot.lane.b32.xlu0 %v476_v21, %s762_s8 }
 0x733   :  { %v479_v23 = vpop.permute.xlu0 %478 }
 0x734   :  { %v481_v24 = vadd.f32 %v479_v23, %v471_v22 }
 0x736   :  { %748 = vtanh.f32 %v481_v24 }
 0x743   :  { %v749_v25 = vpop.eup %748 }
 0x744   :  { %484 = vrot.lane.b32.xlu1 %v749_v25, %s761_s29 }
 0x7b6   :  { %v485_v26 = vpop.permute.xlu1 %484 }
 0x7b7   :  { %v487_v27 = vmul.f32 %v747_v19, %v485_v26 }
 0x7b9   :  { %v495_v28 = vrot.slane %v487_v27, %v847_v17 }
 0x7bb   :  { %496 = vrot.lane.b32.xlu0 %v495_v28, %s762_s8 }
 0x82d   :  { %v497_v29 = vpop.permute.xlu0 %496 }
 0x82e   :  { %612 = vst.msk [vmem:[%s971_s6 + $0x4] sm:$0x3] %vm609_vm3, %v497_v29  ;;  %719 = vmatmul.mubr.msk.f32.vlgmr.msra.gmra.mxu1 %vm164_vm1, %v497_v29 }
 0x8ee   :  { %v566_v31 = vpop.f32.mrf.mxu1 }
 0x8ef   :  { %v570_v32 = vadd.f32 %v566_v31, %v153_v30 }
 0x8f0   :  { %v720_v33 = vpop.f32.mrf.mxu1 }
 0x8f1   :  { %750 = vtanh.f32 %v570_v32  ;;  %v628_v35 = vmul.f32 -1.442695, %v570_v32 }
 0x8f3   :  { %752 = vpow2.f32 %v628_v35 }
 0x8fe   :  { %v751_v34 = vpop.eup %750 }
 0x8ff   :  { %580 = vrot.lane.b32.xlu1 %v751_v34, %s761_s29 }
 0x900   :  { %v753_v36 = vpop.eup %752 }
 0x901   :  { %v574_v37 = vadd.f32 1.0, %v753_v36 }
 0x903   :  { %754 = vrcp.f32 %v574_v37 }
 0x910   :  { %v755_v38 = vpop.eup %754 }
 0x911   :  { %v578_v41 = vmul.f32 %v755_v38, %v481_v24 }
 0x971   :  { %v581_v39 = vpop.permute.xlu1 %580 }
 0x972   :  { %v583_v40 = vmul.f32 %v755_v38, %v581_v39 }
 0x974   :  { %585 = vrot.lane.b32.xlu0 %v583_v40, %s762_s8 }
 0x9e6   :  { %v586_v42 = vpop.permute.xlu0 %585 }
 0x9e7   :  { %v588_v43 = vadd.f32 %v586_v42, %v578_v41 }
 0x9e9   :  { %756 = vtanh.f32 %v588_v43 }
 0x9f6   :  { %v757_v44 = vpop.eup %756 }
 0x9f7   :  { %591 = vrot.lane.b32.xlu1 %v757_v44, %s761_s29 }
 0xa69   :  { %v592_v45 = vpop.permute.xlu1 %591 }
 0xa6a   :  { %v594_v46 = vmul.f32 %v755_v38, %v592_v45 }
 0xa6c   :  { %v602_v47 = vrot.slane %v594_v46, %v847_v17 }
 0xa6e   :  { %603 = vrot.lane.b32.xlu0 %v602_v47, %s762_s8 }
 0xae0   :  { %v604_v48 = vpop.permute.xlu0 %603 }
 0xae1   :  { %613 = vst.msk [vmem:[%s971_s6 + $0x6] sm:$0x3] %vm609_vm3, %v604_v48 }

// kernel: ptr_extract_summ_forward.7
= control target key start
LH: loop header
LB: loop body
LE: loop exit
PB: predicated region body
PF: predicated region fallthrough
CT: control target
= control target key end

     0   :  { %v35_v1 = vlaneseq  ;;  %v1991_v2 = vmov 0.0   ;;  %vm1992_vm0 = vmmov 0   ;;  %v1993_v7 = vmov 1983009808   ;;  %s2441_s0 = inlined_call_operand.vmem [shape: f32[2,6,64], index: 0, kind: input, shape index: {}]   ;;  %s2442_s1 = inlined_call_operand.vmem [shape: f32[2,4,32], index: 1, kind: input, shape index: {}]   ;;  %s2443_s2 = inlined_call_operand.vmem [shape: f32[64,64], index: 2, kind: input, shape index: {}]   ;;  %s2444_s3 = inlined_call_operand.vmem [shape: f32[32,32], index: 3, kind: input, shape index: {}]   ;;  %s2445_s4 = inlined_call_operand.vmem [shape: f32[1,1,32], index: 4, kind: input, shape index: {}]   ;;  %s2446_s5 = inlined_call_operand.vmem [shape: f32[32,32], index: 5, kind: input, shape index: {}]   ;;  %s2447_s6 = inlined_call_operand.vmem [shape: f32[1,1,32], index: 6, kind: input, shape index: {}]   ;;  %s2448_s7 = inlined_call_operand.hbm [shape: f32[2,4,128], index: 7, kind: output, shape index: {}]  }
   0x1   :  { %v214_v0 = vld [vmem:[%s2446_s5 + $0x18] sm:$0xff]  ;;  %1829 = vmatprep.subr.mxu1 %v1991_v2  ;;  %v213_v3 = vld [vmem:[%s2446_s5 + $0x10] sm:$0xff]  ;;  %1837 = vmatprep.mubr.msk.f32.mxu1 %vm1992_vm0, %v1991_v2  ;;  %v212_v6 = vld [vmem:[%s2446_s5 + $0x8] sm:$0xff]  ;;  %v33_v8 = vunpack.c.l.s4 %v1993_v7 }
   0x2   :  { %1830 = vmatpush3.msra.mxu1 %v214_v0  ;;  %v70_v4 = vld [vmem:[%s2443_s2 + $0x38] sm:$0xff]  ;;  %v69_v5 = vld [vmem:[%s2443_s2 + $0x30] sm:$0xff]  ;;  %v2060_v9 = vshrl.u32 %v35_v1, 7  ;;  %v211_v10 = vld [vmem:[%s2446_s5] sm:$0xff] }
   0x3   :  { %1831 = vmatprep.subr.mxu1 %v1991_v2  ;;  %1810 = vmatprep.subr.mxu0 %v70_v4  ;;  %v1870_v11 = vld [vmem:[%s2442_s1] sm:$0xff]   ;;  %v68_v12 = vld [vmem:[%s2443_s2 + $0x28] sm:$0xff]  ;;  %v34_v15 = vunpack.c.0.s8 %v33_v8 }
   0x4   :  { %1832 = vmatpush3.msra.mxu1 %v213_v3  ;;  %1811 = vmatpush3.msra.mxu0 %v70_v4  ;;  %v27_v13 = vld [vmem:[%s2441_s0] sm:$0x3f]  ;;  %v28_v14 = vld [vmem:[%s2441_s0 + $0x8] sm:$0x3f] }
   0x5   :  { %1833 = vmatprep.subr.mxu1 %v1991_v2  ;;  %1812 = vmatprep.subr.mxu0 %v69_v5 }
   0x6   :  { %12 = vsyncpa [#allocation3], 0  ;;  %1834 = vmatpush3.msra.mxu1 %v212_v6  ;;  %vm218_vm1 = vcmask 261120   ;;  %1813 = vmatpush3.msra.mxu0 %v69_v5  ;;  %v67_v16 = vld [vmem:[%s2443_s2 + $0x20] sm:$0xff]  ;;  %v31_v17 = vcombine.high %v27_v13, %v27_v13  ;;  %v47_v18 = vcombine.high %v28_v14, %v28_v14  ;;  %v2083_v19 = vsub.s32 %v34_v15, %v2060_v9  ;;  %v66_v20 = vld [vmem:[%s2443_s2 + $0x18] sm:$0xff] }
   0x7   :  { %1835 = vmatprep.subr.mxu1 %v1991_v2  ;;  %1814 = vmatprep.subr.mxu0 %v68_v12  ;;  %v65_v24 = vld [vmem:[%s2443_s2 + $0x10] sm:$0xff]  ;;  %v64_v29 = vld [vmem:[%s2443_s2 + $0x8] sm:$0xff]  ;;  %v63_v33 = vld [vmem:[%s2443_s2] sm:$0xff]  ;;  %vm96_vm2 = vcmask 523264   ;;  %v1994_v37 = vmov 1966171168  }
   0x8   :  { %1836 = vmatpush3.msra.mxu1 %v211_v10  ;;  %1815 = vmatpush3.msra.mxu0 %v68_v12  ;;  %v38_v21 = vrot.slane %v27_v13, %v2083_v19  ;;  %v45_v22 = vrot.slane %v31_v17, %v2083_v19  ;;  %v54_v23 = vrot.slane %v28_v14, %v2083_v19  ;;  %v294_v38 = vunpack.c.l.s4 %v1994_v37  ;;  %s1995_s2 = smov 32  }
   0x9   :  { %1838 = vmatmul.mubr.msk.f32.vlgmr.msra.gmra.mxu1 %vm218_vm1, %v1870_v11  ;;  %1816 = vmatprep.subr.mxu0 %v67_v16  ;;  %v61_v25 = vrot.slane %v47_v18, %v2083_v19  ;;  %v2116_v43 = vsub.s32 0, %v2060_v9  ;;  %vm852_vm3 = vcmask 259072   ;;  %vm899_vm4 = vcmask 1041409  }
   0xa   :  { %1817 = vmatpush3.msra.mxu0 %v67_v16  ;;  %1840 = vmatprep.subr.mxu1 %v1991_v2  ;;  %v46_v26 = vcombine.high %v38_v21, %v38_v21  ;;  %v62_v27 = vcombine.high %v54_v23, %v54_v23  ;;  %v72_v28 = vcombine.low %v45_v22, %v54_v23  ;;  %v295_v39 = vunpack.c.0.s8 %v294_v38 }
   0xb   :  { %1818 = vmatprep.subr.mxu0 %v66_v20  ;;  %1842 = vmatprep.mubr.msk.f32.mxu1 %vm1992_vm0, %v1991_v2  ;;  %vm901_vm5 = vcmask 1042434   ;;  %vm903_vm6 = vcmask 1043459   ;;  %vm926_vm7 = vcmask 1045504   ;;  %vm923_vm8 = vcmask 48128  }
   0xc   :  { %1819 = vmatpush3.msra.mxu0 %v66_v20  ;;  %v71_v30 = vcombine.low %v38_v21, %v46_v26  ;;  %v86_v31 = vrot.slane %v72_v28, %v2083_v19  ;;  %v88_v32 = vcombine.low %v62_v27, %v61_v25  ;;  %v2112_v40 = vsub.s32 %v295_v39, %v2060_v9 }
   0xd   :  { %1820 = vmatprep.subr.mxu0 %v65_v24 }
   0xe   :  { %1821 = vmatpush3.msra.mxu0 %v65_v24  ;;  %v79_v34 = vrot.slane %v71_v30, %v2083_v19  ;;  %v95_v35 = vrot.slane %v88_v32, %v2083_v19 }
   0xf   :  { %1822 = vmatprep.subr.mxu0 %v64_v29 }
  0x10   :  { %1823 = vmatpush3.msra.mxu0 %v64_v29  ;;  %v87_v36 = vcombine.low %v79_v34, %v86_v31 }
  0x11   :  { %1824 = vmatprep.subr.mxu0 %v63_v33 }
  0x12   :  { %1825 = vmatpush3.msra.mxu0 %v63_v33  ;;  %1826 = vmatprep.mubr.msk.f32.mxu0 %vm96_vm2, %v87_v36  ;;  %v1779_v33 = vld [vmem:[%s2447_s6] ss:$0 sm:$0xff]  ;;  %s1996_s6 = smov 96  }
  0x13   :  { %1850 = vmatprep.subr.mxu0 %v1991_v2  ;;  %1827 = vmatmul.mubr.msk.f32.vlgmr.msra.gmra.mxu0 %vm96_vm2, %v95_v35  ;;  %v634_v37 = vrot.slane %v1779_v33, %v2083_v19  ;;  %v627_v38 = vcombine.high %v1779_v33, %v1779_v33 }
  0x14   :  { %1858 = vmatprep.mubr.msk.f32.mxu0 %vm1992_vm0, %v1991_v2 }
  0xc9   :  { %v287_v41 = vpop.f32.mrf.mxu1 }
  0xca   :  { %v299_v42 = vrot.slane %v287_v41, %v2112_v40  ;;  %v292_v48 = vcombine.high %v287_v41, %v287_v41  ;;  %v642_v41 = vcombine.high %v634_v37, %v634_v37 }
  0xcb   :  { %v1839_v44 = vpop.f32.mrf.mxu1 }
  0xcc   :  { %v307_v45 = vcombine.high %v299_v42, %v299_v42  ;;  %v315_v46 = vrot.slane %v299_v42, %v2112_v40  ;;  %v306_v53 = vrot.slane %v292_v48, %v2112_v40  ;;  %v641_v42 = vrot.slane %v627_v38, %v2083_v19 }
  0xce   :  { %v344_v47 = vrot.slane %v315_v46, %v2116_v43  ;;  %v337_v49 = vcombine.high %v315_v46, %v315_v46  ;;  %v329_v50 = vrot.slane %v307_v45, %v2112_v40  ;;  %v322_v57 = vrot.slane %v306_v53, %v2112_v40 }
  0xcf   :  { %v308_v4 = vcombine.high %v306_v53, %v306_v53 }
  0xd0   :  { %v380_v51 = vrot.slane %v344_v47, %v2083_v19  ;;  %v348_v52 = vrot.slane %v329_v50, %v2116_v43  ;;  %v352_v55 = vrot.slane %v337_v49, %v2116_v43  ;;  %v373_v60 = vcombine.high %v344_v47, %v344_v47 }
  0xd1   :  { %v339_v61 = vcombine.high %v329_v50, %v329_v50  ;;  %v360_v0 = vrot.slane %v322_v57, %v2116_v43  ;;  %v336_v8 = vrot.slane %v308_v4, %v2112_v40  ;;  %v338_v13 = vcombine.high %v322_v57, %v322_v57 }
  0xd2   :  { %501 = vrot.lane.b32.xlu0 %v380_v51, %s1995_s2  ;;  %v396_v54 = vrot.slane %v348_v52, %v2083_v19  ;;  %v388_v56 = vcombine.high %v380_v51, %v380_v51  ;;  %v412_v59 = vrot.slane %v352_v55, %v2083_v19  ;;  %v389_v62 = vcombine.high %v348_v52, %v348_v52 }
  0xd3   :  { %v387_v3 = vrot.slane %v373_v60, %v2083_v19  ;;  %v444_v6 = vrot.slane %v360_v0, %v2083_v19  ;;  %v356_v7 = vrot.slane %v339_v61, %v2116_v43  ;;  %v405_v12 = vcombine.high %v352_v55, %v352_v55  ;;  %v1828_v49 = vpop.f32.mrf.mxu0 }
  0xd4   :  { %507 = vrot.lane.b32.xlu1 %v396_v54, %s1995_s2  ;;  %v404_v58 = vcombine.high %v396_v54, %v396_v54  ;;  %v420_v63 = vcombine.high %v412_v59, %v412_v59  ;;  %v403_v5 = vrot.slane %v389_v62, %v2083_v19  ;;  %v364_v16 = vrot.slane %v336_v8, %v2116_v43 }
  0xd5   :  { %v452_v10 = vcombine.high %v444_v6, %v444_v6  ;;  %v428_v11 = vrot.slane %v356_v7, %v2083_v19  ;;  %v421_v15 = vcombine.high %v356_v7, %v356_v7  ;;  %v419_v17 = vrot.slane %v405_v12, %v2083_v19  ;;  %v167_v52 = vpop.f32.mrf.mxu0 }
  0xd6   :  { %503 = vrot.lane.b32.xlu0 %v388_v56, %s1995_s2  ;;  %v460_v20 = vrot.slane %v364_v16, %v2083_v19  ;;  %v368_v21 = vrot.slane %v338_v13, %v2116_v43  ;;  %v340_v24 = vcombine.high %v336_v8, %v336_v8  ;;  %v437_v25 = vcombine.high %v360_v0, %v360_v0 }
  0xd7   :  { %v436_v14 = vcombine.high %v428_v11, %v428_v11  ;;  %v435_v18 = vrot.slane %v421_v15, %v2083_v19  ;;  %v453_v27 = vcombine.high %v364_v16, %v364_v16  ;;  %v2180_v55 = vrot.slane %v167_v52, %v2083_v19 }
  0xd8   :  { %509 = vrot.lane.b32.xlu1 %v404_v58, %s1995_s2  ;;  %v468_v22 = vcombine.high %v460_v20, %v460_v20  ;;  %v476_v23 = vrot.slane %v368_v21, %v2083_v19  ;;  %v372_v28 = vrot.slane %v340_v24, %v2116_v43  ;;  %v451_v29 = vrot.slane %v437_v25, %v2083_v19 }
  0xd9   :  { %v467_v30 = vrot.slane %v453_v27, %v2083_v19  ;;  %v469_v32 = vcombine.high %v368_v21, %v368_v21  ;;  %v178_v56 = vcombine.high %v167_v52, %v167_v52  ;;  %v2184_v57 = vcombine.high %v2180_v55, %v2180_v55 }
  0xda   :  { %513 = vrot.lane.b32.xlu0 %v412_v59, %s1995_s2  ;;  %v484_v26 = vcombine.high %v476_v23, %v476_v23  ;;  %v492_v31 = vrot.slane %v372_v28, %v2083_v19  ;;  %v485_v35 = vcombine.high %v372_v28, %v372_v28  ;;  %v2199_v7 = vrot.slane %v1828_v49, %v2083_v19 }
  0xdb   :  { %v483_v36 = vrot.slane %v469_v32, %v2083_v19  ;;  %v2189_v62 = vrot.slane %v178_v56, %v2083_v19 }
  0xdc   :  { %515 = vrot.lane.b32.xlu1 %v420_v63, %s1995_s2  ;;  %v500_v34 = vcombine.high %v492_v31, %v492_v31  ;;  %v499_v39 = vrot.slane %v485_v35, %v2083_v19  ;;  %v2213_v25 = vcombine.high %v2199_v7, %v2199_v7 }
  0xde   :  { %505 = vrot.lane.b32.xlu0 %v387_v3, %s1995_s2 }
  0xe0   :  { %511 = vrot.lane.b32.xlu1 %v403_v5, %s1995_s2 }
  0xe2   :  { %525 = vrot.lane.b32.xlu0 %v444_v6, %s1995_s2  ;;  %v2196_v6 = vcombine.high %v2189_v62, %v2189_v62 }
  0xe4   :  { %527 = vrot.lane.b32.xlu1 %v452_v10, %s1995_s2 }
  0xe6   :  { %519 = vrot.lane.b32.xlu0 %v428_v11, %s1995_s2 }
  0xe8   :  { %521 = vrot.lane.b32.xlu1 %v436_v14, %s1995_s2 }
  0xea   :  { %517 = vrot.lane.b32.xlu0 %v419_v17, %s1995_s2 }
  0xec   :  { %523 = vrot.lane.b32.xlu1 %v435_v18, %s1995_s2 }
  0xee   :  { %531 = vrot.lane.b32.xlu0 %v460_v20, %s1995_s2 }
  0xf0   :  { %533 = vrot.lane.b32.xlu1 %v468_v22, %s1995_s2 }
  0xf2   :  { %537 = vrot.lane.b32.xlu0 %v476_v23, %s1995_s2 }
  0xf4   :  { %539 = vrot.lane.b32.xlu1 %v484_v26, %s1995_s2 }
  0xf6   :  { %529 = vrot.lane.b32.xlu0 %v451_v29, %s1995_s2 }
  0xf8   :  { %535 = vrot.lane.b32.xlu1 %v467_v30, %s1995_s2 }
  0xfa   :  { %543 = vrot.lane.b32.xlu0 %v492_v31, %s1995_s2 }
  0xfc   :  { %545 = vrot.lane.b32.xlu1 %v500_v34, %s1995_s2 }
  0xfe   :  { %541 = vrot.lane.b32.xlu0 %v483_v36, %s1995_s2 }
 0x100   :  { %547 = vrot.lane.b32.xlu1 %v499_v39, %s1995_s2 }
 0x102   :  { %643 = vrot.lane.b32.xlu0 %v634_v37, %s1995_s2 }
 0x104   :  { %645 = vrot.lane.b32.xlu1 %v642_v41, %s1995_s2 }
 0x106   :  { %647 = vrot.lane.b32.xlu0 %v641_v42, %s1995_s2 }
 0x144   :  { %v502_v44 = vpop.permute.xlu0 %501 }
 0x145   :  { %v573_v60 = vadd.f32 %v502_v44, %v2180_v55 }
 0x146   :  { %v508_v45 = vpop.permute.xlu1 %507 }
 0x147   :  { %v576_v61 = vadd.f32 %v508_v45, %v2180_v55  ;;  %1873 = vtanh.f32 %v573_v60 }
 0x148   :  { %v504_v46 = vpop.permute.xlu0 %503 }
 0x149   :  { %v574_v63 = vadd.f32 %v504_v46, %v2184_v57  ;;  %1875 = vtanh.f32 %v576_v61 }
 0x14a   :  { %v510_v47 = vpop.permute.xlu1 %509 }
 0x14b   :  { %v577_v3 = vadd.f32 %v510_v47, %v2184_v57  ;;  %1877 = vtanh.f32 %v574_v63 }
 0x14c   :  { %v514_v48 = vpop.permute.xlu0 %513 }
 0x14d   :  { %v579_v5 = vadd.f32 %v514_v48, %v2180_v55  ;;  %1879 = vtanh.f32 %v577_v3 }
 0x14e   :  { %v516_v50 = vpop.permute.xlu1 %515 }
 0x14f   :  { %v580_v8 = vadd.f32 %v516_v50, %v2184_v57  ;;  %1881 = vtanh.f32 %v579_v5 }
 0x150   :  { %v506_v51 = vpop.permute.xlu0 %505 }
 0x151   :  { %v575_v10 = vadd.f32 %v506_v51, %v2189_v62  ;;  %1883 = vtanh.f32 %v580_v8 }
 0x152   :  { %v512_v53 = vpop.permute.xlu1 %511 }
 0x153   :  { %v578_v12 = vadd.f32 %v512_v53, %v2189_v62  ;;  %1885 = vtanh.f32 %v575_v10 }
 0x154   :  { %v526_v54 = vpop.permute.xlu0 %525  ;;  %v1874_v29 = vpop.eup %1873 }
 0x155   :  { %v585_v14 = vadd.f32 %v526_v54, %v2196_v6  ;;  %1887 = vtanh.f32 %v578_v12 }
 0x156   :  { %v528_v58 = vpop.permute.xlu1 %527  ;;  %v1876_v30 = vpop.eup %1875 }
 0x157   :  { %v586_v15 = vadd.f32 %v528_v58, %v2199_v7  ;;  %1889 = vtanh.f32 %v585_v14 }
 0x158   :  { %v520_v59 = vpop.permute.xlu0 %519  ;;  %v1878_v33 = vpop.eup %1877 }
 0x159   :  { %v582_v16 = vadd.f32 %v520_v59, %v2180_v55  ;;  %1891 = vtanh.f32 %v586_v15 }
 0x15a   :  { %v522_v0 = vpop.permute.xlu1 %521  ;;  %v1880_v37 = vpop.eup %1879 }
 0x15b   :  { %v583_v18 = vadd.f32 %v522_v0, %v2184_v57  ;;  %1893 = vtanh.f32 %v582_v16 }
 0x15c   :  { %v518_v4 = vpop.permute.xlu0 %517  ;;  %v1882_v39 = vpop.eup %1881 }
 0x15d   :  { %v581_v22 = vadd.f32 %v518_v4, %v2189_v62  ;;  %1895 = vtanh.f32 %v583_v18 }
 0x15e   :  { %v524_v11 = vpop.permute.xlu1 %523  ;;  %v1884_v41 = vpop.eup %1883 }
 0x15f   :  { %v584_v23 = vadd.f32 %v524_v11, %v2189_v62 }
 0x160   :  { %v532_v13 = vpop.permute.xlu0 %531  ;;  %v1886_v44 = vpop.eup %1885 }
 0x161   :  { %v588_v21 = vadd.f32 %v532_v13, %v2196_v6 }
 0x162   :  { %v534_v17 = vpop.permute.xlu1 %533  ;;  %v1888_v47 = vpop.eup %1887 }
 0x163   :  { %v589_v26 = vadd.f32 %v534_v17, %v2199_v7  ;;  %1897 = vtanh.f32 %v588_v21 }
 0x164   :  { %v538_v20 = vpop.permute.xlu0 %537  ;;  %1899 = vtanh.f32 %v581_v22  ;;  %v1890_v49 = vpop.eup %1889 }
 0x165   :  { %1901 = vtanh.f32 %v584_v23  ;;  %v591_v31 = vadd.f32 %v538_v20, %v2196_v6 }
 0x166   :  { %v540_v24 = vpop.permute.xlu1 %539  ;;  %1903 = vtanh.f32 %v589_v26  ;;  %v1892_v50 = vpop.eup %1891 }
 0x167   :  { %v592_v34 = vadd.f32 %v540_v24, %v2199_v7 }
 0x168   :  { %v530_v27 = vpop.permute.xlu0 %529  ;;  %v1894_v52 = vpop.eup %1893 }
 0x169   :  { %v587_v28 = vadd.f32 %v530_v27, %v2213_v25 }
 0x16a   :  { %v536_v32 = vpop.permute.xlu1 %535  ;;  %v1896_v56 = vpop.eup %1895 }
 0x16b   :  { %v590_v35 = vadd.f32 %v536_v32, %v2213_v25  ;;  %1905 = vtanh.f32 %v587_v28 }
 0x16c   :  { %v544_v36 = vpop.permute.xlu0 %543 }
 0x16d   :  { %v594_v38 = vadd.f32 %v544_v36, %v2196_v6  ;;  %1907 = vtanh.f32 %v590_v35 }
 0x16e   :  { %1909 = vtanh.f32 %v591_v31  ;;  %v546_v42 = vpop.permute.xlu1 %545 }
 0x16f   :  { %1911 = vtanh.f32 %v592_v34  ;;  %v595_v45 = vadd.f32 %v546_v42, %v2199_v7 }
 0x170   :  { %v542_v46 = vpop.permute.xlu0 %541  ;;  %1913 = vtanh.f32 %v594_v38  ;;  %v1898_v58 = vpop.eup %1897 }
 0x171   :  { %v593_v48 = vadd.f32 %v542_v46, %v2213_v25  ;;  %1915 = vtanh.f32 %v595_v45  ;;  %v1900_v60 = vpop.eup %1899 }
 0x172   :  { %v548_v51 = vpop.permute.xlu1 %547  ;;  %v1902_v5 = vpop.eup %1901 }
 0x173   :  { %1917 = vtanh.f32 %v593_v48  ;;  %v596_v53 = vadd.f32 %v548_v51, %v2213_v25  ;;  %v1904_v14 = vpop.eup %1903 }
 0x174   :  { %v644_v54 = vpop.permute.xlu0 %643 }
 0x175   :  { %1919 = vtanh.f32 %v596_v53  ;;  %v655_v59 = vmul.f32 %v1876_v30, %v644_v54  ;;  %v652_v63 = vmul.f32 %v1874_v29, %v644_v54  ;;  %v661_v0 = vmul.f32 %v1894_v52, %v644_v54 }
 0x176   :  { %v646_v61 = vpop.permute.xlu1 %645  ;;  %v658_v3 = vmul.f32 %v1882_v39, %v644_v54  ;;  %v667_v4 = vmul.f32 %v1898_v58, %v644_v54  ;;  %v664_v30 = vmul.f32 %v1890_v49, %v644_v54 }
 0x177   :  { %v656_v10 = vmul.f32 %v1880_v37, %v646_v61  ;;  %v653_v11 = vmul.f32 %v1878_v33, %v646_v61  ;;  %v662_v12 = vmul.f32 %v1896_v56, %v646_v61  ;;  %v659_v13 = vmul.f32 %v1884_v41, %v646_v61 }
 0x178   :  { %v648_v8 = vpop.permute.xlu0 %647  ;;  %v1906_v20 = vpop.eup %1905  ;;  %v668_v38 = vmul.f32 %v1904_v14, %v646_v61  ;;  %v665_v41 = vmul.f32 %v1892_v50, %v646_v61 }
 0x179   :  { %v657_v15 = vmul.f32 %v1888_v47, %v648_v8  ;;  %v654_v16 = vmul.f32 %v1886_v44, %v648_v8  ;;  %v663_v17 = vmul.f32 %v1902_v5, %v648_v8  ;;  %v660_v18 = vmul.f32 %v1900_v60, %v648_v8 }
 0x17a   :  { %v716_v21 = vcombine.low %v655_v59, %v656_v10  ;;  %v700_v22 = vcombine.low %v652_v63, %v653_v11  ;;  %v748_v23 = vcombine.low %v661_v0, %v662_v12  ;;  %v732_v24 = vcombine.low %v658_v3, %v659_v13  ;;  %v1908_v26 = vpop.eup %1907 }
 0x17b   :  { %v730_v27 = vrot.slane %v657_v15, %v2083_v19  ;;  %v714_v28 = vrot.slane %v654_v16, %v2083_v19  ;;  %v762_v29 = vrot.slane %v663_v17, %v2083_v19  ;;  %v1910_v31 = vpop.eup %1909  ;;  %v746_v35 = vrot.slane %v660_v18, %v2083_v19 }
 0x17c   :  { %v723_v32 = vrot.slane %v716_v21, %v2083_v19  ;;  %v707_v33 = vrot.slane %v700_v22, %v2083_v19  ;;  %v755_v34 = vrot.slane %v748_v23, %v2083_v19  ;;  %v1912_v36 = vpop.eup %1911  ;;  %v739_v37 = vrot.slane %v732_v24, %v2083_v19 }
 0x17d   :  { %v669_v39 = vmul.f32 %v1908_v26, %v648_v8  ;;  %v1914_v42 = vpop.eup %1913  ;;  %v666_v46 = vmul.f32 %v1906_v20, %v648_v8  ;;  %v780_v48 = vcombine.low %v667_v4, %v668_v38  ;;  %v764_v49 = vcombine.low %v664_v30, %v665_v41 }
 0x17e   :  { %v731_v44 = vcombine.low %v723_v32, %v730_v27  ;;  %v715_v45 = vcombine.low %v707_v33, %v714_v28  ;;  %v1916_v47 = vpop.eup %1915  ;;  %v671_v53 = vmul.f32 %v1912_v36, %v646_v61  ;;  %v763_v56 = vcombine.low %v755_v34, %v762_v29 }
 0x17f   :  { %v674_v52 = vmul.f32 %v1916_v47, %v646_v61  ;;  %v747_v58 = vcombine.low %v739_v37, %v746_v35  ;;  %v794_v59 = vrot.slane %v669_v39, %v2083_v19  ;;  %v670_v50 = vmul.f32 %v1910_v31, %v644_v54 }
 0x180   :  { %v1918_v51 = vpop.eup %1917  ;;  %830 = vrot.lane.b32.xlu0 %v731_v44, %s1996_s6  ;;  %828 = vrot.lane.b32.xlu1 %v715_v45, %s1996_s6  ;;  %v771_v60 = vrot.slane %v764_v49, %v2083_v19  ;;  %v778_v63 = vrot.slane %v666_v46, %v2083_v19  ;;  %v673_v0 = vmul.f32 %v1914_v42, %v644_v54 }
 0x181   :  { %v672_v3 = vmul.f32 %v1918_v51, %v648_v8  ;;  %v787_v5 = vrot.slane %v780_v48, %v2083_v19  ;;  %v796_v11 = vcombine.low %v670_v50, %v671_v53  ;;  %v1022_v36 = vcombine.low %v2196_v6, %v2199_v7 }
 0x182   :  { %v1920_v4 = vpop.eup %1919  ;;  %v812_v61 = vcombine.low %v673_v0, %v674_v52  ;;  %v779_v13 = vcombine.low %v771_v60, %v778_v63  ;;  %v1036_v38 = vrot.slane %v2213_v25, %v2083_v19  ;;  %v905_v39 = vcombine.low %v2180_v55, %v2184_v57 }
 0x183   :  { %v675_v10 = vmul.f32 %v1920_v4, %v648_v8  ;;  %v795_v12 = vcombine.low %v787_v5, %v794_v59  ;;  %v810_v15 = vrot.slane %v672_v3, %v2083_v19  ;;  %v803_v16 = vrot.slane %v796_v11, %v2083_v19 }
 0x184   :  { %834 = vrot.lane.b32.xlu0 %v763_v56, %s1996_s6  ;;  %832 = vrot.lane.b32.xlu1 %v747_v58, %s1996_s6  ;;  %v819_v54 = vrot.slane %v812_v61, %v2083_v19  ;;  %v1029_v37 = vrot.slane %v1022_v36, %v2083_v19  ;;  %v912_v42 = vrot.slane %v905_v39, %v2083_v19  ;;  %v882_v48 = vand.u32 127, %v35_v1 }
 0x185   :  { %v826_v14 = vrot.slane %v675_v10, %v2083_v19  ;;  %v811_v18 = vcombine.low %v803_v16, %v810_v15  ;;  %v919_v44 = vrot.slane %v2189_v62, %v2083_v19  ;;  %v1116_v16 = vld [vmem:[%s2444_s3 + $0x10] sm:$0xff] }
 0x186   :  { %v1037_v41 = vcombine.low %v1029_v37, %v1036_v38  ;;  %v2270_v52 = vsub.s32 %v882_v48, %v2060_v9 }
 0x187   :  { %v827_v17 = vcombine.low %v819_v54, %v826_v14  ;;  %v920_v45 = vcombine.low %v912_v42, %v919_v44  ;;  %v1117_v54 = vld [vmem:[%s2444_s3 + $0x18] sm:$0xff] }
 0x188   :  { %838 = vrot.lane.b32.xlu0 %v795_v12, %s1996_s6  ;;  %836 = vrot.lane.b32.xlu1 %v779_v13, %s1996_s6 }
 0x189   :  { %1851 = vmatpush3.msra.mxu0 %v1117_v54 }
 0x18a   :  { %1852 = vmatprep.subr.mxu0 %v1991_v2 }
 0x18b   :  { %1853 = vmatpush3.msra.mxu0 %v1116_v16 }
 0x18c   :  { %842 = vrot.lane.b32.xlu0 %v827_v17, %s1996_s6  ;;  %840 = vrot.lane.b32.xlu1 %v811_v18, %s1996_s6  ;;  %v1115_v17 = vld [vmem:[%s2444_s3 + $0x8] sm:$0xff]  ;;  %v1114_v18 = vld [vmem:[%s2444_s3] sm:$0xff] }
 0x18d   :  { %1854 = vmatprep.subr.mxu0 %v1991_v2 }
 0x18e   :  { %1855 = vmatpush3.msra.mxu0 %v1115_v17  ;;  %v1785_v17 = vld [vmem:[%s2445_s4] ss:$0 sm:$0xff]  ;;  %s1997_s4 = smov [#allocation2]  }
 0x18f   :  { %1856 = vmatprep.subr.mxu0 %v1991_v2  ;;  %s1765_s16 = sshll.u32 %s1997_s4, 4  ;;  %s1766_s16 = int_to_ptr.vmem [resolvable:$true] %s1765_s16 }
 0x190   :  { %1857 = vmatpush3.msra.mxu0 %v1114_v18  ;;  %s1969_s17 = scalar_lea.vmem %s1766_s16, 128  ;;  %p1974_p1 = scmp.lt.s32.totalorder %s1766_s16, %s1766_s16 }
 0x191   :  { %p1970_p0 = scmp.ne.s32.totalorder %s1766_s16, %s1969_s17  ;;  %p1975_p2 = scmp.lt.s32.totalorder %s1969_s17, %s1969_s17 }
 0x193   :  { %p1976_p3 = por %p1975_p2, %p1974_p1 }
 0x195   :  { %p1977_p4 = pnand %p1976_p3, %p1970_p0 }
 0x1f2   :  { %v831_v8 = vpop.permute.xlu0 %830  ;;  %v829_v20 = vpop.permute.xlu1 %828 }
 0x1f3   :  { %v856_v21 = vsel %vm852_vm3, %v831_v8, 0.0  ;;  %v853_v22 = vsel %vm852_vm3, %v829_v20, 0.0 }
 0x1f4   :  { %857 = vadd.xlane.f32.xlu0 %v856_v21  ;;  %854 = vadd.xlane.f32.xlu1 %v853_v22 }
 0x1f6   :  { %v835_v23 = vpop.permute.xlu0 %834  ;;  %v833_v24 = vpop.permute.xlu1 %832 }
 0x1f7   :  { %v859_v26 = vsel %vm852_vm3, %v833_v24, 0.0  ;;  %v862_v27 = vsel %vm852_vm3, %v835_v23, 0.0 }
 0x1f8   :  { %860 = vadd.xlane.f32.xlu0 %v859_v26  ;;  %863 = vadd.xlane.f32.xlu1 %v862_v27 }
 0x1fa   :  { %v839_v28 = vpop.permute.xlu0 %838  ;;  %v837_v29 = vpop.permute.xlu1 %836 }
 0x1fb   :  { %v868_v30 = vsel %vm852_vm3, %v839_v28, 0.0  ;;  %v865_v31 = vsel %vm852_vm3, %v837_v29, 0.0 }
 0x1fc   :  { %869 = vadd.xlane.f32.xlu1 %v868_v30  ;;  %866 = vadd.xlane.f32.xlu0 %v865_v31 }
 0x1fe   :  { %v843_v32 = vpop.permute.xlu0 %842  ;;  %v841_v33 = vpop.permute.xlu1 %840 }
 0x1ff   :  { %v874_v34 = vsel %vm852_vm3, %v843_v32, 0.0  ;;  %v871_v35 = vsel %vm852_vm3, %v841_v33, 0.0 }
 0x200   :  { %875 = vadd.xlane.f32.xlu1 %v874_v34  ;;  %872 = vadd.xlane.f32.xlu0 %v871_v35 }
 0x211   :  { %1038 = vrot.lane.b32.xlu1 %v1037_v41, %s1996_s6 }
 0x216   :  { %921 = vrot.lane.b32.xlu0 %v920_v45, %s1996_s6 }
 0x27d   :  { %v858_v46 = vpop.xlane.xlu0 %857  ;;  %v855_v47 = vpop.xlane.xlu1 %854 }
 0x27e   :  { %v890_v58 = vrot.slane %v858_v46, %v2270_v52  ;;  %v886_v59 = vrot.slane %v855_v47, %v2270_v52 }
 0x280   :  { %v900_v0 = vsel %vm899_vm4, %v890_v58, %v886_v59 }
 0x281   :  { %v861_v49 = vpop.xlane.xlu0 %860  ;;  %v864_v51 = vpop.xlane.xlu1 %863 }
 0x282   :  { %v894_v50 = vrot.slane %v861_v49, %v2270_v52  ;;  %v898_v1 = vrot.slane %v864_v51, %v2270_v52 }
 0x284   :  { %v902_v4 = vsel %vm901_vm5, %v894_v50, %v900_v0 }
 0x285   :  { %v867_v53 = vpop.xlane.xlu0 %866  ;;  %v870_v56 = vpop.xlane.xlu1 %869  ;;  %v904_v61 = vsel %vm903_vm6, %v898_v1, %v902_v4 }
 0x286   :  { %v1006_v3 = vrot.slane %v867_v53, %v2270_v52  ;;  %v1010_v9 = vrot.slane %v870_v56, %v2270_v52 }
 0x288   :  { %v1019_v11 = vsel %vm899_vm4, %v1010_v9, %v1006_v3 }
 0x289   :  { %v873_v60 = vpop.xlane.xlu0 %872  ;;  %v876_v63 = vpop.xlane.xlu1 %875 }
 0x28a   :  { %v1014_v5 = vrot.slane %v873_v60, %v2270_v52  ;;  %v1018_v12 = vrot.slane %v876_v63, %v2270_v52 }
 0x28c   :  { %v1020_v13 = vsel %vm901_vm5, %v1014_v5, %v1019_v11 }
 0x28d   :  { %v922_v10 = vpop.permute.xlu0 %921  ;;  %v1039_v14 = vpop.permute.xlu1 %1038  ;;  %v1021_v15 = vsel %vm903_vm6, %v1018_v12, %v1020_v13 }
 0x28e   :  { %1841 = vmatpush3.msk.msra.mxu1 %vm926_vm7, %v922_v10 }
 0x28f   :  { %1843 = vmatmul.mubr.msk.f32.vlgmr.msra.gmra.mxu1 %vm923_vm8, %v904_v61  ;;  %1845 = vmatprep.subr.mxu1 %v1991_v2 }
 0x290   :  { %1846 = vmatpush3.msk.msra.mxu1 %vm926_vm7, %v1039_v14  ;;  %1847 = vmatprep.mubr.msk.f32.mxu1 %vm1992_vm0, %v1991_v2 }
 0x293   :  { %1848 = vmatmul.mubr.msk.f32.vlgmr.msra.gmra.mxu1 %vm923_vm8, %v1021_v15 }
 0x34f   :  { %v995_v8 = vpop.f32.mrf.mxu1 }
 0x351   :  { %v1844_v20 = vpop.f32.mrf.mxu1 }
 0x353   :  { %v1110_v21 = vpop.f32.mrf.mxu1 }
 0x354   :  { %v1120_v22 = vcombine.low %v995_v8, %v1110_v21 }
 0x355   :  { %v1849_v23 = vpop.f32.mrf.mxu1 }
 0x356   :  { %1859 = vmatmul.mubr.msk.f32.vlgmr.msra.gmra.mxu0 %vm218_vm1, %v1120_v22 }
 0x416   :  { %v1189_v24 = vpop.f32.mrf.mxu0 }
 0x417   :  { %v1201_v26 = vrot.slane %v1189_v24, %v2112_v40  ;;  %v1194_v30 = vcombine.high %v1189_v24, %v1189_v24 }
 0x418   :  { %v1860_v27 = vpop.f32.mrf.mxu0 }
 0x419   :  { %v1209_v28 = vcombine.high %v1201_v26, %v1201_v26  ;;  %v1217_v29 = vrot.slane %v1201_v26, %v2112_v40  ;;  %v1208_v32 = vrot.slane %v1194_v30, %v2112_v40  ;;  %v1481_v27 = vcombine.high %v1785_v17, %v1785_v17 }
 0x41b   :  { %v1231_v31 = vrot.slane %v1209_v28, %v2112_v40  ;;  %v1246_v2 = vrot.slane %v1217_v29, %v2116_v43  ;;  %v1239_v33 = vcombine.high %v1217_v29, %v1217_v29  ;;  %v1210_v38 = vcombine.high %v1208_v32, %v1208_v32 }
 0x41c   :  { %v1224_v42 = vrot.slane %v1208_v32, %v2112_v40  ;;  %v2349_v29 = vrot.slane %v1785_v17, %v2083_v19 }
 0x41d   :  { %v1250_v34 = vrot.slane %v1231_v31, %v2116_v43  ;;  %v1282_v35 = vrot.slane %v1246_v2, %v2083_v19  ;;  %v1241_v36 = vcombine.high %v1231_v31, %v1231_v31  ;;  %v1275_v37 = vcombine.high %v1246_v2, %v1246_v2 }
 0x41e   :  { %v1254_v39 = vrot.slane %v1239_v33, %v2116_v43  ;;  %v1238_v48 = vrot.slane %v1210_v38, %v2112_v40  ;;  %v1262_v58 = vrot.slane %v1224_v42, %v2116_v43  ;;  %v1240_v60 = vcombine.high %v1224_v42, %v1224_v42 }
 0x41f   :  { %v1298_v41 = vrot.slane %v1250_v34, %v2083_v19  ;;  %v1290_v44 = vcombine.high %v1282_v35, %v1282_v35  ;;  %v1291_v45 = vcombine.high %v1250_v34, %v1250_v34  ;;  %v1258_v46 = vrot.slane %v1241_v36, %v2116_v43 }
 0x420   :  { %v1289_v47 = vrot.slane %v1275_v37, %v2083_v19  ;;  %v1314_v49 = vrot.slane %v1254_v39, %v2083_v19  ;;  %v1307_v53 = vcombine.high %v1254_v39, %v1254_v39  ;;  %v1427_v56 = vadd.f32 %v1282_v35, %v2180_v55 }
 0x421   :  { %v1306_v51 = vcombine.high %v1298_v41, %v1298_v41  ;;  %v1305_v59 = vrot.slane %v1291_v45, %v2083_v19  ;;  %v1428_v50 = vadd.f32 %v1290_v44, %v2184_v57  ;;  %v1330_v63 = vrot.slane %v1258_v46, %v2083_v19 }
 0x422   :  { %v1429_v0 = vadd.f32 %v1289_v47, %v2189_v62  ;;  %v1242_v1 = vcombine.high %v1238_v48, %v1238_v48  ;;  %v1322_v3 = vcombine.high %v1314_v49, %v1314_v49  ;;  %v1323_v40 = vcombine.high %v1258_v46, %v1258_v46 }
 0x423   :  { %v1430_v9 = vadd.f32 %v1298_v41, %v2180_v55  ;;  %v1266_v4 = vrot.slane %v1238_v48, %v2116_v43  ;;  %v1321_v5 = vrot.slane %v1307_v53, %v2083_v19  ;;  %v1431_v10 = vadd.f32 %v1306_v51, %v2184_v57 }
 0x424   :  { %1921 = vtanh.f32 %v1427_v56  ;;  %v1346_v61 = vrot.slane %v1262_v58, %v2083_v19  ;;  %v1432_v11 = vadd.f32 %v1305_v59, %v2189_v62  ;;  %v1338_v12 = vcombine.high %v1330_v63, %v1330_v63 }
 0x425   :  { %1923 = vtanh.f32 %v1428_v50  ;;  %v1339_v13 = vcombine.high %v1262_v58, %v1262_v58  ;;  %v1433_v14 = vadd.f32 %v1314_v49, %v2180_v55  ;;  %v1270_v15 = vrot.slane %v1240_v60, %v2116_v43 }
 0x426   :  { %1925 = vtanh.f32 %v1429_v0  ;;  %v1337_v54 = vrot.slane %v1323_v40, %v2083_v19  ;;  %v1434_v16 = vadd.f32 %v1322_v3, %v2184_v57  ;;  %v1274_v18 = vrot.slane %v1242_v1, %v2116_v43 }
 0x427   :  { %1927 = vtanh.f32 %v1430_v9  ;;  %v1362_v8 = vrot.slane %v1266_v4, %v2083_v19  ;;  %v1435_v20 = vadd.f32 %v1321_v5, %v2189_v62  ;;  %v1354_v21 = vcombine.high %v1346_v61, %v1346_v61 }
 0x428   :  { %1929 = vtanh.f32 %v1431_v10  ;;  %v1355_v22 = vcombine.high %v1266_v4, %v1266_v4  ;;  %v1436_v23 = vadd.f32 %v1330_v63, %v2180_v55  ;;  %v1353_v24 = vrot.slane %v1339_v13, %v2083_v19 }
 0x429   :  { %1931 = vtanh.f32 %v1432_v11  ;;  %v1437_v26 = vadd.f32 %v1338_v12, %v2184_v57  ;;  %v1378_v28 = vrot.slane %v1270_v15, %v2083_v19  ;;  %v1438_v43 = vadd.f32 %v1337_v54, %v2189_v62 }
 0x42a   :  { %1933 = vtanh.f32 %v1433_v14  ;;  %v1370_v30 = vcombine.high %v1362_v8, %v1362_v8  ;;  %v1371_v31 = vcombine.high %v1270_v15, %v1270_v15  ;;  %v1439_v2 = vadd.f32 %v1346_v61, %v2196_v6 }
 0x42b   :  { %1935 = vtanh.f32 %v1434_v16  ;;  %v1369_v55 = vrot.slane %v1355_v22, %v2083_v19  ;;  %v1394_v32 = vrot.slane %v1274_v18, %v2083_v19  ;;  %v1440_v57 = vadd.f32 %v1354_v21, %v2199_v7 }
 0x42c   :  { %1937 = vtanh.f32 %v1435_v20  ;;  %v1387_v33 = vcombine.high %v1274_v18, %v1274_v18  ;;  %v1441_v34 = vadd.f32 %v1353_v24, %v2213_v25  ;;  %v1386_v62 = vcombine.high %v1378_v28, %v1378_v28 }
 0x42d   :  { %1939 = vtanh.f32 %v1436_v23  ;;  %v1442_v35 = vadd.f32 %v1362_v8, %v2196_v6  ;;  %v2359_v36 = vcombine.high %v2349_v29, %v2349_v29  ;;  %v1385_v37 = vrot.slane %v1371_v31, %v2083_v19 }
 0x42e   :  { %1941 = vtanh.f32 %v1437_v26  ;;  %v1443_v38 = vadd.f32 %v1370_v30, %v2199_v7  ;;  %v2364_v39 = vrot.slane %v1481_v27, %v2083_v19  ;;  %v1402_v42 = vcombine.high %v1394_v32, %v1394_v32 }
 0x42f   :  { %1943 = vtanh.f32 %v1438_v43  ;;  %v1444_v44 = vadd.f32 %v1369_v55, %v2213_v25  ;;  %v1401_v46 = vrot.slane %v1387_v33, %v2083_v19  ;;  %v1445_v47 = vadd.f32 %v1378_v28, %v2196_v6 }
 0x430   :  { %1945 = vtanh.f32 %v1439_v2  ;;  %v1446_v49 = vadd.f32 %v1386_v62, %v2199_v7  ;;  %v1447_v58 = vadd.f32 %v1385_v37, %v2213_v25  ;;  %v1448_v60 = vadd.f32 %v1394_v32, %v2196_v6 }
 0x431   :  { %v1922_v41 = vpop.eup %1921  ;;  %1947 = vtanh.f32 %v1440_v57  ;;  %v1449_v63 = vadd.f32 %v1402_v42, %v2199_v7  ;;  %v1450_v3 = vadd.f32 %v1401_v46, %v2213_v25 }
 0x432   :  { %v1924_v45 = vpop.eup %1923  ;;  %1949 = vtanh.f32 %v1441_v34  ;;  %v1500_v51 = vmul.f32 %v1922_v41, %v2349_v29 }
 0x433   :  { %v1926_v48 = vpop.eup %1925  ;;  %1951 = vtanh.f32 %v1442_v35  ;;  %v1501_v53 = vmul.f32 %v1924_v45, %v2359_v36 }
 0x434   :  { %v1928_v56 = vpop.eup %1927  ;;  %1953 = vtanh.f32 %v1443_v38  ;;  %v1502_v59 = vmul.f32 %v1926_v48, %v2364_v39 }
 0x435   :  { %v1930_v50 = vpop.eup %1929  ;;  %1955 = vtanh.f32 %v1444_v44  ;;  %v1548_v0 = vcombine.low %v1500_v51, %v1501_v53  ;;  %v1503_v40 = vmul.f32 %v1928_v56, %v2349_v29 }
 0x436   :  { %v1932_v1 = vpop.eup %1931  ;;  %1957 = vtanh.f32 %v1445_v47  ;;  %v1504_v9 = vmul.f32 %v1930_v50, %v2359_v36  ;;  %v1562_v10 = vrot.slane %v1502_v59, %v2083_v19 }
 0x437   :  { %v1934_v4 = vpop.eup %1933  ;;  %1959 = vtanh.f32 %v1446_v49  ;;  %v1555_v5 = vrot.slane %v1548_v0, %v2083_v19  ;;  %v1505_v6 = vmul.f32 %v1932_v1, %v2364_v39 }
 0x438   :  { %v1936_v61 = vpop.eup %1935  ;;  %1961 = vtanh.f32 %v1447_v58  ;;  %v1564_v7 = vcombine.low %v1503_v40, %v1504_v9  ;;  %v1506_v8 = vmul.f32 %v1934_v4, %v2349_v29 }
 0x439   :  { %v1938_v11 = vpop.eup %1937  ;;  %1963 = vtanh.f32 %v1448_v60  ;;  %v1563_v12 = vcombine.low %v1555_v5, %v1562_v10  ;;  %v1578_v14 = vrot.slane %v1505_v6, %v2083_v19  ;;  %v1507_v15 = vmul.f32 %v1936_v61, %v2359_v36 }
 0x43a   :  { %v1940_v25 = vpop.eup %1939  ;;  %1965 = vtanh.f32 %v1449_v63  ;;  %v1571_v13 = vrot.slane %v1564_v7, %v2083_v19  ;;  %v1508_v31 = vmul.f32 %v1938_v11, %v2364_v39 }
 0x43b   :  { %v1942_v54 = vpop.eup %1941  ;;  %1967 = vtanh.f32 %v1450_v3  ;;  %v1684_v16 = vsel %vm852_vm3, %v1563_v12, 0.0  ;;  %v1580_v23 = vcombine.low %v1506_v8, %v1507_v15  ;;  %v1509_v32 = vmul.f32 %v1940_v25, %v2349_v29 }
 0x43c   :  { %v1944_v17 = vpop.eup %1943  ;;  %1685 = vadd.xlane.f32.xlu1 %v1684_v16  ;;  %v1579_v18 = vcombine.low %v1571_v13, %v1578_v14  ;;  %v1510_v28 = vmul.f32 %v1942_v54, %v2359_v36  ;;  %v1594_v46 = vrot.slane %v1508_v31, %v2083_v19 }
 0x43d   :  { %v1946_v20 = vpop.eup %1945  ;;  %v1587_v62 = vrot.slane %v1580_v23, %v2083_v19  ;;  %v1511_v53 = vmul.f32 %v1944_v17, %v2364_v39 }
 0x43e   :  { %v1948_v21 = vpop.eup %1947  ;;  %v1687_v22 = vsel %vm852_vm3, %v1579_v18, 0.0  ;;  %v1512_v26 = vmul.f32 %v1946_v20, %v2349_v29  ;;  %v1596_v42 = vcombine.low %v1509_v32, %v1510_v28 }
 0x43f   :  { %v1950_v24 = vpop.eup %1949  ;;  %1688 = vadd.xlane.f32.xlu0 %v1687_v22  ;;  %v1513_v27 = vmul.f32 %v1948_v21, %v2359_v36  ;;  %v1595_v1 = vcombine.low %v1587_v62, %v1594_v46  ;;  %v1610_v7 = vrot.slane %v1511_v53, %v2083_v19 }
 0x440   :  { %v1952_v43 = vpop.eup %1951  ;;  %v1514_v30 = vmul.f32 %v1950_v24, %v2364_v39  ;;  %v1603_v3 = vrot.slane %v1596_v42, %v2083_v19 }
 0x441   :  { %v1954_v2 = vpop.eup %1953  ;;  %v1612_v55 = vcombine.low %v1512_v26, %v1513_v27  ;;  %v1515_v33 = vmul.f32 %v1952_v43, %v2349_v29  ;;  %v1690_v13 = vsel %vm852_vm3, %v1595_v1, 0.0 }
 0x442   :  { %v1956_v57 = vpop.eup %1955  ;;  %v1516_v34 = vmul.f32 %v1954_v2, %v2359_v36  ;;  %v1626_v41 = vrot.slane %v1514_v30, %v2083_v19  ;;  %v1611_v14 = vcombine.low %v1603_v3, %v1610_v7 }
 0x443   :  { %v1958_v35 = vpop.eup %1957  ;;  %v1517_v37 = vmul.f32 %v1956_v57, %v2364_v39  ;;  %v1619_v38 = vrot.slane %v1612_v55, %v2083_v19 }
 0x444   :  { %v1960_v44 = vpop.eup %1959  ;;  %v1628_v45 = vcombine.low %v1515_v33, %v1516_v34  ;;  %v1518_v49 = vmul.f32 %v1958_v35, %v2349_v29 }
 0x445   :  { %v1962_v47 = vpop.eup %1961  ;;  %v1627_v48 = vcombine.low %v1619_v38, %v1626_v41  ;;  %v1519_v51 = vmul.f32 %v1960_v44, %v2359_v36  ;;  %v1642_v59 = vrot.slane %v1517_v37, %v2083_v19 }
 0x446   :  { %v1964_v56 = vpop.eup %1963  ;;  %v1635_v58 = vrot.slane %v1628_v45, %v2083_v19  ;;  %v1520_v50 = vmul.f32 %v1962_v47, %v2364_v39 }
 0x447   :  { %v1966_v60 = vpop.eup %1965  ;;  %v1696_v63 = vsel %vm852_vm3, %v1627_v48, 0.0  ;;  %v1644_v0 = vcombine.low %v1518_v49, %v1519_v51  ;;  %v1521_v4 = vmul.f32 %v1964_v56, %v2349_v29 }
 0x448   :  { %v1968_v40 = vpop.eup %1967  ;;  %v1643_v9 = vcombine.low %v1635_v58, %v1642_v59  ;;  %1697 = vadd.xlane.f32.xlu0 %v1696_v63  ;;  %v1522_v5 = vmul.f32 %v1966_v60, %v2359_v36  ;;  %v1658_v6 = vrot.slane %v1520_v50, %v2083_v19 }
 0x449   :  { %v1651_v10 = vrot.slane %v1644_v0, %v2083_v19  ;;  %v1523_v61 = vmul.f32 %v1968_v40, %v2364_v39  ;;  %v1693_v39 = vsel %vm852_vm3, %v1611_v14, 0.0 }
 0x44a   :  { %v1699_v11 = vsel %vm852_vm3, %v1643_v9, 0.0  ;;  %v1660_v12 = vcombine.low %v1521_v4, %v1522_v5 }
 0x44b   :  { %1700 = vadd.xlane.f32.xlu1 %v1699_v11  ;;  %v1659_v25 = vcombine.low %v1651_v10, %v1658_v6  ;;  %v1674_v36 = vrot.slane %v1523_v61, %v2083_v19 }
 0x44c   :  { %1691 = vadd.xlane.f32.xlu0 %v1690_v13  ;;  %v1667_v29 = vrot.slane %v1660_v12, %v2083_v19 }
 0x44d   :  { %v1702_v15 = vsel %vm852_vm3, %v1659_v25, 0.0 }
 0x44e   :  { %v1675_v54 = vcombine.low %v1667_v29, %v1674_v36 }
 0x44f   :  { %1703 = vadd.xlane.f32.xlu1 %v1702_v15 }
 0x450   :  { %1694 = vadd.xlane.f32.xlu0 %v1693_v39  ;;  %v1705_v16 = vsel %vm852_vm3, %v1675_v54, 0.0 }
 0x453   :  { %1706 = vadd.xlane.f32.xlu1 %v1705_v16 }
 0x4c5   :  { %v1686_v18 = vpop.xlane.xlu1 %1685 }
 0x4c6   :  { %v1719_v24 = vrot.slane %v1686_v18, %v2270_v52 }
 0x4c8   :  { %v1689_v17 = vpop.xlane.xlu0 %1688 }
 0x4c9   :  { %v1723_v22 = vrot.slane %v1689_v17, %v2270_v52 }
 0x4cb   :  { %v1748_v43 = vsel %vm899_vm4, %v1723_v22, %v1719_v24 }
 0x4d1   :  { %v1698_v8 = vpop.xlane.xlu0 %1697 }
 0x4d2   :  { %v1735_v23 = vrot.slane %v1698_v8, %v2270_v52 }
 0x4d4   :  { %v1701_v20 = vpop.xlane.xlu1 %1700 }
 0x4d5   :  { %v1692_v21 = vpop.xlane.xlu0 %1691  ;;  %v1739_v27 = vrot.slane %v1701_v20, %v2270_v52 }
 0x4d6   :  { %v1727_v19 = vrot.slane %v1692_v21, %v2270_v52 }
 0x4d7   :  { %v1751_v2 = vsel %vm899_vm4, %v1739_v27, %v1735_v23 }
 0x4d8   :  { %v1704_v26 = vpop.xlane.xlu1 %1703  ;;  %v1749_v55 = vsel %vm901_vm5, %v1727_v19, %v1748_v43 }
 0x4d9   :  { %v1695_v28 = vpop.xlane.xlu0 %1694  ;;  %v1743_v30 = vrot.slane %v1704_v26, %v2270_v52 }
 0x4da   :  { %v1731_v31 = vrot.slane %v1695_v28, %v2270_v52 }
 0x4db   :  { %v1752_v62 = vsel %vm901_vm5, %v1743_v30, %v1751_v2 }
 0x4dc   :  { %v1707_v32 = vpop.xlane.xlu1 %1706  ;;  %v1750_v57 = vsel %vm903_vm6, %v1731_v31, %v1749_v55 }
 0x4dd   :  { %v1747_v33 = vrot.slane %v1707_v32, %v2270_v52  ;;  %v1756_v34 = vsel %vm923_vm8, %v1750_v57, 0.0 }
 0x4de   :  { %1758 = vst [vmem:[#allocation2] sm:$0xf] %v1756_v34 }
 0x4df   :  { %v1753_v35 = vsel %vm903_vm6, %v1747_v33, %v1752_v62 }
 0x4e0   :  { %v1757_v37 = vsel %vm923_vm8, %v1753_v35, 0.0 }
 0x4e1   :  { %1759 = vst [vmem:[#allocation2 + $0x4] sm:$0xf] %v1757_v37 }
 0x4e2   :  { %1980 = shalt.err (!%p1977_p4)
}
 0x4e3   :  { %s1998_s18 = smov 64   ;;  %s1999_s19 = smov 4  }
 0x4e4   :  { %1771 = dma.vmem_to_hbm [thread:$0]  %s1766_s16, 128, %s2448_s7, [#allocation3], %s1998_s18, %s1998_s18, %s1999_s19  }
 0x4e5   :  { %1989 = dma.done.wait [#allocation3], 128  }
 0x4e6   :  { %1990 = vsyncadd [#allocation3], 4294967168 }
 0x4e7   :  { %1775 = vsyncpa [#allocation3], 1 }

</bundles_post_ra>
